<compile_context>
chip_gen: v7x
topology: tpu7x:2x2x1
jax: 0.10.0
libtpu: 0.0.40
codegen_flags: <defaults>
</compile_context>

<pallas_src>
import functools

import jax
import jax.numpy as jnp
from jax.experimental import pallas as pl
from jax.experimental.pallas import tpu as pltpu

_OFF = 8  # sublane-aligned column offset of the data interior in the halo'd scratch


def _double_conv_kernel(x_ref, w1_ref, b1_ref, w2_ref, b2_ref, o_ref,
                        xbuf, mbuf, *, conv2_single_dot):
    """Fused (conv3x3 + BN + ReLU) x 2 for one image.

    x_ref : (1, H, W, Cin)       f32  input tile (straight from HBM)
    w1_ref: (9*Cin, Cmid_p)      bf16 conv1 weights, BN1 scale folded, im2col K layout
    b1_ref: (1, Cmid_p)          f32  folded BN1 bias (includes conv bias)
    w2_ref: (9*Cmid_p, Cout_p)   bf16 conv2 weights, BN2 scale folded, im2col K layout
    b2_ref: (1, Cout_p)          f32  folded BN2 bias
    o_ref : (1, H, W, Cout_p)    f32  lane-dense (channel-padded) output tile
    xbuf  : (H+2, Wp, Cin)       bf16 VMEM scratch, zero-halo input, interior at col _OFF
    mbuf  : (H+2, Wp, Cmid_p)    bf16 VMEM scratch, zero-halo intermediate
    """
    _, H, W, Cout_p = o_ref.shape
    Cin = x_ref.shape[3]
    Cmid_p = mbuf.shape[2]

    def zero_halo_ring(buf, c):
        # Zero only the halo cells the 3x3 stencil reads; the interior is
        # overwritten with data right after (no full-buffer memset).  Done every
        # grid step so the "parallel" batch grid stays correct on megacore.
        zrow = jnp.zeros((buf.shape[1], c), buf.dtype)
        buf[0] = zrow                                         # top halo row
        buf[H + 1] = zrow                                     # bottom halo row
        zcol = jnp.zeros((H, 1, c), buf.dtype)
        buf[1:H + 1, _OFF - 1:_OFF, :] = zcol                 # left halo column
        buf[1:H + 1, _OFF + W:_OFF + W + 1, :] = zcol         # right halo column

    def im2col(buf, c):
        # Hoist the 3 dx (sublane-axis) shifts out of the 9-tap construction;
        # the per-tap dy slices / reshapes only touch leading dims.  Tap order
        # (dy, dx) matches the HWIO -> (9*Cin, Cout) weight flattening.
        sh = [buf[:, _OFF - 1 + dx:_OFF - 1 + dx + W, :] for dx in range(3)]
        patches = [sh[dx][dy:dy + H].reshape(H * W, c)
                   for dy in range(3) for dx in range(3)]
        return jnp.concatenate(patches, axis=1)               # (H*W, 9*c) bf16

    # ---- stage 0: zero-halo bf16 input tile (interior store is sublane aligned)
    zero_halo_ring(xbuf, Cin)
    xbuf[1:H + 1, _OFF:_OFF + W, :] = x_ref[0].astype(xbuf.dtype)

    # ---- stage 1: conv1 as ONE im2col contraction (K = 9*Cin) + bias + ReLU
    y1 = jnp.dot(im2col(xbuf, Cin), w1_ref[...],
                 preferred_element_type=jnp.float32)
    y1 = jnp.maximum(y1 + b1_ref[...], 0.0)

    zero_halo_ring(mbuf, Cmid_p)
    mbuf[1:H + 1, _OFF:_OFF + W, :] = y1.reshape(H, W, Cmid_p).astype(mbuf.dtype)

    # ---- stage 2: conv2 + bias + ReLU
    if conv2_single_dot:
        # v6e / v7x (256-deep MXU): one K = 9*Cmid_p contraction fills the MXU
        # and removes the 8 per-tap f32 accumulator adds.
        acc = jnp.dot(im2col(mbuf, Cmid_p), w2_ref[...],
                      preferred_element_type=jnp.float32)
    else:
        # v5e (128-deep MXU): K = Cmid_p per tap is already perfectly shaped, so
        # skip the im2col staging copies.  dx loop outermost -> only one shifted
        # copy live at a time; acc initialised from the first tap's dot.
        acc = None
        for dx in range(3):
            sh = mbuf[:, _OFF - 1 + dx:_OFF - 1 + dx + W, :]
            for dy in range(3):
                patch = sh[dy:dy + H].reshape(H * W, Cmid_p)
                t = dy * 3 + dx
                d = jnp.dot(patch, w2_ref[t * Cmid_p:(t + 1) * Cmid_p, :],
                            preferred_element_type=jnp.float32)
                acc = d if acc is None else acc + d

    y2 = jnp.maximum(acc + b2_ref[...], 0.0)
    o_ref[0] = y2.reshape(H, W, Cout_p).astype(o_ref.dtype)


def _round_up(x, m):
    return ((x + m - 1) // m) * m


def _prep_conv_bn(w_oihw, conv_bias, gamma, beta, rmean, rvar,
                  cin_pad, cout_pad, eps=1e-5):
    """Fold eval-mode BN into (weights, bias), pad channels, flatten to im2col K."""
    s = gamma / jnp.sqrt(rvar + eps)                          # (Cout,)
    b = (conv_bias - rmean) * s + beta                        # (Cout,)
    w = jnp.transpose(w_oihw, (2, 3, 1, 0)) * s               # OIHW -> HWIO, scale folded
    cin, cout = w.shape[2], w.shape[3]
    w = jnp.pad(w, ((0, 0), (0, 0), (0, cin_pad - cin), (0, cout_pad - cout)))
    b = jnp.pad(b, (0, cout_pad - cout))
    return (w.reshape(9 * cin_pad, cout_pad).astype(jnp.bfloat16),
            b.reshape(1, cout_pad).astype(jnp.float32))


def _wide_k_conv2():
    """True on 256-deep-MXU chips (v6e / v7x); False on 128-deep MXUs (<= v5)."""
    try:
        kind = jax.devices()[0].device_kind.lower()
    except Exception:
        return True
    return not any(v in kind for v in ("v2", "v3", "v4", "v5"))


def double33conv(x_nchw, params):
    """Forward pass of Double33Conv (eval-mode BN).  NCHW in / NCHW out."""
    x = jnp.transpose(x_nchw, (0, 2, 3, 1))                   # NCHW -> NHWC
    N, H, W, Cin = x.shape
    Cout = params["w1"].shape[0]
    Cmid_p = _round_up(Cout, 128)                             # conv1 out / conv2 in
    Cout_p = _round_up(Cout, 128)                             # conv2 out (lane-dense)
    Wp = _OFF + _round_up(W + 1, 8)                           # halo'd scratch width

    w1, b1 = _prep_conv_bn(params["w1"], params["cb1"], params["g1"],
                           params["be1"], params["rm1"], params["rv1"],
                           cin_pad=Cin, cout_pad=Cmid_p)
    w2, b2 = _prep_conv_bn(params["w2"], params["cb2"], params["g2"],
                           params["be2"], params["rm2"], params["rv2"],
                           cin_pad=Cmid_p, cout_pad=Cout_p)

    kernel = functools.partial(_double_conv_kernel,
                               conv2_single_dot=_wide_k_conv2())

    out_p = pl.pallas_call(
        kernel,
        out_shape=jax.ShapeDtypeStruct((N, H, W, Cout_p), jnp.float32),
        grid_spec=pltpu.PrefetchScalarGridSpec(
            num_scalar_prefetch=0,
            grid=(N,),
            in_specs=[
                pl.BlockSpec((1, H, W, Cin), lambda n: (n, 0, 0, 0)),
                pl.BlockSpec((9 * Cin, Cmid_p), lambda n: (0, 0)),
                pl.BlockSpec((1, Cmid_p), lambda n: (0, 0)),
                pl.BlockSpec((9 * Cmid_p, Cout_p), lambda n: (0, 0)),
                pl.BlockSpec((1, Cout_p), lambda n: (0, 0)),
            ],
            out_specs=pl.BlockSpec((1, H, W, Cout_p), lambda n: (n, 0, 0, 0)),
            scratch_shapes=[
                pltpu.VMEM((H + 2, Wp, Cin), jnp.bfloat16),
                pltpu.VMEM((H + 2, Wp, Cmid_p), jnp.bfloat16),
            ],
        ),
        compiler_params=pltpu.CompilerParams(
            dimension_semantics=("parallel",),
            vmem_limit_bytes=64 * 1024 * 1024),
    )(x, w1, b1, w2, b2)

    out = out_p[..., :Cout]                                   # drop lane padding
    return jnp.transpose(out, (0, 3, 1, 2))                   # NHWC -> NCHW


# ---------------- reference (pure JAX, f32) for a numerical sanity check -----
def _fold_bn(conv_bias, gamma, beta, running_mean, running_var, eps=1e-5):
    s = gamma / jnp.sqrt(running_var + eps)
    b = (conv_bias - running_mean) * s + beta
    return s, b


def _ref_block(x_nhwc, w_hwio, scale, bias):
    y = jax.lax.conv_general_dilated(
        x_nhwc.astype(jnp.float32), w_hwio.astype(jnp.float32),
        window_strides=(1, 1), padding=((1, 1), (1, 1)),
        dimension_numbers=("NHWC", "HWIO", "NHWC"))
    y = y * scale + bias
    return jnp.maximum(y, 0.0)


def double33conv_ref(x_nchw, params):
    x = jnp.transpose(x_nchw, (0, 2, 3, 1))
    s1, b1 = _fold_bn(params["cb1"], params["g1"], params["be1"],
                      params["rm1"], params["rv1"])
    s2, b2 = _fold_bn(params["cb2"], params["g2"], params["be2"],
                      params["rm2"], params["rv2"])
    w1 = jnp.transpose(params["w1"], (2, 3, 1, 0))
    w2 = jnp.transpose(params["w2"], (2, 3, 1, 0))
    y = _ref_block(x, w1, s1, b1)
    y = _ref_block(y, w2, s2, b2)
    return jnp.transpose(y, (0, 3, 1, 2))


def make_params(key, in_ch, out_ch):
    ks = jax.random.split(key, 12)
    p = {
        # Conv2d(in_ch, out_ch, 3, padding=1) weights (OIHW) + bias
        "w1": 0.1 * jax.random.normal(ks[0], (out_ch, in_ch, 3, 3), jnp.float32),
        "cb1": 0.1 * jax.random.normal(ks[1], (out_ch,), jnp.float32),
        # BatchNorm2d(out_ch): gamma, beta, running stats
        "g1": 1.0 + 0.1 * jax.random.normal(ks[2], (out_ch,), jnp.float32),
        "be1": 0.1 * jax.random.normal(ks[3], (out_ch,), jnp.float32),
        "rm1": 0.05 * jax.random.normal(ks[4], (out_ch,), jnp.float32),
        "rv1": 1.0 + 0.1 * jax.random.uniform(ks[5], (out_ch,), jnp.float32),
        # Conv2d(out_ch, out_ch, 3, padding=1)
        "w2": 0.1 * jax.random.normal(ks[6], (out_ch, out_ch, 3, 3), jnp.float32),
        "cb2": 0.1 * jax.random.normal(ks[7], (out_ch,), jnp.float32),
        "g2": 1.0 + 0.1 * jax.random.normal(ks[8], (out_ch,), jnp.float32),
        "be2": 0.1 * jax.random.normal(ks[9], (out_ch,), jnp.float32),
        "rm2": 0.05 * jax.random.normal(ks[10], (out_ch,), jnp.float32),
        "rv2": 1.0 + 0.1 * jax.random.uniform(ks[11], (out_ch,), jnp.float32),
    }
    return p


if __name__ == "__main__":
    key = jax.random.PRNGKey(0)
    k_x, k_p = jax.random.split(key)

    N, IN_CH, OUT_CH, H, W = 2, 4, 8, 16, 16
    x = jax.random.normal(k_x, (N, IN_CH, H, W), jnp.float32)  # NCHW like PyTorch
    params = make_params(k_p, IN_CH, OUT_CH)

    out = jax.jit(double33conv)(x, params)
    out = jax.block_until_ready(out)

    ref = double33conv_ref(x, params)
    assert out.shape == (N, OUT_CH, H, W), out.shape
    # bf16 MXU operands with f32 accumulation -> looser tolerance than pure f32.
    err = float(jnp.max(jnp.abs(out - ref)))
    assert jnp.allclose(out, ref, atol=5e-2, rtol=5e-2), (
        f"mismatch vs reference, max abs err = {err}")

    print("KERNEL_OK")
</pallas_src>

<mosaic_0001>
module attributes {stable_mosaic.version = 11 : i64} {
  func.func @_double_conv_kernel(%arg0: i32, %arg1: memref<1x16x16x4xf32, #tpu.memory_space<vmem>>, %arg2: memref<36x128xbf16, #tpu.memory_space<vmem>>, %arg3: memref<1x128xf32, #tpu.memory_space<vmem>>, %arg4: memref<1152x128xbf16, #tpu.memory_space<vmem>>, %arg5: memref<1x128xf32, #tpu.memory_space<vmem>>, %arg6: memref<1x16x16x128xf32, #tpu.memory_space<vmem>>, %arg7: memref<18x32x4xbf16, #tpu.memory_space<vmem>>, %arg8: memref<18x32x128xbf16, #tpu.memory_space<vmem>>) attributes {dimension_semantics = [#tpu.dimension_semantics<parallel>], iteration_bounds = array<i64: 2>, scalar_prefetch = 0 : i64, scratch_operands = 2 : i64, tpu.core_type = #tpu.core_type<tc>, window_params = [{transform_indices = @transform_0, window_bounds = array<i64: 1, 16, 16, 4>}, {pipeline_mode = #tpu.pipeline_mode<synchronous>, transform_indices = @transform_1, window_bounds = array<i64: 36, 128>}, {pipeline_mode = #tpu.pipeline_mode<synchronous>, transform_indices = @transform_2, window_bounds = array<i64: 1, 128>}, {pipeline_mode = #tpu.pipeline_mode<synchronous>, transform_indices = @transform_3, window_bounds = array<i64: 1152, 128>}, {pipeline_mode = #tpu.pipeline_mode<synchronous>, transform_indices = @transform_4, window_bounds = array<i64: 1, 128>}, {transform_indices = @transform_5, window_bounds = array<i64: 1, 16, 16, 128>}]} {
    %cst = arith.constant 0.000000e+00 : bf16
    %0 = vector.broadcast %cst : bf16 to vector<32x4xbf16>
    %c0 = arith.constant 0 : index
    %c0_0 = arith.constant 0 : index
    %c0_1 = arith.constant 0 : index
    %1 = vector.load %arg7[%c0, %c0_0, %c0_1] : memref<18x32x4xbf16, #tpu.memory_space<vmem>>, vector<1x32x4xbf16>
    %2 = vector.shape_cast %1 : vector<1x32x4xbf16> to vector<32x4xbf16>
    %3 = vector.shape_cast %0 : vector<32x4xbf16> to vector<1x32x4xbf16>
    tpu.vector_store %arg7[%c0, %c0_0, %c0_1], %3 {strides = array<i32>} : memref<18x32x4xbf16, #tpu.memory_space<vmem>>, vector<1x32x4xbf16>,
    %c17 = arith.constant 17 : index
    %c0_2 = arith.constant 0 : index
    %c0_3 = arith.constant 0 : index
    %4 = vector.load %arg7[%c17, %c0_2, %c0_3] : memref<18x32x4xbf16, #tpu.memory_space<vmem>>, vector<1x32x4xbf16>
    %5 = vector.shape_cast %4 : vector<1x32x4xbf16> to vector<32x4xbf16>
    %6 = vector.shape_cast %0 : vector<32x4xbf16> to vector<1x32x4xbf16>
    tpu.vector_store %arg7[%c17, %c0_2, %c0_3], %6 {strides = array<i32>} : memref<18x32x4xbf16, #tpu.memory_space<vmem>>, vector<1x32x4xbf16>,
    %cst_4 = arith.constant 0.000000e+00 : bf16
    %7 = vector.broadcast %cst_4 : bf16 to vector<16x1x4xbf16>
    %c1 = arith.constant 1 : index
    %c7 = arith.constant 7 : index
    %c0_5 = arith.constant 0 : index
    %8 = vector.load %arg7[%c1, %c7, %c0_5] : memref<18x32x4xbf16, #tpu.memory_space<vmem>>, vector<16x1x4xbf16>
    tpu.vector_store %arg7[%c1, %c7, %c0_5], %7 {strides = array<i32>} : memref<18x32x4xbf16, #tpu.memory_space<vmem>>, vector<16x1x4xbf16>,
    %c1_6 = arith.constant 1 : index
    %c24 = arith.constant 24 : index
    %c0_7 = arith.constant 0 : index
    %9 = vector.load %arg7[%c1_6, %c24, %c0_7] : memref<18x32x4xbf16, #tpu.memory_space<vmem>>, vector<16x1x4xbf16>
    tpu.vector_store %arg7[%c1_6, %c24, %c0_7], %7 {strides = array<i32>} : memref<18x32x4xbf16, #tpu.memory_space<vmem>>, vector<16x1x4xbf16>,
    %c0_8 = arith.constant 0 : index
    %c0_9 = arith.constant 0 : index
    %c0_10 = arith.constant 0 : index
    %c0_11 = arith.constant 0 : index
    %10 = vector.load %arg1[%c0_8, %c0_9, %c0_10, %c0_11] : memref<1x16x16x4xf32, #tpu.memory_space<vmem>>, vector<1x16x16x4xf32>
    %11 = vector.shape_cast %10 : vector<1x16x16x4xf32> to vector<16x16x4xf32>
    %12 = arith.truncf %11 : vector<16x16x4xf32> to vector<16x16x4xbf16>
    %c1_12 = arith.constant 1 : index
    %c8 = arith.constant 8 : index
    %c0_13 = arith.constant 0 : index
    %13 = vector.load %arg7[%c1_12, %c8, %c0_13] : memref<18x32x4xbf16, #tpu.memory_space<vmem>>, vector<16x16x4xbf16>
    tpu.vector_store %arg7[%c1_12, %c8, %c0_13], %12 {strides = array<i32>} : memref<18x32x4xbf16, #tpu.memory_space<vmem>>, vector<16x16x4xbf16>,
    %c0_14 = arith.constant 0 : index
    %c7_15 = arith.constant 7 : index
    %c0_16 = arith.constant 0 : index
    %14 = vector.load %arg7[%c0_14, %c7_15, %c0_16] : memref<18x32x4xbf16, #tpu.memory_space<vmem>>, vector<18x16x4xbf16>
    %c0_17 = arith.constant 0 : index
    %c8_18 = arith.constant 8 : index
    %c0_19 = arith.constant 0 : index
    %15 = vector.load %arg7[%c0_17, %c8_18, %c0_19] : memref<18x32x4xbf16, #tpu.memory_space<vmem>>, vector<18x16x4xbf16>
    %c0_20 = arith.constant 0 : index
    %c9 = arith.constant 9 : index
    %c0_21 = arith.constant 0 : index
    %16 = vector.load %arg7[%c0_20, %c9, %c0_21] : memref<18x32x4xbf16, #tpu.memory_space<vmem>>, vector<18x16x4xbf16>
    %17 = vector.extract_strided_slice %14 {offsets = [0, 0, 0], sizes = [16, 16, 4], strides = [1, 1, 1]} : vector<18x16x4xbf16> to vector<16x16x4xbf16>
    %18 = vector.shape_cast %17 : vector<16x16x4xbf16> to vector<256x4xbf16>
    %19 = vector.extract_strided_slice %15 {offsets = [0, 0, 0], sizes = [16, 16, 4], strides = [1, 1, 1]} : vector<18x16x4xbf16> to vector<16x16x4xbf16>
    %20 = vector.shape_cast %19 : vector<16x16x4xbf16> to vector<256x4xbf16>
    %21 = vector.extract_strided_slice %16 {offsets = [0, 0, 0], sizes = [16, 16, 4], strides = [1, 1, 1]} : vector<18x16x4xbf16> to vector<16x16x4xbf16>
    %22 = vector.shape_cast %21 : vector<16x16x4xbf16> to vector<256x4xbf16>
    %23 = vector.extract_strided_slice %14 {offsets = [1, 0, 0], sizes = [16, 16, 4], strides = [1, 1, 1]} : vector<18x16x4xbf16> to vector<16x16x4xbf16>
    %24 = vector.shape_cast %23 : vector<16x16x4xbf16> to vector<256x4xbf16>
    %25 = vector.extract_strided_slice %15 {offsets = [1, 0, 0], sizes = [16, 16, 4], strides = [1, 1, 1]} : vector<18x16x4xbf16> to vector<16x16x4xbf16>
    %26 = vector.shape_cast %25 : vector<16x16x4xbf16> to vector<256x4xbf16>
    %27 = vector.extract_strided_slice %16 {offsets = [1, 0, 0], sizes = [16, 16, 4], strides = [1, 1, 1]} : vector<18x16x4xbf16> to vector<16x16x4xbf16>
    %28 = vector.shape_cast %27 : vector<16x16x4xbf16> to vector<256x4xbf16>
    %29 = vector.extract_strided_slice %14 {offsets = [2, 0, 0], sizes = [16, 16, 4], strides = [1, 1, 1]} : vector<18x16x4xbf16> to vector<16x16x4xbf16>
    %30 = vector.shape_cast %29 : vector<16x16x4xbf16> to vector<256x4xbf16>
    %31 = vector.extract_strided_slice %15 {offsets = [2, 0, 0], sizes = [16, 16, 4], strides = [1, 1, 1]} : vector<18x16x4xbf16> to vector<16x16x4xbf16>
    %32 = vector.shape_cast %31 : vector<16x16x4xbf16> to vector<256x4xbf16>
    %33 = vector.extract_strided_slice %16 {offsets = [2, 0, 0], sizes = [16, 16, 4], strides = [1, 1, 1]} : vector<18x16x4xbf16> to vector<16x16x4xbf16>
    %34 = vector.shape_cast %33 : vector<16x16x4xbf16> to vector<256x4xbf16>
    %35 = tpu.concatenate %18, %20, %22, %24, %26, %28, %30, %32, %34 in 1 : vector<256x4xbf16>, vector<256x4xbf16>, vector<256x4xbf16>, vector<256x4xbf16>, vector<256x4xbf16>, vector<256x4xbf16>, vector<256x4xbf16>, vector<256x4xbf16>, vector<256x4xbf16> -> vector<256x36xbf16>
    %c0_22 = arith.constant 0 : index
    %c0_23 = arith.constant 0 : index
    %36 = vector.load %arg2[%c0_22, %c0_23] : memref<36x128xbf16, #tpu.memory_space<vmem>>, vector<36x128xbf16>
    %cst_24 = arith.constant dense<0.000000e+00> : vector<256x128xf32>
    %37 = tpu.matmul %35, %36, %cst_24 {dimension_numbers = #tpu.dot_dimension_numbers<[1], [0], [0], [1], [0, 0, 1, 1], [], []>} : vector<256x36xbf16>, vector<36x128xbf16>, vector<256x128xf32> -> vector<256x128xf32>
    %c0_25 = arith.constant 0 : index
    %c0_26 = arith.constant 0 : index
    %38 = vector.load %arg3[%c0_25, %c0_26] : memref<1x128xf32, #tpu.memory_space<vmem>>, vector<1x128xf32>
    %39 = vector.broadcast %38 : vector<1x128xf32> to vector<256x128xf32>
    %40 = arith.addf %37, %39 : vector<256x128xf32>
    %cst_27 = arith.constant 0.000000e+00 : f32
    %41 = vector.broadcast %cst_27 : f32 to vector<256x128xf32>
    %42 = arith.maximumf %40, %41 : vector<256x128xf32>
    %cst_28 = arith.constant 0.000000e+00 : bf16
    %43 = vector.broadcast %cst_28 : bf16 to vector<32x128xbf16>
    %c0_29 = arith.constant 0 : index
    %c0_30 = arith.constant 0 : index
    %c0_31 = arith.constant 0 : index
    %44 = vector.load %arg8[%c0_29, %c0_30, %c0_31] : memref<18x32x128xbf16, #tpu.memory_space<vmem>>, vector<1x32x128xbf16>
    %45 = vector.shape_cast %44 : vector<1x32x128xbf16> to vector<32x128xbf16>
    %46 = vector.shape_cast %43 : vector<32x128xbf16> to vector<1x32x128xbf16>
    tpu.vector_store %arg8[%c0_29, %c0_30, %c0_31], %46 {strides = array<i32>} : memref<18x32x128xbf16, #tpu.memory_space<vmem>>, vector<1x32x128xbf16>,
    %c17_32 = arith.constant 17 : index
    %c0_33 = arith.constant 0 : index
    %c0_34 = arith.constant 0 : index
    %47 = vector.load %arg8[%c17_32, %c0_33, %c0_34] : memref<18x32x128xbf16, #tpu.memory_space<vmem>>, vector<1x32x128xbf16>
    %48 = vector.shape_cast %47 : vector<1x32x128xbf16> to vector<32x128xbf16>
    %49 = vector.shape_cast %43 : vector<32x128xbf16> to vector<1x32x128xbf16>
    tpu.vector_store %arg8[%c17_32, %c0_33, %c0_34], %49 {strides = array<i32>} : memref<18x32x128xbf16, #tpu.memory_space<vmem>>, vector<1x32x128xbf16>,
    %cst_35 = arith.constant 0.000000e+00 : bf16
    %50 = vector.broadcast %cst_35 : bf16 to vector<16x1x128xbf16>
    %c1_36 = arith.constant 1 : index
    %c7_37 = arith.constant 7 : index
    %c0_38 = arith.constant 0 : index
    %51 = vector.load %arg8[%c1_36, %c7_37, %c0_38] : memref<18x32x128xbf16, #tpu.memory_space<vmem>>, vector<16x1x128xbf16>
    tpu.vector_store %arg8[%c1_36, %c7_37, %c0_38], %50 {strides = array<i32>} : memref<18x32x128xbf16, #tpu.memory_space<vmem>>, vector<16x1x128xbf16>,
    %c1_39 = arith.constant 1 : index
    %c24_40 = arith.constant 24 : index
    %c0_41 = arith.constant 0 : index
    %52 = vector.load %arg8[%c1_39, %c24_40, %c0_41] : memref<18x32x128xbf16, #tpu.memory_space<vmem>>, vector<16x1x128xbf16>
    tpu.vector_store %arg8[%c1_39, %c24_40, %c0_41], %50 {strides = array<i32>} : memref<18x32x128xbf16, #tpu.memory_space<vmem>>, vector<16x1x128xbf16>,
    %53 = vector.shape_cast %42 : vector<256x128xf32> to vector<16x16x128xf32>
    %54 = arith.truncf %53 : vector<16x16x128xf32> to vector<16x16x128xbf16>
    %c1_42 = arith.constant 1 : index
    %c8_43 = arith.constant 8 : index
    %c0_44 = arith.constant 0 : index
    %55 = vector.load %arg8[%c1_42, %c8_43, %c0_44] : memref<18x32x128xbf16, #tpu.memory_space<vmem>>, vector<16x16x128xbf16>
    tpu.vector_store %arg8[%c1_42, %c8_43, %c0_44], %54 {strides = array<i32>} : memref<18x32x128xbf16, #tpu.memory_space<vmem>>, vector<16x16x128xbf16>,
    %c0_45 = arith.constant 0 : index
    %c7_46 = arith.constant 7 : index
    %c0_47 = arith.constant 0 : index
    %56 = vector.load %arg8[%c0_45, %c7_46, %c0_47] : memref<18x32x128xbf16, #tpu.memory_space<vmem>>, vector<18x16x128xbf16>
    %c0_48 = arith.constant 0 : index
    %c8_49 = arith.constant 8 : index
    %c0_50 = arith.constant 0 : index
    %57 = vector.load %arg8[%c0_48, %c8_49, %c0_50] : memref<18x32x128xbf16, #tpu.memory_space<vmem>>, vector<18x16x128xbf16>
    %c0_51 = arith.constant 0 : index
    %c9_52 = arith.constant 9 : index
    %c0_53 = arith.constant 0 : index
    %58 = vector.load %arg8[%c0_51, %c9_52, %c0_53] : memref<18x32x128xbf16, #tpu.memory_space<vmem>>, vector<18x16x128xbf16>
    %59 = vector.extract_strided_slice %56 {offsets = [0, 0, 0], sizes = [16, 16, 128], strides = [1, 1, 1]} : vector<18x16x128xbf16> to vector<16x16x128xbf16>
    %60 = vector.shape_cast %59 : vector<16x16x128xbf16> to vector<256x128xbf16>
    %61 = vector.extract_strided_slice %57 {offsets = [0, 0, 0], sizes = [16, 16, 128], strides = [1, 1, 1]} : vector<18x16x128xbf16> to vector<16x16x128xbf16>
    %62 = vector.shape_cast %61 : vector<16x16x128xbf16> to vector<256x128xbf16>
    %63 = vector.extract_strided_slice %58 {offsets = [0, 0, 0], sizes = [16, 16, 128], strides = [1, 1, 1]} : vector<18x16x128xbf16> to vector<16x16x128xbf16>
    %64 = vector.shape_cast %63 : vector<16x16x128xbf16> to vector<256x128xbf16>
    %65 = vector.extract_strided_slice %56 {offsets = [1, 0, 0], sizes = [16, 16, 128], strides = [1, 1, 1]} : vector<18x16x128xbf16> to vector<16x16x128xbf16>
    %66 = vector.shape_cast %65 : vector<16x16x128xbf16> to vector<256x128xbf16>
    %67 = vector.extract_strided_slice %57 {offsets = [1, 0, 0], sizes = [16, 16, 128], strides = [1, 1, 1]} : vector<18x16x128xbf16> to vector<16x16x128xbf16>
    %68 = vector.shape_cast %67 : vector<16x16x128xbf16> to vector<256x128xbf16>
    %69 = vector.extract_strided_slice %58 {offsets = [1, 0, 0], sizes = [16, 16, 128], strides = [1, 1, 1]} : vector<18x16x128xbf16> to vector<16x16x128xbf16>
    %70 = vector.shape_cast %69 : vector<16x16x128xbf16> to vector<256x128xbf16>
    %71 = vector.extract_strided_slice %56 {offsets = [2, 0, 0], sizes = [16, 16, 128], strides = [1, 1, 1]} : vector<18x16x128xbf16> to vector<16x16x128xbf16>
    %72 = vector.shape_cast %71 : vector<16x16x128xbf16> to vector<256x128xbf16>
    %73 = vector.extract_strided_slice %57 {offsets = [2, 0, 0], sizes = [16, 16, 128], strides = [1, 1, 1]} : vector<18x16x128xbf16> to vector<16x16x128xbf16>
    %74 = vector.shape_cast %73 : vector<16x16x128xbf16> to vector<256x128xbf16>
    %75 = vector.extract_strided_slice %58 {offsets = [2, 0, 0], sizes = [16, 16, 128], strides = [1, 1, 1]} : vector<18x16x128xbf16> to vector<16x16x128xbf16>
    %76 = vector.shape_cast %75 : vector<16x16x128xbf16> to vector<256x128xbf16>
    %77 = tpu.concatenate %60, %62, %64, %66, %68, %70, %72, %74, %76 in 1 : vector<256x128xbf16>, vector<256x128xbf16>, vector<256x128xbf16>, vector<256x128xbf16>, vector<256x128xbf16>, vector<256x128xbf16>, vector<256x128xbf16>, vector<256x128xbf16>, vector<256x128xbf16> -> vector<256x1152xbf16>
    %c0_54 = arith.constant 0 : index
    %c0_55 = arith.constant 0 : index
    %78 = vector.load %arg4[%c0_54, %c0_55] : memref<1152x128xbf16, #tpu.memory_space<vmem>>, vector<1152x128xbf16>
    %cst_56 = arith.constant dense<0.000000e+00> : vector<256x128xf32>
    %79 = tpu.matmul %77, %78, %cst_56 {dimension_numbers = #tpu.dot_dimension_numbers<[1], [0], [0], [1], [0, 0, 1, 1], [], []>} : vector<256x1152xbf16>, vector<1152x128xbf16>, vector<256x128xf32> -> vector<256x128xf32>
    %c0_57 = arith.constant 0 : index
    %c0_58 = arith.constant 0 : index
    %80 = vector.load %arg5[%c0_57, %c0_58] : memref<1x128xf32, #tpu.memory_space<vmem>>, vector<1x128xf32>
    %81 = vector.broadcast %80 : vector<1x128xf32> to vector<256x128xf32>
    %82 = arith.addf %79, %81 : vector<256x128xf32>
    %cst_59 = arith.constant 0.000000e+00 : f32
    %83 = vector.broadcast %cst_59 : f32 to vector<256x128xf32>
    %84 = arith.maximumf %82, %83 : vector<256x128xf32>
    %85 = vector.shape_cast %84 : vector<256x128xf32> to vector<16x16x128xf32>
    %c0_60 = arith.constant 0 : index
    %c0_61 = arith.constant 0 : index
    %c0_62 = arith.constant 0 : index
    %c0_63 = arith.constant 0 : index
    %86 = vector.load %arg6[%c0_60, %c0_61, %c0_62, %c0_63] : memref<1x16x16x128xf32, #tpu.memory_space<vmem>>, vector<1x16x16x128xf32>
    %87 = vector.shape_cast %86 : vector<1x16x16x128xf32> to vector<16x16x128xf32>
    %88 = vector.shape_cast %85 : vector<16x16x128xf32> to vector<1x16x16x128xf32>
    tpu.vector_store %arg6[%c0_60, %c0_61, %c0_62, %c0_63], %88 {strides = array<i32>} : memref<1x16x16x128xf32, #tpu.memory_space<vmem>>, vector<1x16x16x128xf32>,
    return
  }
  func.func @transform_0(%arg0: i32) -> (i32, i32, i32, i32) {
    %c0_i32 = arith.constant 0 : i32
    %c0_i32_0 = arith.constant 0 : i32
    %c0_i32_1 = arith.constant 0 : i32
    %c0_i32_2 = arith.constant 0 : i32
    return %arg0, %c0_i32, %c0_i32_0, %c0_i32_1 : i32, i32, i32, i32
  }
  func.func @transform_1(%arg0: i32) -> (i32, i32) {
    %c0_i32 = arith.constant 0 : i32
    %c0_i32_0 = arith.constant 0 : i32
    %c0_i32_1 = arith.constant 0 : i32
    return %c0_i32, %c0_i32_0 : i32, i32
  }
  func.func @transform_2(%arg0: i32) -> (i32, i32) {
    %c0_i32 = arith.constant 0 : i32
    %c0_i32_0 = arith.constant 0 : i32
    %c0_i32_1 = arith.constant 0 : i32
    return %c0_i32, %c0_i32_0 : i32, i32
  }
  func.func @transform_3(%arg0: i32) -> (i32, i32) {
    %c0_i32 = arith.constant 0 : i32
    %c0_i32_0 = arith.constant 0 : i32
    %c0_i32_1 = arith.constant 0 : i32
    return %c0_i32, %c0_i32_0 : i32, i32
  }
  func.func @transform_4(%arg0: i32) -> (i32, i32) {
    %c0_i32 = arith.constant 0 : i32
    %c0_i32_0 = arith.constant 0 : i32
    %c0_i32_1 = arith.constant 0 : i32
    return %c0_i32, %c0_i32_0 : i32, i32
  }
  func.func @transform_5(%arg0: i32) -> (i32, i32, i32, i32) {
    %c0_i32 = arith.constant 0 : i32
    %c0_i32_0 = arith.constant 0 : i32
    %c0_i32_1 = arith.constant 0 : i32
    %c0_i32_2 = arith.constant 0 : i32
    return %arg0, %c0_i32, %c0_i32_0, %c0_i32_1 : i32, i32, i32, i32
  }
}

</mosaic_0001>

<bundles_post_ra>
// kernel: double33conv.1
= control target key start
LH: loop header
LB: loop body
LE: loop exit
PB: predicated region body
PF: predicated region fallthrough
CT: control target
= control target key end

     0   :  { %10 = vsyncpa [#allocation5], 0  ;;  %s7834_s0 = inlined_call_operand.hbm [shape: f32[2,16,16,4], index: 0, kind: input, shape index: {}]   ;;  %s7835_s1 = inlined_call_operand.hbm [shape: bf16[36,128], index: 1, kind: input, shape index: {}]   ;;  %s7836_s2 = inlined_call_operand.hbm [shape: f32[1,128], index: 2, kind: input, shape index: {}]   ;;  %s7837_s3 = inlined_call_operand.hbm [shape: bf16[1152,128], index: 3, kind: input, shape index: {}]   ;;  %s7838_s4 = inlined_call_operand.hbm [shape: f32[1,128], index: 4, kind: input, shape index: {}]   ;;  %s7839_s5 = inlined_call_operand.hbm [shape: f32[2,16,16,128], index: 5, kind: output, shape index: {}]  }
   0x1   :  { %12 = vsyncpa [#allocation5 + $0x1], 0 }
   0x2   :  { %13 = vsyncpa [#allocation8], 0 }
   0x3   :  { %14 = vsyncpa [#allocation11], 0 }
   0x4   :  { %15 = vsyncpa [#allocation6], 0 }
   0x5   :  { %17 = vsyncpa [#allocation6 + $0x1], 0  ;;  %s5869_s18 = smov 0   ;;  %s5871_s19 = smov 0  }
   0x6   :  { %s5873_s20 = smov 0   ;;  %s5875_s21 = smov 0  }
   0x7 LB: > { %s5890_s22 = sadd.s32 4294967295, %s5817_s21   ;;  %s4712_s23 = sadd.s32 4294967294, %s5817_s21   ;;  %s5817_s21 = sphi %s5875_s21, %s7924_s21   ;;  %s5813_s20 = sphi %s5873_s20, %s7923_s20   ;;  %s5809_s19 = sphi %s5871_s19, %s7922_s19   ;;  %s5805_s18 = sphi %s5869_s18, %s7921_s18  }
   0x8   : > { %p43_p0 = scmp.ne.s32.totalorder %s5809_s19, %s5805_s18  ;;  %p7840_p1 = scmp.eq.s32.totalorder %s5890_s22, 0 }
   0x9   : > { %p157_p3 = scmp.eq.s32.totalorder %s4712_s23, 1  ;;  %p4713_p5 = scmp.ge.s32.totalorder %s5817_s21, 1 }
   0xa   : > { %p5899_p4 = por %p7840_p1, %p43_p0  ;;  %p164_p7 = scmp.lt.s32.totalorder %s5817_s21, 3 }
   0xb   : > { %p5904_p6 = por %p157_p3, %p43_p0  ;;  %s5819_s27 = smov [#allocation7]  }
   0xc   : > { %s7865_s24 = scalar_select %p5899_p4, 1, 0 }
   0xd   : > { %s7866_s25 = scalar_select %p5904_p6, 1, 0 }
   0xe   : > { %p5909_p8 = pnand %p4713_p5, %p164_p7  ;;  %s176_s28 = sshll.u32 %s5819_s27, 4  ;;  %s5913_s28 = int_to_ptr.vmem [resolvable:$true] %s176_s28 }
   0xf   : > { %s5820_s30 = smov [#allocation10]   ;;  %s5821_s7 = smov [#allocation9]  }
  0x10   : > { %s7867_s26 = scalar_select %p5909_p8, 1, 0 }
  0x11   : > { %p5443_p9 = pneg %p5909_p8  ;;  %s200_s6 = sshll.u32 %s5820_s30, 4  ;;  %s5924_s6 = int_to_ptr.vmem [resolvable:$true] %s200_s6 }
  0x12   : > { %s5926_s8 = sshll.u32 %s5821_s7, 4  ;;  %s5601_s11 = scalar_lea.hbm %s7835_s1, 320  ;;  %s191_s8 = int_to_ptr.vmem [resolvable:$true] %s5926_s8 }
  0x13   : > { %p5920_p11 = pnand %p5443_p9, %p7840_p1  ;;  %p5602_p12 = scmp.ne.s32.totalorder %s7835_s1, %s5601_s11 }
  0x14   : > { %p5608_p5 = scmp.lt.u32.totalorder %s5601_s11, %s7835_s1 }
  0x15   : > { %p5936_p13 = pneg %p5920_p11 }
  0x17   : > { %p5604_p0 = pnand %p5936_p13, %p5602_p12 }
  0x19   : > { %p5605_p3 = pneg %p5604_p0 }
  0x1b   : > { %p5610_p7 = pnand %p5608_p5, %p5605_p3 }
  0x1d   : > { %5613 = shalt.err (!%p5610_p7)
}
  0x1e   : > { %s5614_s17 = scalar_lea.vmem %s5913_s28, 320  ;;  %p5622_p2 = scmp.lt.s32.totalorder %s5913_s28, %s5913_s28 }
  0x1f   : > { %p5615_p9 = scmp.ne.s32.totalorder %s5913_s28, %s5614_s17  ;;  %p5623_p6 = scmp.lt.s32.totalorder %s5614_s17, %s5614_s17 }
  0x21   : > { %p5617_p10 = pnand %p5615_p9, %p5936_p13  ;;  %p5624_p12 = por %p5623_p6, %p5622_p2 }
  0x23   : > { %p5618_p1 = pneg %p5617_p10 }
  0x25   : > { %p5625_p0 = pnand %p5624_p12, %p5618_p1 }
  0x27   : > { %5628 = shalt.err (!%p5625_p0)
}
  0x28   : > { %s5822_s23 = smov 64   ;;  %s5823_s27 = smov 4  }
  0x29   : > { %5446 = dma.hbm_to_vmem [thread:$0]  (!%p5920_p11), %s7835_s1, 320, %s5913_s28, [#allocation8], %s5822_s23, %s5822_s23, %s5823_s27  }
  0x2a   : > { %s5629_s11 = scalar_lea.hbm %s7837_s3, 9216 }
  0x2b   : > { %p5630_p2 = scmp.ne.s32.totalorder %s7837_s3, %s5629_s11  ;;  %p5636_p10 = scmp.lt.u32.totalorder %s5629_s11, %s7837_s3 }
  0x2d   : > { %p5632_p1 = pnand %p5630_p2, %p5936_p13 }
  0x2f   : > { %p5633_p6 = pneg %p5632_p1 }
  0x31   : > { %p5638_p3 = pnand %p5636_p10, %p5633_p6 }
  0x33   : > { %5641 = shalt.err (!%p5638_p3)
}
  0x34   : > { %s5642_s28 = scalar_lea.vmem %s5924_s6, 9216  ;;  %p5650_p12 = scmp.lt.s32.totalorder %s5924_s6, %s5924_s6 }
  0x35   : > { %p5643_p5 = scmp.ne.s32.totalorder %s5924_s6, %s5642_s28  ;;  %p5651_p0 = scmp.lt.s32.totalorder %s5642_s28, %s5642_s28 }
  0x37   : > { %p5645_p7 = pnand %p5643_p5, %p5936_p13  ;;  %p5652_p2 = por %p5651_p0, %p5650_p12 }
  0x39   : > { %p5646_p9 = pneg %p5645_p7 }
  0x3b   : > { %p5653_p1 = pnand %p5652_p2, %p5646_p9 }
  0x3d   : > { %5656 = shalt.err (!%p5653_p1)
}
  0x3e   : > { %5452 = dma.hbm_to_vmem [thread:$0]  (!%p5920_p11), %s7837_s3, 9216, %s5924_s6, [#allocation11], %s5822_s23, %s5822_s23, %s5823_s27  }
  0x3f   : > { %s5657_s10 = scalar_lea.hbm %s7836_s2, 16 }
  0x40   : > { %p5658_p6 = scmp.ne.s32.totalorder %s7836_s2, %s5657_s10  ;;  %p5664_p5 = scmp.lt.u32.totalorder %s5657_s10, %s7836_s2 }
  0x42   : > { %p5660_p10 = pnand %p5658_p6, %p5936_p13 }
  0x44   : > { %p5661_p3 = pneg %p5660_p10 }
  0x46   : > { %p5666_p7 = pnand %p5664_p5, %p5661_p3 }
  0x48   : > { %5669 = shalt.err (!%p5666_p7)
}
  0x49   : > { %s5670_s16 = scalar_lea.vmem %s191_s8, 16  ;;  %s5677_s6 = scalar_lea.vmem %s191_s8, 32 }
  0x4a   : > { %p5671_p9 = scmp.ne.s32.totalorder %s191_s8, %s5670_s16  ;;  %p5678_p2 = scmp.lt.s32.totalorder %s191_s8, %s191_s8 }
  0x4b   : > { %p5679_p1 = scmp.lt.s32.totalorder %s5677_s6, %s5670_s16 }
  0x4c   : > { %p5673_p12 = pnand %p5671_p9, %p5936_p13 }
  0x4d   : > { %p5680_p4 = por %p5679_p1, %p5678_p2 }
  0x4e   : > { %p5674_p0 = pneg %p5673_p12 }
  0x50   : > { %p5681_p8 = pnand %p5680_p4, %p5674_p0 }
  0x52   : > { %5684 = shalt.err (!%p5681_p8)
}
  0x53   : > { %5449 = dma.hbm_to_vmem [thread:$0]  (!%p5920_p11), %s7836_s2, 16, %s191_s8, [#allocation8]  }
  0x54   : > { %s5824_s28 = smov [#allocation12]   ;;  %s5685_s9 = scalar_lea.hbm %s7838_s4, 16 }
  0x55   : > { %s214_s17 = sshll.u32 %s5824_s28, 4  ;;  %p5686_p6 = scmp.ne.s32.totalorder %s7838_s4, %s5685_s9  ;;  %s215_s17 = int_to_ptr.vmem [resolvable:$true] %s214_s17 }
  0x56   : > { %p5692_p10 = scmp.lt.u32.totalorder %s5685_s9, %s7838_s4 }
  0x57   : > { %p5688_p4 = pnand %p5686_p6, %p5936_p13 }
  0x59   : > { %p5689_p8 = pneg %p5688_p4 }
  0x5b   : > { %p5694_p3 = pnand %p5692_p10, %p5689_p8 }
  0x5d   : > { %5697 = shalt.err (!%p5694_p3)
}
  0x5e   : > { %s5698_s8 = scalar_lea.vmem %s215_s17, 16  ;;  %s5705_s15 = scalar_lea.vmem %s215_s17, 32 }
  0x5f   : > { %p5699_p5 = scmp.ne.s32.totalorder %s215_s17, %s5698_s8  ;;  %p5706_p12 = scmp.lt.s32.totalorder %s215_s17, %s215_s17 }
  0x60   : > { %p5707_p0 = scmp.lt.s32.totalorder %s5705_s15, %s5698_s8 }
  0x61   : > { %p5701_p7 = pnand %p5699_p5, %p5936_p13 }
  0x62   : > { %p5708_p2 = por %p5707_p0, %p5706_p12 }
  0x63   : > { %p5702_p9 = pneg %p5701_p7 }
  0x65   : > { %p5709_p1 = pnand %p5708_p2, %p5702_p9 }
  0x67   : > { %5712 = shalt.err (!%p5709_p1)
}
  0x68   : > { %5455 = dma.hbm_to_vmem [thread:$0]  (!%p5920_p11), %s7838_s4, 16, %s215_s17, [#allocation11]  }
  0x69   : > { %s6018_s14 = sadd.s32 1, %s5817_s21   ;;  %s30_s23 = sadd.s32 1, %s5813_s20 }
  0x6a   : > { %s27_s29 = ssub.s32 %s5817_s21, %s6018_s14  ;;  %p37_p13 = scmp.ne.s32.totalorder %s5813_s20, %s5809_s19 }
  0x6b   : > { %p28_p6 = scmp.eq.s32.totalorder %s27_s29, 0  ;;  %p38_p4 = scmp.eq.s32.totalorder %s5817_s21, 0 }
  0x6c   : > { %p7870_p8 = scmp.eq.s32.totalorder %s5890_s22, 1  ;;  %p5468_p3 = scmp.lt.s32.totalorder %s5817_s21, 2 }
  0x6d   : > { %s6034_s28 = scalar_select %p28_p6, %s5813_s20, %s30_s23  }
  0x6e   : > { %p6028_p10 = por %p7870_p8, %p37_p13  ;;  %p39_p5 = por %p38_p4, %p37_p13 }
  0x6f   : > { %s225_s30 = sand.u32 1, %s5813_s20   ;;  %s4827_s17 = sshll.u32 %s5817_s21, 12 }
  0x70   : > { %s4719_s7 = sshll.u32 %s225_s30, 8  ;;  %s6041_s11 = scalar_lea.hbm %s7834_s0, %s4827_s17 }
  0x71   : > { %s229_s12 = scalar_lea.vmem [#allocation4], %s4719_s7  ;;  %p6045_p11 = pnand %p5468_p3, %p39_p5 }
  0x72   : > { %s236_s13 = sshll.u32 %s229_s12, 4  ;;  %s6049_s15 = scalar_lea.sflag [#allocation5], %s225_s30  ;;  %s6043_s13 = int_to_ptr.vmem [resolvable:$true] %s236_s13 }
  0x73   : > { %s5713_s16 = scalar_lea.hbm %s6041_s11, 4096  ;;  %p5715_p9 = pneg %p6045_p11 }
  0x74   : > { %p5714_p7 = scmp.ne.s32.totalorder %s6041_s11, %s5713_s16  ;;  %s5718_s29 = scalar_lea.hbm %s7834_s0, 8192 }
  0x75   : > { %p5719_p2 = scmp.lt.u32.totalorder %s6041_s11, %s7834_s0  ;;  %p5720_p1 = scmp.lt.u32.totalorder %s5718_s29, %s5713_s16 }
  0x76   : > { %p5716_p12 = pnand %p5715_p9, %p5714_p7  ;;  %p5722_p6 = scmp.lt.u32.totalorder %s5713_s16, %s6041_s11 }
  0x77   : > { %p5721_p13 = por %p5720_p1, %p5719_p2 }
  0x78   : > { %p5717_p0 = pneg %p5716_p12 }
  0x79   : > { %p5723_p4 = por %p5722_p6, %p5721_p13 }
  0x7b   : > { %p5724_p8 = pnand %p5723_p4, %p5717_p0 }
  0x7d   : > { %5727 = shalt.err (!%p5724_p8)
}
  0x7e   : > { %s5728_s30 = scalar_lea.vmem %s6043_s13, 4096  ;;  %s5825_s9 = smov [#allocation4]  }
  0x7f   : > { %p5729_p3 = scmp.ne.s32.totalorder %s6043_s13, %s5728_s30  ;;  %s5733_s10 = sshll.u32 %s5825_s9, 4  ;;  %s5734_s10 = int_to_ptr.vmem [resolvable:$false] %s5733_s10 }
  0x80   : > { %s5735_s12 = scalar_lea.vmem %s5734_s10, 8192  ;;  %p5736_p12 = scmp.lt.s32.totalorder %s6043_s13, %s5734_s10 }
  0x81   : > { %p5731_p5 = pnand %p5729_p3, %p5715_p9  ;;  %p5737_p2 = scmp.lt.s32.totalorder %s5735_s12, %s5728_s30 }
  0x83   : > { %p5732_p7 = pneg %p5731_p5  ;;  %p5738_p1 = por %p5737_p2, %p5736_p12 }
  0x85   : > { %p5739_p13 = pnand %p5738_p1, %p5732_p7 }
  0x87   : > { %5742 = shalt.err (!%p5739_p13)
}
  0x88   : > { %s5826_s16 = smov 128   ;;  %s5827_s6 = smov 8  }
  0x89   : > { %5459 = dma.hbm_to_vmem [thread:$0]  (!%p6045_p11), %s6041_s11, 4096, %s6043_s13, %s6049_s15, %s5826_s16, %s5826_s16, %s5827_s6  }
  0x8a   : > { %p7873_p9 = scmp.ne.s32.totalorder %s7867_s26, 0 }
  0x8c   : > { %248 = sbr.rel (%p7873_p9) target bundleno = 1213 (0x4bd), region = 40 }
  0x93   : > { %s6080_s23 = sand.u32 1, %s5809_s19   ;;  %p7874_p0 = scmp.ne.s32.totalorder %s7865_s24, 0 }
  0x94   : > { %s4723_s29 = sshll.u32 %s6080_s23, 8  ;;  %s251_s7 = scalar_lea.sflag [#allocation5], %s6080_s23 }
  0x95   : > { %s6086_s17 = scalar_lea.vmem [#allocation4], %s4723_s29 }
  0x96   : > { %5788 = dma.done.wait (%p7874_p0), %s251_s7, 4096  }
  0x97   : > { %5790 = vsyncadd (%p7874_p0), %s251_s7, 4294963200  ;;  %p7875_p11 = scmp.eq.s32.totalorder %s5890_s22, 0 }
  0x99   : > { %5792 = dma.done.wait (%p7875_p11), [#allocation8], 336   ;;  %p7876_p6 = pmov %p7875_p11 }
  0x9b   : > { %5794 = vsyncadd (%p7876_p6), [#allocation8], 4294966960  ;;  %p7877_p4 = pmov %p7876_p6 }
  0x9d   : > { %5796 = dma.done.wait (%p7877_p4), [#allocation11], 9232   ;;  %p7878_p8 = pmov %p7877_p4 }
  0x9e   : > { %vm298_vm0 = vcmask 31744   ;;  %v5828_v0 = vmov 0   ;;  %vm962_vm1 = vsmask.f32 3328  ;;  %vm913_vm2 = vcmask 1043456   ;;  %v409_v1 = vld [vmem:[%s6086_s17 + $0x10] sm:$0xff] }
  0x9f   : > { %5798 = vsyncadd (%p7878_p8), [#allocation11], 4294958064  ;;  %299 = vst.msk [vmem:[#allocation2] sm:$0xff] %vm298_vm0, %v5828_v0  ;;  %vm356_vm3 = vcmask 28676   ;;  %vm357_vm4 = vsmask.f32 4352 }
  0xa0   : > { %300 = vst.msk [vmem:[#allocation2 + $0x8] sm:$0xff] %vm298_vm0, %v5828_v0  ;;  %302 = vst.msk [vmem:[#allocation2 + $0x110] sm:$0xff] %vm298_vm0, %v5828_v0  ;;  %v410_v2 = vld [vmem:[%s6086_s17 + $0x18] sm:$0xff]  ;;  %vm503_vm5 = vcmask 31748   ;;  %vm305_vm6 = vcmask 27651   ;;  %v407_v11 = vld [vmem:[%s6086_s17] sm:$0xff] }
  0xa1   : > { %303 = vst.msk [vmem:[#allocation2 + $0x118] sm:$0xff] %vm298_vm0, %v5828_v0  ;;  %2105 = vst [vmem:[#allocation3] sm:$0xff] %v5828_v0  ;;  %vm306_vm7 = vsmask.f32 7950  ;;  %v440_v6 = vpack.c.bf16 %v410_v2, %v409_v1  ;;  %vm505_vm9 = vcmask 27648   ;;  %v408_v15 = vld [vmem:[%s6086_s17 + $0x8] sm:$0xff] }
  0xa2   : > { %2106 = vst [vmem:[#allocation3 + $0x8] sm:$0xff] %v5828_v0  ;;  %2108 = vst [vmem:[#allocation3 + $0x110] sm:$0xff] %v5828_v0  ;;  %v411_v16 = vld [vmem:[%s6086_s17 + $0x20] sm:$0xff]  ;;  %v412_v17 = vld [vmem:[%s6086_s17 + $0x28] sm:$0xff]  ;;  %s5829_s24 = smov 4   ;;  %v439_v31 = vpack.c.bf16 %v408_v15, %v407_v11  ;;  %s5830_s26 = smov 8  }
  0xa3   : > { %2109 = vst [vmem:[#allocation3 + $0x118] sm:$0xff] %v5828_v0  ;;  %vm6109_vm8 = vmand %vm356_vm3, %vm357_vm4  ;;  %v359_v22 = vld [vmem:[#allocation2 + $0x18] sm:$0x10]  ;;  %v472_v25 = vrot.slane %v440_v6, 4  ;;  %v311_v26 = vld [vmem:[#allocation2 + $0x20] sm:$0x8]  ;;  %v441_v32 = vpack.c.bf16 %v412_v17, %v411_v16 }
  0xa4   : > { %vm6118_vm10 = vmand %vm305_vm6, %vm306_vm7  ;;  %v413_v27 = vld [vmem:[%s6086_s17 + $0x30] sm:$0xff]  ;;  %v414_v28 = vld [vmem:[%s6086_s17 + $0x38] sm:$0xff]  ;;  %v360_v36 = vsel %vm6109_vm8, 0, %v359_v22  ;;  %v471_v42 = vrot.slane %v439_v31, 4  ;;  %s5831_s11 = smov 16   ;;  %s5832_s13 = smov 28  }
  0xa5   : > { %v308_v33 = vld [vmem:[#allocation2 + $0x10] sm:$0x8]  ;;  %v362_v34 = vld [vmem:[#allocation2 + $0x28] sm:$0x10]  ;;  %507 = vst.msk [vmem:[#allocation2 + $0x20] sm:$0xf0] %vm503_vm5, %v472_v25  ;;  %v442_v49 = vpack.c.bf16 %v414_v28, %v413_v27 }
  0xa6   : > { %v573_v3 = vld [vmem:[#allocation2] sm:$0xf0]  ;;  %v314_v35 = vld [vmem:[#allocation2 + $0x30] sm:$0x8]  ;;  %508 = vst.msk [vmem:[#allocation2 + $0x28] sm:$0xf] %vm505_vm9, %v472_v25 }
  0xa7   : > { %v591_v4 = vld [vmem:[#allocation2 + $0x8] sm:$0x1f]  ;;  %v964_v7 = vshrl.u32 %v573_v3, 16  ;;  %v967_v8 = vshll.u32 %v573_v3, 16  ;;  %v914_v13 = vrot.slane %v573_v3, 4  ;;  %v312_v37 = vsel %vm6118_vm10, 0, %v311_v26 }
  0xa8   : > { %v538_v5 = vld [vmem:[#allocation2 + $0x8] sm:$0xf]  ;;  %v972_v9 = vshrl.u32 %v591_v4, 16  ;;  %v975_v10 = vshll.u32 %v591_v4, 16  ;;  %v309_v38 = vsel %vm6118_vm10, 0, %v308_v33  ;;  %v363_v39 = vsel %vm6109_vm8, 0, %v362_v34 }
  0xa9   : > { %v915_v14 = vrot.slane %v538_v5, 4  ;;  %v966_v18 = vrot.slane %v964_v7, 4  ;;  %v969_v19 = vrot.slane %v967_v8, 5  ;;  %v365_v40 = vld [vmem:[#allocation2 + $0x38] sm:$0x10]  ;;  %v473_v43 = vrot.slane %v441_v32, 4 }
  0xaa   : > { %v974_v20 = vrot.slane %v972_v9, 4  ;;  %v977_v21 = vrot.slane %v975_v10, 5  ;;  %361 = vst [vmem:[#allocation2 + $0x18] sm:$0x10] %v360_v36  ;;  %313 = vst [vmem:[#allocation2 + $0x20] sm:$0x8] %v312_v37 }
  0xab   : > { %v916_v24 = vsel %vm913_vm2, %v914_v13, %v915_v14  ;;  %v970_v29 = vor.u32 %v969_v19, %v966_v18  ;;  %310 = vst [vmem:[#allocation2 + $0x10] sm:$0x8] %v309_v38  ;;  %364 = vst [vmem:[#allocation2 + $0x28] sm:$0x10] %v363_v39  ;;  %v315_v44 = vsel %vm6118_vm10, 0, %v314_v35  ;;  %v415_v46 = vld [vmem:[%s6086_s17 + $0x40] sm:$0xff] }
  0xac   : > { %v978_v30 = vor.u32 %v977_v21, %v974_v20  ;;  %1313 = vrot.lane.b32.xlu0 %v916_v24, %s5829_s24  ;;  %v317_v45 = vld [vmem:[#allocation2 + $0x40] sm:$0x8]  ;;  %316 = vst [vmem:[#allocation2 + $0x30] sm:$0x8] %v315_v44  ;;  %v366_v47 = vsel %vm6109_vm8, 0, %v365_v40  ;;  %v416_v54 = vld [vmem:[%s6086_s17 + $0x48] sm:$0xff] }
  0xad   : > { %v318_v48 = vsel %vm6118_vm10, 0, %v317_v45  ;;  %v368_v50 = vld [vmem:[#allocation2 + $0x48] sm:$0x10]  ;;  %v320_v51 = vld [vmem:[#allocation2 + $0x50] sm:$0x8]  ;;  %v474_v57 = vrot.slane %v442_v49, 4  ;;  %v443_v58 = vpack.c.bf16 %v416_v54, %v415_v46 }
  0xae   : > { %v979_v41 = vsel %vm962_vm1, %v970_v29, %v978_v30  ;;  %504 = vst.msk [vmem:[#allocation2 + $0x10] sm:$0xf0] %vm503_vm5, %v471_v42  ;;  %509 = vst.msk [vmem:[#allocation2 + $0x30] sm:$0xf0] %vm503_vm5, %v473_v43  ;;  %v369_v52 = vsel %vm6109_vm8, 0, %v368_v50  ;;  %v321_v53 = vsel %vm6118_vm10, 0, %v320_v51 }
  0xaf   : > { %1345 = vrot.lane.b32.xlu1 %v979_v41, %s5830_s26  ;;  %506 = vst.msk [vmem:[#allocation2 + $0x18] sm:$0xf] %vm505_vm9, %v471_v42  ;;  %510 = vst.msk [vmem:[#allocation2 + $0x38] sm:$0xf] %vm505_vm9, %v473_v43  ;;  %v371_v55 = vld [vmem:[#allocation2 + $0x58] sm:$0x10] }
  0xb0   : > { %367 = vst [vmem:[#allocation2 + $0x38] sm:$0x10] %v366_v47  ;;  %319 = vst [vmem:[#allocation2 + $0x40] sm:$0x8] %v318_v48  ;;  %v417_v56 = vld [vmem:[%s6086_s17 + $0x50] sm:$0xff]  ;;  %v372_v59 = vsel %vm6109_vm8, 0, %v371_v55 }
  0xb1   : > { %370 = vst [vmem:[#allocation2 + $0x48] sm:$0x10] %v369_v52  ;;  %322 = vst [vmem:[#allocation2 + $0x50] sm:$0x8] %v321_v53  ;;  %v323_v60 = vld [vmem:[#allocation2 + $0x60] sm:$0x8] }
  0xb2   : > { %v418_v61 = vld [vmem:[%s6086_s17 + $0x58] sm:$0xff]  ;;  %373 = vst [vmem:[#allocation2 + $0x58] sm:$0x10] %v372_v59  ;;  %v324_v62 = vsel %vm6118_vm10, 0, %v323_v60  ;;  %v374_v0 = vld [vmem:[#allocation2 + $0x68] sm:$0x10] }
  0xb3   : > { %v444_v63 = vpack.c.bf16 %v418_v61, %v417_v56  ;;  %v326_v1 = vld [vmem:[#allocation2 + $0x70] sm:$0x8]  ;;  %511 = vst.msk [vmem:[#allocation2 + $0x40] sm:$0xf0] %vm503_vm5, %v474_v57  ;;  %v475_v2 = vrot.slane %v443_v58, 4  ;;  %v375_v3 = vsel %vm6109_vm8, 0, %v374_v0 }
  0xb4   : > { %512 = vst.msk [vmem:[#allocation2 + $0x48] sm:$0xf] %vm505_vm9, %v474_v57  ;;  %325 = vst [vmem:[#allocation2 + $0x60] sm:$0x8] %v324_v62  ;;  %v327_v4 = vsel %vm6118_vm10, 0, %v326_v1  ;;  %s5833_s8 = smov 12  }
  0xb5   : > { %v377_v5 = vld [vmem:[#allocation2 + $0x78] sm:$0x10]  ;;  %v542_v6 = vld [vmem:[#allocation2 + $0x28] sm:$0xf]  ;;  %v6166_v7 = vld [vmem:[#allocation2 + $0x20] sm:$0xf0] }
  0xb6   : > { %v476_v8 = vrot.slane %v444_v63, 4  ;;  %376 = vst [vmem:[#allocation2 + $0x68] sm:$0x10] %v375_v3  ;;  %328 = vst [vmem:[#allocation2 + $0x70] sm:$0x8] %v327_v4  ;;  %v378_v9 = vsel %vm6109_vm8, 0, %v377_v5 }
  0xb7   : > { %v920_v10 = vrot.slane %v6166_v7, 4  ;;  %v921_v11 = vrot.slane %v542_v6, 4  ;;  %v541_v13 = vld [vmem:[#allocation2 + $0x20] sm:$0xf8]  ;;  %v652_v14 = vshrl.u32 %v542_v6, 16  ;;  %v655_v15 = vshll.u32 %v542_v6, 16 }
  0xb8   : > { %513 = vst.msk [vmem:[#allocation2 + $0x50] sm:$0xf0] %vm503_vm5, %v475_v2  ;;  %379 = vst [vmem:[#allocation2 + $0x78] sm:$0x10] %v378_v9  ;;  %v644_v16 = vshrl.u32 %v541_v13, 16  ;;  %v647_v17 = vshll.u32 %v541_v13, 16 }
  0xb9   : > { %514 = vst.msk [vmem:[#allocation2 + $0x58] sm:$0xf] %vm505_vm9, %v475_v2  ;;  %v998_v18 = vshrl.u32 %v6166_v7, 16  ;;  %v1001_v19 = vshll.u32 %v6166_v7, 16  ;;  %516 = vst.msk [vmem:[#allocation2 + $0x68] sm:$0xf] %vm505_vm9, %v476_v8  ;;  %v6178_v20 = vsel %vm913_vm2, %v920_v10, %v921_v11 }
  0xba   : > { %515 = vst.msk [vmem:[#allocation2 + $0x60] sm:$0xf0] %vm503_vm5, %v476_v8  ;;  %v540_v21 = vld [vmem:[#allocation2 + $0x18] sm:$0xf]  ;;  %v574_v22 = vld [vmem:[#allocation2 + $0x10] sm:$0xf0]  ;;  %1411 = vrot.lane.b32.xlu1 %v6178_v20, %s5831_s11 }
  0xbb   : > { %v6180_v24 = vld [vmem:[#allocation2 + $0x38] sm:$0xf]  ;;  %v917_v25 = vrot.slane %v574_v22, 4  ;;  %v918_v26 = vrot.slane %v540_v21, 4  ;;  %v6184_v27 = vld [vmem:[#allocation2 + $0x30] sm:$0xf0] }
  0xbc   : > { %v924_v28 = vrot.slane %v6180_v24, 4  ;;  %v981_v29 = vshrl.u32 %v574_v22, 16  ;;  %v923_v30 = vrot.slane %v6184_v27, 4  ;;  %v592_v31 = vld [vmem:[#allocation2 + $0x18] sm:$0x1f]  ;;  %v984_v32 = vshll.u32 %v574_v22, 16 }
  0xbd   : > { %v646_v33 = vrot.slane %v644_v16, 3  ;;  %v649_v34 = vrot.slane %v647_v17, 4  ;;  %v919_v35 = vsel %vm913_vm2, %v917_v25, %v918_v26  ;;  %v989_v37 = vshrl.u32 %v592_v31, 16  ;;  %v539_v39 = vld [vmem:[#allocation2 + $0x10] sm:$0xf8]  ;;  %v5524_v16 = vld [vmem:[#allocation7] sm:$0xff]  }
  0xbe   : > { %v983_v36 = vrot.slane %v981_v29, 4  ;;  %v992_v38 = vshll.u32 %v592_v31, 16  ;;  %1315 = vrot.lane.b32.xlu0 %v919_v35, %s5829_s24  ;;  %v6191_v40 = vsel %vm913_vm2, %v923_v30, %v924_v28  ;;  %v986_v41 = vrot.slane %v984_v32, 5  ;;  %v593_v52 = vld [vmem:[#allocation2 + $0x28] sm:$0x1f]  ;;  %5320 = vmatprep.subr.bf16.mxu0 %v5524_v16  ;;  %s5834_s15 = smov 20  }
  0xbf   : > { %v650_v42 = vor.u32 %v649_v34, %v646_v33  ;;  %v654_v43 = vrot.slane %v652_v14, 3  ;;  %1507 = vrot.lane.b32.xlu1 %v6191_v40, %s5832_s13  ;;  %v991_v44 = vrot.slane %v989_v37, 4  ;;  %v657_v46 = vrot.slane %v655_v15, 4  ;;  %v543_v57 = vld [vmem:[#allocation2 + $0x30] sm:$0xf8]  ;;  %5321 = vmatpush3.bf16.msra.mxu0 %v5524_v16  ;;  %v5525_v33 = vld [vmem:[#allocation7 + $0x8] sm:$0xff]  }
  0xc0   : > { %v994_v45 = vrot.slane %v992_v38, 5  ;;  %v627_v47 = vshrl.u32 %v539_v39, 16  ;;  %v987_v48 = vor.u32 %v986_v41, %v983_v36  ;;  %v630_v49 = vshll.u32 %v539_v39, 16  ;;  %v594_v10 = vld [vmem:[#allocation2 + $0x38] sm:$0x1f]  ;;  %5322 = vmatprep.subr.bf16.mxu0 %v5525_v33  ;;  %s5835_s30 = smov 24  }
  0xc1   : > { %v635_v50 = vshrl.u32 %v540_v21, 16  ;;  %v638_v51 = vshll.u32 %v540_v21, 16  ;;  %v658_v54 = vor.u32 %v657_v46, %v654_v43  ;;  %v1000_v56 = vrot.slane %v998_v18, 4  ;;  %v545_v37 = vld [vmem:[#allocation2 + $0x40] sm:$0xf8]  ;;  %s5836_s9 = smov 32  }
  0xc2   : > { %v995_v53 = vor.u32 %v994_v45, %v991_v44  ;;  %v629_v55 = vrot.slane %v627_v47, 3  ;;  %1409 = vrot.lane.b32.xlu0 %v919_v35, %s5831_s11  ;;  %v632_v58 = vrot.slane %v630_v49, 4  ;;  %v1003_v61 = vrot.slane %v1001_v19, 5  ;;  %v6222_v38 = vld [vmem:[#allocation2 + $0x48] sm:$0xf]  ;;  %s7716_s10 = scalar_lea.vmem [#allocation13], %s4723_s29 }
  0xc3   : > { %v637_v59 = vrot.slane %v635_v50, 3  ;;  %v640_v60 = vrot.slane %v638_v51, 4  ;;  %v6198_v63 = vsel %vm357_vm4, %v650_v42, %v658_v54  ;;  %v1006_v0 = vshrl.u32 %v593_v52, 16  ;;  %5323 = vmatpush3.bf16.msra.mxu0 %v5525_v33  ;;  %v6234_v45 = vld [vmem:[#allocation2 + $0x40] sm:$0xf0]  ;;  %v420_v54 = vld [vmem:[%s6086_s17 + $0x68] sm:$0xff] }
  0xc4   : > { %v996_v62 = vsel %vm962_vm1, %v987_v48, %v995_v53  ;;  %v1009_v1 = vshll.u32 %v593_v52, 16  ;;  %v633_v2 = vor.u32 %v632_v58, %v629_v55  ;;  %v1004_v4 = vor.u32 %v1003_v61, %v1000_v56  ;;  %v595_v50 = vld [vmem:[#allocation2 + $0x48] sm:$0x1f]  ;;  %v419_v53 = vld [vmem:[%s6086_s17 + $0x60] sm:$0xff]  ;;  %v422_v61 = vld [vmem:[%s6086_s17 + $0x78] sm:$0xff]  ;;  %s4828_s12 = sshll.u32 %s5890_s22, 12 }
  0xc5   : > { %1347 = vrot.lane.b32.xlu1 %v996_v62, %s5830_s26  ;;  %v641_v3 = vor.u32 %v640_v60, %v637_v59  ;;  %v661_v5 = vshrl.u32 %v543_v57, 16  ;;  %v1008_v6 = vrot.slane %v1006_v0, 4  ;;  %v664_v8 = vshll.u32 %v543_v57, 16  ;;  %v547_v59 = vld [vmem:[#allocation2 + $0x50] sm:$0xf8]  ;;  %s4601_s16 = sshll.u32 %s7716_s10, 4  ;;  %s7784_s7 = scalar_lea.hbm %s7839_s5, %s4828_s12  ;;  %s7787_s16 = int_to_ptr.vmem [resolvable:$true] %s4601_s16 }
  0xc6   : > { %v1011_v7 = vrot.slane %v1009_v1, 5  ;;  %v669_v9 = vshrl.u32 %v6180_v24, 16  ;;  %1505 = vrot.lane.b32.xlu0 %v6178_v20, %s5832_s13  ;;  %v672_v14 = vshll.u32 %v6180_v24, 16  ;;  %v1015_v15 = vshrl.u32 %v6184_v27, 16  ;;  %v421_v60 = vld [vmem:[%s6086_s17 + $0x70] sm:$0xff]  ;;  %s4588_s22 = scalar_lea.sflag [#allocation6], %s6080_s23 }
  0xc7   : > { %v6205_v11 = vsel %vm357_vm4, %v633_v2, %v641_v3  ;;  %v663_v13 = vrot.slane %v661_v5, 3  ;;  %v666_v18 = vrot.slane %v664_v8, 4  ;;  %v1018_v21 = vshll.u32 %v6184_v27, 16  ;;  %v329_v1 = vld [vmem:[#allocation2 + $0x80] sm:$0x8] }
  0xc8   : > { %v1012_v17 = vor.u32 %v1011_v7, %v1008_v6  ;;  %v671_v19 = vrot.slane %v669_v9, 3  ;;  %v674_v22 = vrot.slane %v672_v14, 4  ;;  %v1023_v25 = vshrl.u32 %v594_v10, 16  ;;  %v380_v2 = vld [vmem:[#allocation2 + $0x88] sm:$0x10] }
  0xc9   : > { %1379 = vrot.lane.b32.xlu1 %v6198_v63, %s5833_s8  ;;  %v1026_v26 = vshll.u32 %v594_v10, 16  ;;  %v667_v24 = vor.u32 %v666_v18, %v663_v13  ;;  %v1017_v29 = vrot.slane %v1015_v15, 4  ;;  %v1020_v30 = vrot.slane %v1018_v21, 5  ;;  %v332_v7 = vld [vmem:[#allocation2 + $0x90] sm:$0x8]  ;;  %v423_v10 = vld [vmem:[%s6086_s17 + $0x80] sm:$0xff] }
  0xca   : > { %v6213_v28 = vsel %vm962_vm1, %v1004_v4, %v1012_v17  ;;  %1377 = vrot.lane.b32.xlu0 %v6205_v11, %s5833_s8  ;;  %v675_v31 = vor.u32 %v674_v22, %v671_v19  ;;  %v1025_v27 = vrot.slane %v1023_v25, 4  ;;  %v678_v39 = vshrl.u32 %v545_v37, 16  ;;  %v383_v13 = vld [vmem:[#allocation2 + $0x98] sm:$0x10]  ;;  %v424_v17 = vld [vmem:[%s6086_s17 + $0x88] sm:$0xff] }
  0xcb   : > { %v1028_v32 = vrot.slane %v1026_v26, 5  ;;  %v1021_v35 = vor.u32 %v1020_v30, %v1017_v29  ;;  %v681_v41 = vshll.u32 %v545_v37, 16  ;;  %v686_v42 = vshrl.u32 %v6222_v38, 16  ;;  %v335_v25 = vld [vmem:[#allocation2 + $0xa0] sm:$0x8]  ;;  %v425_v26 = vld [vmem:[%s6086_s17 + $0x90] sm:$0xff] }
  0xcc   : > { %v6220_v34 = vsel %vm357_vm4, %v667_v24, %v675_v31  ;;  %v689_v43 = vshll.u32 %v6222_v38, 16  ;;  %v680_v46 = vrot.slane %v678_v39, 3  ;;  %v1032_v51 = vshrl.u32 %v6234_v45, 16  ;;  %v6272_v24 = vld [vmem:[#allocation2 + $0x50] sm:$0xf0]  ;;  %v426_v30 = vld [vmem:[%s6086_s17 + $0x98] sm:$0xff] }
  0xcd   : > { %1443 = vrot.lane.b32.xlu1 %v6213_v28, %s5834_s15  ;;  %v1029_v36 = vor.u32 %v1028_v32, %v1025_v27  ;;  %v683_v47 = vrot.slane %v681_v41, 4  ;;  %v688_v48 = vrot.slane %v686_v42, 3  ;;  %v1035_v52 = vshll.u32 %v6234_v45, 16  ;;  %v596_v32 = vld [vmem:[#allocation2 + $0x58] sm:$0x1f] }
  0xce   : > { %1441 = vrot.lane.b32.xlu0 %v996_v62, %s5834_s15  ;;  %v691_v49 = vrot.slane %v689_v43, 4  ;;  %v1040_v57 = vshrl.u32 %v595_v50, 16  ;;  %v1043_v58 = vshll.u32 %v595_v50, 16  ;;  %v6248_v62 = vld [vmem:[#allocation2 + $0x58] sm:$0xf]  ;;  %v445_v0 = vpack.c.bf16 %v420_v54, %v419_v53 }
  0xcf   : > { %v6230_v44 = vsel %vm962_vm1, %v1021_v35, %v1029_v36  ;;  %v684_v55 = vor.u32 %v683_v47, %v680_v46  ;;  %v926_v3 = vrot.slane %v6234_v45, 4  ;;  %v927_v4 = vrot.slane %v6222_v38, 4  ;;  %v5526_v38 = vld [vmem:[#allocation7 + $0x10] ss:$0 sps:$4 sm:$0x33]  }
  0xd0   : > { %v692_v56 = vor.u32 %v691_v49, %v688_v48  ;;  %v6254_v5 = vrot.slane %v1032_v51, 4  ;;  %v6256_v6 = vrot.slane %v1035_v52, 5  ;;  %v695_v8 = vshrl.u32 %v547_v59, 16  ;;  %v386_v45 = vld [vmem:[#allocation2 + $0xa8] sm:$0x10] }
  0xd1   : > { %1475 = vrot.lane.b32.xlu1 %v6220_v34, %s5835_s30  ;;  %v698_v9 = vshll.u32 %v547_v59, 16  ;;  %v1042_v14 = vrot.slane %v1040_v57, 4  ;;  %v1045_v15 = vrot.slane %v1043_v58, 5  ;;  %v703_v16 = vshrl.u32 %v6248_v62, 16  ;;  %v338_v49 = vld [vmem:[#allocation2 + $0xb0] sm:$0x8] }
  0xd2   : > { %1473 = vrot.lane.b32.xlu0 %v6198_v63, %s5835_s30  ;;  %v706_v18 = vshll.u32 %v6248_v62, 16  ;;  %v477_v19 = vrot.slane %v445_v0, 4  ;;  %v330_v21 = vsel %vm6118_vm10, 0, %v329_v1  ;;  %v446_v22 = vpack.c.bf16 %v422_v61, %v421_v60 }
  0xd3   : > { %331 = vst [vmem:[#allocation2 + $0x80] sm:$0x8] %v330_v21  ;;  %v381_v29 = vsel %vm6109_vm8, 0, %v380_v2  ;;  %v697_v31 = vrot.slane %v695_v8, 3  ;;  %v700_v27 = vrot.slane %v698_v9, 4  ;;  %v333_v35 = vsel %vm6118_vm10, 0, %v332_v7 }
  0xd4   : > { %517 = vst.msk [vmem:[#allocation2 + $0x70] sm:$0xf0] %vm503_vm5, %v477_v19  ;;  %v478_v33 = vrot.slane %v446_v22, 4  ;;  %382 = vst [vmem:[#allocation2 + $0x88] sm:$0x10] %v381_v29  ;;  %v447_v36 = vpack.c.bf16 %v424_v17, %v423_v10  ;;  %v384_v37 = vsel %vm6109_vm8, 0, %v383_v13  ;;  %v1038_v39 = vor.u32 %v6256_v6, %v6254_v5 }
  0xd5   : > { %1539 = vrot.lane.b32.xlu1 %v6230_v44, %s5836_s9  ;;  %518 = vst.msk [vmem:[#allocation2 + $0x78] sm:$0xf] %vm505_vm9, %v477_v19  ;;  %334 = vst [vmem:[#allocation2 + $0x90] sm:$0x8] %v333_v35  ;;  %v1046_v41 = vor.u32 %v1045_v15, %v1042_v14  ;;  %v705_v42 = vrot.slane %v703_v16, 3  ;;  %v708_v43 = vrot.slane %v706_v18, 4  ;;  %v448_v48 = vpack.c.bf16 %v426_v30, %v425_v26 }
  0xd6   : > { %1537 = vrot.lane.b32.xlu0 %v6213_v28, %s5836_s9  ;;  %519 = vst.msk [vmem:[#allocation2 + $0x80] sm:$0xf0] %vm503_vm5, %v478_v33  ;;  %385 = vst [vmem:[#allocation2 + $0x98] sm:$0x10] %v384_v37  ;;  %v479_v46 = vrot.slane %v447_v36, 4  ;;  %v336_v47 = vsel %vm6118_vm10, 0, %v335_v25  ;;  %v701_v50 = vor.u32 %v700_v27, %v697_v31 }
  0xd7   : > { %520 = vst.msk [vmem:[#allocation2 + $0x88] sm:$0xf] %vm505_vm9, %v478_v33  ;;  %v1049_v51 = vshrl.u32 %v6272_v24, 16  ;;  %v1052_v52 = vshll.u32 %v6272_v24, 16  ;;  %337 = vst [vmem:[#allocation2 + $0xa0] sm:$0x8] %v336_v47  ;;  %v6305_v57 = vsel %vm962_vm1, %v1038_v39, %v1046_v41  ;;  %v709_v58 = vor.u32 %v708_v43, %v705_v42 }
  0xd8   : > { %vm1908_vm11 = vcmask 1041408   ;;  %v1057_v53 = vshrl.u32 %v596_v32, 16  ;;  %521 = vst.msk [vmem:[#allocation2 + $0x90] sm:$0xf0] %vm503_vm5, %v479_v46  ;;  %v480_v54 = vrot.slane %v448_v48, 4  ;;  %v1060_v59 = vshll.u32 %v596_v32, 16 }
  0xd9   : > { %1319 = vrot.lane.b32.xlu1 %v6191_v40, %s5829_s24  ;;  %522 = vst.msk [vmem:[#allocation2 + $0x98] sm:$0xf] %vm505_vm9, %v479_v46  ;;  %5422 = vmatprep.subr.msk.bf16.mxu0 %vm1908_vm11, %v5526_v38  ;;  %v339_v60 = vsel %vm6118_vm10, 0, %v338_v49  ;;  %v929_v61 = vrot.slane %v6272_v24, 4  ;;  %v930_v0 = vrot.slane %v6248_v62, 4  ;;  %v1051_v1 = vrot.slane %v1049_v51, 4 }
  0xda   : > { %1317 = vrot.lane.b32.xlu0 %v6178_v20, %s5829_s24  ;;  %v6262_v20 = vsel %vm357_vm4, %v684_v55, %v692_v56  ;;  %v1910_v55 = vsel %vm1908_vm11, %v5526_v38, 0  ;;  %v387_v56 = vsel %vm6109_vm8, 0, %v386_v45  ;;  %523 = vst.msk [vmem:[#allocation2 + $0xa0] sm:$0xf0] %vm503_vm5, %v480_v54  ;;  %340 = vst [vmem:[#allocation2 + $0xb0] sm:$0x8] %v339_v60  ;;  %v6318_v2 = vsel %vm357_vm4, %v701_v50, %v709_v58 }
  0xdb   : > { %5325 = vmatpush3.bf16.msra.mxu0 %v1910_v55  ;;  %388 = vst [vmem:[#allocation2 + $0xa8] sm:$0x10] %v387_v56  ;;  %524 = vst.msk [vmem:[#allocation2 + $0xa8] sm:$0xf] %vm505_vm9, %v480_v54  ;;  %v1062_v5 = vrot.slane %v1060_v59, 5  ;;  %v6325_v6 = vsel %vm913_vm2, %v929_v61, %v930_v0  ;;  %v427_v30 = vld [vmem:[%s6086_s17 + $0xa0] sm:$0xff] }
  0xdc   : > { %v6327_v62 = vld [vmem:[#allocation2 + $0x68] sm:$0xf]  ;;  %v579_v15 = vld [vmem:[#allocation2 + $0x60] sm:$0xf0]  ;;  %v551_v29 = vld [vmem:[#allocation2 + $0x70] sm:$0xf8] }
  0xdd   : > { %1351 = vrot.lane.b32.xlu1 %v6230_v44, %s5830_s26  ;;  %v723_v13 = vshll.u32 %v6327_v62, 16  ;;  %v597_v16 = vld [vmem:[#allocation2 + $0x68] sm:$0x1f]  ;;  %v1066_v22 = vshrl.u32 %v579_v15, 16  ;;  %v1069_v25 = vshll.u32 %v579_v15, 16  ;;  %v932_v32 = vrot.slane %v579_v15, 4 }
  0xde   : > { %1349 = vrot.lane.b32.xlu0 %v6213_v28, %s5830_s26  ;;  %v6284_v28 = vsel %vm913_vm2, %v926_v3, %v927_v4  ;;  %v1054_v3 = vrot.slane %v1052_v52, 5  ;;  %v1059_v4 = vrot.slane %v1057_v53, 4  ;;  %v1074_v26 = vshrl.u32 %v597_v16, 16  ;;  %v428_v31 = vld [vmem:[%s6086_s17 + $0xa8] sm:$0xff]  ;;  %v6346_v27 = vld [vmem:[#allocation2 + $0x78] sm:$0xf] }
  0xdf   : > { %v725_v21 = vrot.slane %v723_v13, 4  ;;  %v1077_v24 = vshll.u32 %v597_v16, 16  ;;  %v933_v33 = vrot.slane %v6327_v62, 4  ;;  %v729_v36 = vshrl.u32 %v551_v29, 16  ;;  %v6351_v38 = vld [vmem:[#allocation2 + $0x70] sm:$0xf0] }
  0xe0   : > { %v1055_v7 = vor.u32 %v1054_v3, %v1051_v1  ;;  %v1063_v8 = vor.u32 %v1062_v5, %v1059_v4  ;;  %v732_v37 = vshll.u32 %v551_v29, 16  ;;  %v6353_v41 = vrot.slane %v1066_v22, 4  ;;  %v429_v45 = vld [vmem:[%s6086_s17 + $0xb0] sm:$0xff]  ;;  %v430_v46 = vld [vmem:[%s6086_s17 + $0xb8] sm:$0xff]  ;;  %v341_v52 = vld [vmem:[#allocation2 + $0xc0] sm:$0x8] }
  0xe1   : > { %1383 = vrot.lane.b32.xlu1 %v6262_v20, %s5833_s8  ;;  %v6355_v42 = vrot.slane %v1069_v25, 5  ;;  %v737_v43 = vshrl.u32 %v6346_v27, 16  ;;  %v6362_v47 = vrot.slane %v1074_v26, 4  ;;  %v6364_v48 = vrot.slane %v1077_v24, 5  ;;  %v389_v51 = vld [vmem:[#allocation2 + $0xb8] sm:$0x10] }
  0xe2   : > { %1381 = vrot.lane.b32.xlu0 %v6220_v34, %s5833_s8  ;;  %v6336_v14 = vsel %vm962_vm1, %v1055_v7, %v1063_v8  ;;  %v740_v49 = vshll.u32 %v6346_v27, 16  ;;  %v449_v50 = vpack.c.bf16 %v428_v31, %v427_v30  ;;  %v431_v53 = vld [vmem:[%s6086_s17 + $0xc0] sm:$0xff]  ;;  %v432_v54 = vld [vmem:[%s6086_s17 + $0xc8] sm:$0xff]  ;;  %v6369_v55 = vld [vmem:[#allocation2 + $0x78] sm:$0x1f]  ;;  %v1083_v56 = vshrl.u32 %v6351_v38, 16 }
  0xe3   : > { %v1086_v58 = vshll.u32 %v6351_v38, 16  ;;  %v344_v59 = vld [vmem:[#allocation2 + $0xd0] sm:$0x8]  ;;  %v6375_v60 = vrot.slane %v729_v36, 3  ;;  %v6377_v61 = vrot.slane %v732_v37, 4  ;;  %v450_v0 = vpack.c.bf16 %v430_v46, %v429_v45  ;;  %v434_v8 = vld [vmem:[%s6086_s17 + $0xd8] sm:$0xff] }
  0xe4   : > { %v395_v1 = vld [vmem:[#allocation2 + $0xd8] sm:$0x10]  ;;  %v347_v3 = vld [vmem:[#allocation2 + $0xe0] sm:$0x8]  ;;  %v6382_v5 = vrot.slane %v737_v43, 3  ;;  %v433_v7 = vld [vmem:[%s6086_s17 + $0xd0] sm:$0xff]  ;;  %v1072_v16 = vor.u32 %v6355_v42, %v6353_v41 }
  0xe5   : > { %1415 = vrot.lane.b32.xlu1 %v6284_v28, %s5831_s11  ;;  %v435_v13 = vld [vmem:[%s6086_s17 + $0xe0] sm:$0xff]  ;;  %v436_v15 = vld [vmem:[%s6086_s17 + $0xe8] sm:$0xff]  ;;  %v482_v22 = vrot.slane %v450_v0, 4  ;;  %v345_v26 = vsel %vm6118_vm10, 0, %v344_v59  ;;  %v1094_v24 = vshll.u32 %v6369_v55, 16  ;;  %v396_v30 = vsel %vm6109_vm8, 0, %v395_v1 }
  0xe6   : > { %1413 = vrot.lane.b32.xlu0 %v6191_v40, %s5831_s11  ;;  %v549_v40 = vld [vmem:[#allocation2 + $0x60] sm:$0xf8]  ;;  %346 = vst [vmem:[#allocation2 + $0xd0] sm:$0x8] %v345_v26  ;;  %v348_v31 = vsel %vm6118_vm10, 0, %v347_v3  ;;  %v453_v36 = vpack.c.bf16 %v436_v15, %v435_v13  ;;  %v735_v42 = vor.u32 %v6377_v61, %v6375_v60  ;;  %vm1617_vm12 = vcmask 64512  }
  0xe7   : > { %v712_v9 = vshrl.u32 %v549_v40, 16  ;;  %v715_v10 = vshll.u32 %v549_v40, 16  ;;  %v451_v40 = vpack.c.bf16 %v432_v54, %v431_v53  ;;  %527 = vst.msk [vmem:[#allocation2 + $0xc0] sm:$0xf0] %vm503_vm5, %v482_v22  ;;  %397 = vst [vmem:[#allocation2 + $0xd8] sm:$0x10] %v396_v30 }
  0xe8   : > { %528 = vst.msk [vmem:[#allocation2 + $0xc8] sm:$0xf] %vm505_vm9, %v482_v22  ;;  %349 = vst [vmem:[#allocation2 + $0xe0] sm:$0x8] %v348_v31  ;;  %v401_v45 = vld [vmem:[#allocation2 + $0xf8] sm:$0x10] }
  0xe9   : > { %1447 = vrot.lane.b32.xlu1 %v6305_v57, %s5834_s15  ;;  %v714_v17 = vrot.slane %v712_v9, 3  ;;  %v717_v18 = vrot.slane %v715_v10, 4  ;;  %v6389_v9 = vsel %vm913_vm2, %v932_v32, %v933_v33  ;;  %v742_v10 = vrot.slane %v740_v49, 4  ;;  %v581_v60 = vld [vmem:[#allocation2 + $0x80] sm:$0xf0] }
  0xea   : > { %1445 = vrot.lane.b32.xlu0 %v6230_v44, %s5834_s15  ;;  %v720_v44 = vshrl.u32 %v6327_v62, 16  ;;  %v398_v62 = vld [vmem:[#allocation2 + $0xe8] sm:$0x10]  ;;  %v483_v29 = vrot.slane %v451_v40, 4  ;;  %v452_v32 = vpack.c.bf16 %v434_v8, %v433_v7  ;;  %v402_v46 = vsel %vm6109_vm8, 0, %v401_v45 }
  0xeb   : > { %v718_v35 = vor.u32 %v717_v18, %v714_v17  ;;  %v1080_v17 = vor.u32 %v6364_v48, %v6362_v47  ;;  %v390_v18 = vsel %vm6109_vm8, 0, %v389_v51  ;;  %v399_v33 = vsel %vm6109_vm8, 0, %v398_v62  ;;  %403 = vst [vmem:[#allocation2 + $0xf8] sm:$0x10] %v402_v46  ;;  %v555_v13 = vld [vmem:[#allocation2 + $0x90] sm:$0xf8] }
  0xec   : > { %v722_v19 = vrot.slane %v720_v44, 3  ;;  %v481_v44 = vrot.slane %v449_v50, 4  ;;  %391 = vst [vmem:[#allocation2 + $0xb8] sm:$0x10] %v390_v18  ;;  %529 = vst.msk [vmem:[#allocation2 + $0xd0] sm:$0xf0] %vm503_vm5, %v483_v29  ;;  %v743_v43 = vor.u32 %v742_v10, %v6382_v5 }
  0xed   : > { %1479 = vrot.lane.b32.xlu1 %v6318_v2, %s5835_s30  ;;  %530 = vst.msk [vmem:[#allocation2 + $0xd8] sm:$0xf] %vm505_vm9, %v483_v29  ;;  %400 = vst [vmem:[#allocation2 + $0xe8] sm:$0x10] %v399_v33  ;;  %v484_v37 = vrot.slane %v452_v32, 4  ;;  %v6428_v41 = vsel %vm962_vm1, %v1072_v16, %v1080_v17  ;;  %v935_v47 = vrot.slane %v6351_v38, 4 }
  0xee   : > { %1477 = vrot.lane.b32.xlu0 %v6262_v20, %s5835_s30  ;;  %v726_v39 = vor.u32 %v725_v21, %v722_v19  ;;  %v342_v19 = vsel %vm6118_vm10, 0, %v341_v52  ;;  %v1091_v21 = vshrl.u32 %v6369_v55, 16  ;;  %525 = vst.msk [vmem:[#allocation2 + $0xb0] sm:$0xf0] %vm503_vm5, %v481_v44  ;;  %v936_v48 = vrot.slane %v6346_v27, 4 }
  0xef   : > { %526 = vst.msk [vmem:[#allocation2 + $0xb8] sm:$0xf] %vm505_vm9, %v481_v44  ;;  %343 = vst [vmem:[#allocation2 + $0xc0] sm:$0x8] %v342_v19  ;;  %v6448_v49 = vsel %vm357_vm4, %v735_v42, %v743_v43  ;;  %v1088_v50 = vrot.slane %v1086_v58, 5  ;;  %v1096_v52 = vrot.slane %v1094_v24, 5 }
  0xf0   : > { %v6380_v4 = vsel %vm357_vm4, %v718_v35, %v726_v39  ;;  %v485_v39 = vrot.slane %v453_v36, 4  ;;  %531 = vst.msk [vmem:[#allocation2 + $0xe0] sm:$0xf0] %vm503_vm5, %v484_v37  ;;  %v1093_v51 = vrot.slane %v1091_v21, 4  ;;  %v6457_v53 = vsel %vm913_vm2, %v935_v47, %v936_v48  ;;  %v553_v55 = vld [vmem:[#allocation2 + $0x80] sm:$0xf8] }
  0xf1   : > { %1511 = vrot.lane.b32.xlu1 %v6325_v6, %s5832_s13  ;;  %532 = vst.msk [vmem:[#allocation2 + $0xe8] sm:$0xf] %vm505_vm9, %v484_v37  ;;  %v746_v38 = vshrl.u32 %v553_v55, 16  ;;  %v599_v5 = vld [vmem:[#allocation2 + $0x88] sm:$0x1f]  ;;  %v1100_v40 = vshrl.u32 %v581_v60, 16 }
  0xf2   : > { %1509 = vrot.lane.b32.xlu0 %v6284_v28, %s5832_s13  ;;  %533 = vst.msk [vmem:[#allocation2 + $0xf0] sm:$0xf0] %vm503_vm5, %v485_v39  ;;  %v1097_v54 = vor.u32 %v1096_v52, %v1093_v51  ;;  %v1103_v7 = vshll.u32 %v581_v60, 16  ;;  %v1108_v8 = vshrl.u32 %v599_v5, 16  ;;  %v1111_v62 = vshll.u32 %v599_v5, 16 }
  0xf3   : > { %534 = vst.msk [vmem:[#allocation2 + $0xf8] sm:$0xf] %vm505_vm9, %v485_v39  ;;  %v748_v61 = vrot.slane %v746_v38, 3  ;;  %v537_v15 = vld [vmem:[#allocation2] sm:$0xf8]  ;;  %v938_v19 = vrot.slane %v581_v60, 4 }
  0xf4   : > { %v6476_v16 = vld [vmem:[#allocation2 + $0x98] sm:$0xf]  ;;  %v5599_v17 = vld [vmem:[#allocation2 + $0x8] sm:$0xf]  ;;  %v1102_v21 = vrot.slane %v1100_v40, 4  ;;  %v1105_v22 = vrot.slane %v1103_v7, 5 }
  0xf5   : > { %1543 = vrot.lane.b32.xlu1 %v6336_v14, %s5836_s9  ;;  %v618_v18 = vshrl.u32 %v5599_v17, 16  ;;  %v1113_v26 = vrot.slane %v1111_v62, 5  ;;  %v763_v24 = vshrl.u32 %v555_v13, 16  ;;  %v766_v30 = vshll.u32 %v555_v13, 16  ;;  %v582_v36 = vld [vmem:[#allocation2 + $0x90] sm:$0xf0] }
  0xf6   : > { %1541 = vrot.lane.b32.xlu0 %v6305_v57, %s5836_s9  ;;  %v774_v31 = vshll.u32 %v6476_v16, 16  ;;  %v621_v32 = vshll.u32 %v5599_v17, 16  ;;  %v1106_v39 = vor.u32 %v1105_v22, %v1102_v21  ;;  %v613_v43 = vshll.u32 %v537_v15, 16  ;;  %v600_v45 = vld [vmem:[#allocation2 + $0x98] sm:$0x1f] }
  0xf7   : > { %v6487_v33 = vrot.slane %v618_v18, 3  ;;  %v765_v46 = vrot.slane %v763_v24, 3  ;;  %v768_v47 = vrot.slane %v766_v30, 4  ;;  %v1120_v51 = vshll.u32 %v582_v36, 16  ;;  %v353_v52 = vld [vmem:[#allocation2 + $0x100] sm:$0x8] }
  0xf8   : > { %v941_v5 = vrot.slane %v582_v36, 4  ;;  %v942_v40 = vrot.slane %v6476_v16, 4  ;;  %v6523_v13 = vld [vmem:[#allocation2 + $0xa8] sm:$0xf]  ;;  %v6529_v12 = vld [vmem:[#allocation2 + $0xa0] sm:$0xf0] }
  0xf9   : > { %1323 = vrot.lane.b32.xlu1 %v6325_v6, %s5829_s24  ;;  %v1122_v62 = vrot.slane %v1120_v51, 5  ;;  %v788_v22 = vshrl.u32 %v6523_v13, 16  ;;  %v945_v51 = vrot.slane %v6523_v13, 4  ;;  %vm1650_vm13 = vcmask 97280  }
  0xfa   : > { %1321 = vrot.lane.b32.xlu0 %v6284_v28, %s5829_s24  ;;  %v392_v28 = vld [vmem:[#allocation2 + $0xc8] sm:$0x10]  ;;  %vm1683_vm14 = vcmask 130048   ;;  %vm1716_vm15 = vcmask 162816   ;;  %vm1749_vm3 = vcmask 195584   ;;  %vm1815_vm6 = vcmask 261120  }
  0xfb   : > { %v393_v25 = vsel %vm6109_vm8, 0, %v392_v28 }
  0xfc   : > { %394 = vst [vmem:[#allocation2 + $0xc8] sm:$0x10] %v393_v25  ;;  %v1110_v25 = vrot.slane %v1108_v8, 4 }
  0xfd   : > { %1355 = vrot.lane.b32.xlu1 %v6336_v14, %s5830_s26 }
  0xfe   : > { %1353 = vrot.lane.b32.xlu0 %v6305_v57, %s5830_s26  ;;  %v350_v57 = vld [vmem:[#allocation2 + $0xf0] sm:$0x8]  ;;  %v1114_v42 = vor.u32 %v1113_v26, %v1110_v25  ;;  %v791_v25 = vshll.u32 %v6523_v13, 16  ;;  %v601_v26 = vld [vmem:[#allocation2 + $0xa8] sm:$0x1f] }
  0xff   : > { %v351_v35 = vsel %vm6118_vm10, 0, %v350_v57 }
 0x100   : > { %352 = vst [vmem:[#allocation2 + $0xf0] sm:$0x8] %v351_v35  ;;  %v610_v35 = vshrl.u32 %v537_v15, 16 }
 0x101   : > { %1387 = vrot.lane.b32.xlu1 %v6380_v4, %s5833_s8 }
 0x102   : > { %1385 = vrot.lane.b32.xlu0 %v6318_v2, %s5833_s8  ;;  %v6507_v60 = vrot.slane %v610_v35, 3  ;;  %v559_v35 = vld [vmem:[#allocation2 + $0xb0] sm:$0xf8] }
 0x105   : > { %1419 = vrot.lane.b32.xlu1 %v6389_v9, %s5831_s11 }
 0x106   : > { %1417 = vrot.lane.b32.xlu0 %v6325_v6, %s5831_s11  ;;  %v1085_v6 = vrot.slane %v1083_v56, 4  ;;  %v554_v56 = vld [vmem:[#allocation2 + $0x88] sm:$0xf] }
 0x107   : > { %v754_v28 = vshrl.u32 %v554_v56, 16  ;;  %v757_v59 = vshll.u32 %v554_v56, 16  ;;  %v939_v57 = vrot.slane %v554_v56, 4  ;;  %v769_v56 = vor.u32 %v768_v47, %v765_v46  ;;  %v6563_v46 = vld [vmem:[#allocation2 + $0xb0] sm:$0xf0] }
 0x108   : > { %v1089_v27 = vor.u32 %v1088_v50, %v1085_v6  ;;  %v1117_v6 = vshrl.u32 %v582_v36, 16  ;;  %v437_v50 = vld [vmem:[%s6086_s17 + $0xf0] sm:$0xff]  ;;  %v6552_v36 = vld [vmem:[#allocation2 + $0xb8] sm:$0xf]  ;;  %v790_v47 = vrot.slane %v788_v22, 3 }
 0x109   : > { %1451 = vrot.lane.b32.xlu1 %v6428_v41, %s5834_s15  ;;  %v756_v1 = vrot.slane %v754_v28, 3  ;;  %v759_v3 = vrot.slane %v757_v59, 4  ;;  %v6492_v37 = vsel %vm913_vm2, %v938_v19, %v939_v57  ;;  %v1128_v28 = vshll.u32 %v600_v45, 16 }
 0x10a   : > { %1449 = vrot.lane.b32.xlu0 %v6336_v14, %s5834_s15  ;;  %v6464_v58 = vsel %vm962_vm1, %v1089_v27, %v1097_v54  ;;  %v749_v14 = vshll.u32 %v553_v55, 16  ;;  %v438_v27 = vld [vmem:[%s6086_s17 + $0xf8] sm:$0xff]  ;;  %v6501_v54 = vsel %vm962_vm1, %v1106_v39, %v1114_v42  ;;  %v404_v55 = vld [vmem:[#allocation2 + $0x108] sm:$0x10]  ;;  %v6503_v59 = vrot.slane %v621_v32, 4  ;;  %s5743_s17 = scalar_lea.vmem %s7787_s16, 4096 }
 0x10b   : > { %v760_v44 = vor.u32 %v759_v3, %v756_v1  ;;  %v354_v1 = vsel %vm6118_vm10, 0, %v353_v52  ;;  %v454_v7 = vpack.c.bf16 %v438_v27, %v437_v50  ;;  %v405_v8 = vsel %vm6109_vm8, 0, %v404_v55  ;;  %v602_v50 = vld [vmem:[#allocation2 + $0xb8] sm:$0x1f]  ;;  %p5744_p3 = scmp.ne.s32.totalorder %s7787_s16, %s5743_s17 }
 0x10c   : > { %v751_v0 = vrot.slane %v749_v14, 4  ;;  %v1125_v14 = vshrl.u32 %v600_v45, 16  ;;  %355 = vst [vmem:[#allocation2 + $0x100] sm:$0x8] %v354_v1  ;;  %406 = vst [vmem:[#allocation2 + $0x108] sm:$0x10] %v405_v8  ;;  %v6538_v57 = vsel %vm913_vm2, %v941_v5, %v942_v40  ;;  %v624_v39 = vor.u32 %v6503_v59, %v6487_v33 }
 0x10d   : > { %1483 = vrot.lane.b32.xlu1 %v6448_v49, %s5835_s30  ;;  %v486_v15 = vrot.slane %v454_v7, 4  ;;  %v793_v33 = vrot.slane %v791_v25, 4  ;;  %v797_v52 = vshrl.u32 %v559_v35, 16  ;;  %v800_v27 = vshll.u32 %v559_v35, 16  ;;  %p5745_p5 = pnand %p5744_p3, %p6028_p10 }
 0x10e   : > { %1481 = vrot.lane.b32.xlu0 %v6380_v4, %s5835_s30  ;;  %v752_v10 = vor.u32 %v751_v0, %v748_v61  ;;  %v6509_v61 = vrot.slane %v613_v43, 4  ;;  %v557_v0 = vld [vmem:[#allocation2 + $0xa0] sm:$0xf8]  ;;  %v1127_v23 = vrot.slane %v1125_v14, 4  ;;  %v1151_v14 = vshrl.u32 %v6563_v46, 16 }
 0x10f   : > { %v780_v17 = vshrl.u32 %v557_v0, 16  ;;  %v783_v18 = vshll.u32 %v557_v0, 16  ;;  %535 = vst.msk [vmem:[#allocation2 + $0x100] sm:$0xf0] %vm503_vm5, %v486_v15  ;;  %v1162_v0 = vshll.u32 %v602_v50, 16  ;;  %v947_v7 = vrot.slane %v6563_v46, 4  ;;  %p5746_p7 = pneg %p5745_p5 }
 0x110   : > { %v6481_v29 = vsel %vm357_vm4, %v752_v10, %v760_v44  ;;  %v1130_v44 = vrot.slane %v1128_v28, 5  ;;  %536 = vst.msk [vmem:[#allocation2 + $0x108] sm:$0xf] %vm505_vm9, %v486_v15  ;;  %v616_v42 = vor.u32 %v6509_v61, %v6507_v60  ;;  %v1154_v28 = vshll.u32 %v6563_v46, 16 }
 0x111   : > { %1515 = vrot.lane.b32.xlu1 %v6457_v53, %s5832_s13  ;;  %v6544_v24 = vrot.slane %v780_v17, 3  ;;  %v6546_v30 = vrot.slane %v783_v18, 4  ;;  %v1159_v61 = vshrl.u32 %v602_v50, 16  ;;  %v948_v8 = vrot.slane %v6552_v36, 4 }
 0x112   : > { %1513 = vrot.lane.b32.xlu0 %v6389_v9, %s5832_s13  ;;  %v6584_v17 = vrot.slane %v1154_v28, 5  ;;  %v1164_v22 = vrot.slane %v1162_v0, 5  ;;  %vm1782_vm5 = vcmask 228352   ;;  %vm1875_vm8 = vcmask 293888  }
 0x113   : > { %v786_v18 = vor.u32 %v6546_v30, %v6544_v24  ;;  %vm2111_vm9 = vcmask 1043459  }
 0x114   : > { %vm6938_vm10 = vmand %vm2111_vm9, %vm306_vm7  ;;  %vm2161_vm7 = vcmask 1044484  }
 0x115   : > { %1547 = vrot.lane.b32.xlu1 %v6464_v58, %s5836_s9  ;;  %vm6976_vm11 = vmand %vm2161_vm7, %vm357_vm4 }
 0x116   : > { %1545 = vrot.lane.b32.xlu0 %v6428_v41, %s5836_s9 }
 0x119   : > { %1327 = vrot.lane.b32.xlu1 %v6457_v53, %s5829_s24 }
 0x11a   : > { %1325 = vrot.lane.b32.xlu0 %v6389_v9, %s5829_s24  ;;  %v771_v9 = vshrl.u32 %v6476_v16, 16 }
 0x11c   : > { %v773_v48 = vrot.slane %v771_v9, 3  ;;  %v1134_v9 = vshrl.u32 %v6529_v12, 16 }
 0x11d   : > { %1359 = vrot.lane.b32.xlu1 %v6464_v58, %s5830_s26 }
 0x11e   : > { %1357 = vrot.lane.b32.xlu0 %v6428_v41, %s5830_s26  ;;  %v776_v41 = vrot.slane %v774_v31, 4  ;;  %v6527_v16 = vpop.permute.xlu0 %1313  ;;  %v1137_v31 = vshll.u32 %v6529_v12, 16  ;;  %v1136_v59 = vrot.slane %v1134_v9, 4 }
 0x120   : > { %v777_v38 = vor.u32 %v776_v41, %v773_v48  ;;  %v944_v48 = vrot.slane %v6529_v12, 4  ;;  %v1142_v41 = vshrl.u32 %v601_v26, 16  ;;  %v1139_v60 = vrot.slane %v1137_v31, 5 }
 0x121   : > { %1391 = vrot.lane.b32.xlu1 %v6481_v29, %s5833_s8  ;;  %v6513_v3 = vpop.permute.xlu1 %1345  ;;  %v6582_v12 = vrot.slane %v1151_v14, 4 }
 0x122   : > { %1389 = vrot.lane.b32.xlu0 %v6448_v49, %s5833_s8  ;;  %v6521_v10 = vsel %vm357_vm4, %v769_v56, %v777_v38  ;;  %v805_v56 = vshrl.u32 %v6552_v36, 16  ;;  %v808_v38 = vshll.u32 %v6552_v36, 16  ;;  %v1144_v5 = vrot.slane %v1142_v41, 4 }
 0x124   : > { %v807_v13 = vrot.slane %v805_v56, 3  ;;  %v810_v15 = vrot.slane %v808_v38, 4 }
 0x125   : > { %1423 = vrot.lane.b32.xlu1 %v6492_v37, %s5831_s11 }
 0x126   : > { %1421 = vrot.lane.b32.xlu0 %v6457_v53, %s5831_s11  ;;  %v1119_v53 = vrot.slane %v1117_v6, 4  ;;  %v1145_v6 = vshll.u32 %v601_v26, 16 }
 0x128   : > { %v1123_v21 = vor.u32 %v1122_v62, %v1119_v53  ;;  %v1147_v40 = vrot.slane %v1145_v6, 5  ;;  %v625_v53 = vsel %vm357_vm4, %v616_v42, %v624_v39  ;;  %v799_v62 = vrot.slane %v797_v52, 3 }
 0x129   : > { %1455 = vrot.lane.b32.xlu1 %v6501_v54, %s5834_s15  ;;  %v1571_v26 = vsel %vm298_vm0, %v625_v53, %v6527_v16 }
 0x12a   : > { %1453 = vrot.lane.b32.xlu0 %v6464_v58, %s5834_s15  ;;  %v1131_v58 = vor.u32 %v1130_v44, %v1127_v23  ;;  %v802_v23 = vrot.slane %v800_v27, 4  ;;  %v1619_v35 = vsel %vm1617_vm12, %v1571_v26, %v6513_v3  ;;  %v811_v27 = vor.u32 %v810_v15, %v807_v13  ;;  %v603_v15 = vld [vmem:[#allocation2 + $0xc8] sm:$0x1f] }
 0x12b   : > { %v1176_v26 = vshrl.u32 %v603_v15, 16 }
 0x12c   : > { %v6535_v19 = vpop.permute.xlu1 %1411  ;;  %v6561_v45 = vsel %vm962_vm1, %v1123_v21, %v1131_v58  ;;  %v794_v21 = vor.u32 %v793_v33, %v790_v47  ;;  %v6588_v58 = vrot.slane %v1159_v61, 4  ;;  %v1148_v47 = vor.u32 %v1147_v40, %v1144_v5  ;;  %v562_v40 = vld [vmem:[#allocation2 + $0xc8] sm:$0xf] }
 0x12d   : > { %1487 = vrot.lane.b32.xlu1 %v6521_v10, %s5835_s30  ;;  %v6654_v61 = vsel %vm913_vm2, %v947_v7, %v948_v8  ;;  %v822_v8 = vshrl.u32 %v562_v40, 16 }
 0x12e   : > { %1485 = vrot.lane.b32.xlu0 %v6481_v29, %s5835_s30  ;;  %v6599_v30 = vsel %vm357_vm4, %v786_v18, %v794_v21  ;;  %v1165_v0 = vor.u32 %v1164_v22, %v6588_v58 }
 0x12f   : > { %v824_v18 = vrot.slane %v822_v8, 3 }
 0x130   : > { %v1316_v32 = vpop.permute.xlu0 %1315 }
 0x131   : > { %1519 = vrot.lane.b32.xlu1 %v6538_v57, %s5832_s13  ;;  %v6558_v43 = vpop.permute.xlu1 %1507  ;;  %v1574_v24 = vsel %vm298_vm0, %v6205_v11, %v1316_v32  ;;  %v6611_v11 = vsel %vm913_vm2, %v944_v48, %v945_v51  ;;  %v1140_v32 = vor.u32 %v1139_v60, %v1136_v59  ;;  %v803_v51 = vor.u32 %v802_v23, %v799_v62 }
 0x132   : > { %1517 = vrot.lane.b32.xlu0 %v6492_v37, %s5832_s13  ;;  %v825_v62 = vshll.u32 %v562_v40, 16 }
 0x133   : > { %v6637_v60 = vsel %vm357_vm4, %v803_v51, %v811_v27 }
 0x134   : > { %v1410_v55 = vpop.permute.xlu0 %1409  ;;  %v827_v21 = vrot.slane %v825_v62, 4 }
 0x135   : > { %1551 = vrot.lane.b32.xlu1 %v6561_v45, %s5836_s9 }
 0x136   : > { %1549 = vrot.lane.b32.xlu0 %v6501_v54, %s5836_s9 }
 0x137   : > { %v1348_v1 = vpop.permute.xlu1 %1347 }
 0x138   : > { %v1506_v44 = vpop.permute.xlu0 %1505  ;;  %v1621_v31 = vsel %vm1617_vm12, %v1574_v24, %v1348_v1  ;;  %v561_v1 = vld [vmem:[#allocation2 + $0xc0] sm:$0xf8] }
 0x139   : > { %1331 = vrot.lane.b32.xlu1 %v6538_v57, %s5829_s24  ;;  %v814_v36 = vshrl.u32 %v561_v1, 16  ;;  %v817_v7 = vshll.u32 %v561_v1, 16 }
 0x13a   : > { %1329 = vrot.lane.b32.xlu0 %v6492_v37, %s5829_s24 }
 0x13b   : > { %v1380_v25 = vpop.permute.xlu1 %1379 }
 0x13c   : > { %v1378_v9 = vpop.permute.xlu0 %1377  ;;  %v1654_v16 = vsel %vm1650_vm13, %v1621_v31, %v1380_v25  ;;  %v563_v31 = vld [vmem:[#allocation2 + $0xd0] sm:$0xf8] }
 0x13d   : > { %1363 = vrot.lane.b32.xlu1 %v6561_v45, %s5830_s26  ;;  %v1652_v39 = vsel %vm1650_vm13, %v1619_v35, %v1378_v9  ;;  %v1179_v9 = vshll.u32 %v603_v15, 16 }
 0x13e   : > { %1361 = vrot.lane.b32.xlu0 %v6501_v54, %s5830_s26  ;;  %v1687_v54 = vsel %vm1683_vm14, %v1654_v16, %v6535_v19  ;;  %v1685_v6 = vsel %vm1683_vm14, %v1652_v39, %v1410_v55  ;;  %v6625_v19 = vsel %vm962_vm1, %v1140_v32, %v1148_v47  ;;  %v828_v16 = vor.u32 %v827_v21, %v824_v18  ;;  %v6678_v32 = vld [vmem:[#allocation2 + $0xd8] sm:$0xf] }
 0x13f   : > { %v1444_v37 = vpop.permute.xlu1 %1443  ;;  %v1178_v47 = vrot.slane %v1176_v26, 4 }
 0x140   : > { %v1442_v42 = vpop.permute.xlu0 %1441  ;;  %v1720_v3 = vsel %vm1716_vm15, %v1687_v54, %v1444_v37  ;;  %v1181_v54 = vrot.slane %v1179_v9, 5  ;;  %v954_v9 = vrot.slane %v6678_v32, 4 }
 0x141   : > { %1395 = vrot.lane.b32.xlu1 %v6599_v30, %s5833_s8  ;;  %v1718_v50 = vsel %vm1716_vm15, %v1685_v6, %v1442_v42 }
 0x142   : > { %1393 = vrot.lane.b32.xlu0 %v6521_v10, %s5833_s8 }
 0x143   : > { %v1476_v41 = vpop.permute.xlu1 %1475 }
 0x144   : > { %v1753_v33 = vsel %vm1749_vm3, %v1720_v3, %v1476_v41  ;;  %v1474_v52 = vpop.permute.xlu0 %1473  ;;  %v831_v41 = vshrl.u32 %v563_v31, 16  ;;  %v834_v3 = vshll.u32 %v563_v31, 16 }
 0x145   : > { %1427 = vrot.lane.b32.xlu1 %v6611_v11, %s5831_s11  ;;  %v1751_v48 = vsel %vm1749_vm3, %v1718_v50, %v1474_v52  ;;  %v1786_v55 = vsel %vm1782_vm5, %v1753_v33, %v6558_v43  ;;  %v951_v52 = vrot.slane %v562_v40, 4 }
 0x146   : > { %1425 = vrot.lane.b32.xlu0 %v6538_v57, %s5831_s11  ;;  %v1784_v28 = vsel %vm1782_vm5, %v1751_v48, %v1506_v44  ;;  %v585_v44 = vld [vmem:[#allocation2 + $0xc0] sm:$0xf0]  ;;  %v842_v48 = vshll.u32 %v6678_v32, 16 }
 0x147   : > { %v1540_v56 = vpop.permute.xlu1 %1539  ;;  %v1168_v22 = vshrl.u32 %v585_v44, 16  ;;  %v1171_v25 = vshll.u32 %v585_v44, 16  ;;  %v950_v50 = vrot.slane %v585_v44, 4 }
 0x148   : > { %v1819_v38 = vsel %vm1815_vm6, %v1786_v55, %v1540_v56  ;;  %v1538_v14 = vpop.permute.xlu0 %1537  ;;  %v1182_v56 = vor.u32 %v1181_v54, %v1178_v47  ;;  %v833_v55 = vrot.slane %v831_v41, 3  ;;  %v844_v1 = vrot.slane %v842_v48, 4 }
 0x149   : > { %1459 = vrot.lane.b32.xlu1 %v6625_v19, %s5834_s15  ;;  %v1817_v59 = vsel %vm1815_vm6, %v1784_v28, %v1538_v14  ;;  %v1170_v39 = vrot.slane %v1168_v22, 4  ;;  %v1173_v42 = vrot.slane %v1171_v25, 5  ;;  %v586_v14 = vld [vmem:[#allocation2 + $0xd0] sm:$0xf0] }
 0x14a   : > { %1457 = vrot.lane.b32.xlu0 %v6561_v45, %s5834_s15  ;;  %5326 = vmatprep.mubr.msk.bf16.mxu0 %vm1875_vm8, %v1817_v59  ;;  %v1157_v45 = vor.u32 %v6584_v17, %v6582_v12  ;;  %v816_v12 = vrot.slane %v814_v36, 3  ;;  %v819_v17 = vrot.slane %v817_v7, 4  ;;  %v1185_v8 = vshrl.u32 %v586_v14, 16 }
 0x14b   : > { %v6642_v57 = vpop.permute.xlu1 %1319  ;;  %5327 = vmatmul.mubr.msk.bf16.vlgmr.msra.gmra.mrb[0].mxu0 %vm1875_vm8, %v1819_v38  ;;  %v1174_v27 = vor.u32 %v1173_v42, %v1170_v39  ;;  %v836_v38 = vrot.slane %v834_v3, 4  ;;  %v953_v26 = vrot.slane %v586_v14, 4 }
 0x14c   : > { %v6645_v43 = vpop.permute.xlu0 %1317  ;;  %v6666_v46 = vsel %vm962_vm1, %v1157_v45, %v1165_v0  ;;  %v820_v37 = vor.u32 %v819_v17, %v816_v12  ;;  %v1580_v59 = vsel %vm298_vm0, %v6220_v34, %v6642_v57  ;;  %v6695_v45 = vsel %vm913_vm2, %v950_v50, %v951_v52  ;;  %v565_v50 = vld [vmem:[#allocation2 + $0xe0] sm:$0xf8]  ;;  %v566_v52 = vld [vmem:[#allocation2 + $0xe8] sm:$0xf] }
 0x14d   : > { %1491 = vrot.lane.b32.xlu1 %v6637_v60, %s5835_s30  ;;  %v1577_v40 = vsel %vm298_vm0, %v6198_v63, %v6645_v43  ;;  %v6707_v62 = vsel %vm962_vm1, %v1174_v27, %v1182_v56  ;;  %v837_v44 = vor.u32 %v836_v38, %v833_v55  ;;  %v6741_v41 = vsel %vm913_vm2, %v953_v26, %v954_v9 }
 0x14e   : > { %1489 = vrot.lane.b32.xlu0 %v6599_v30, %s5835_s30  ;;  %v6683_v33 = vsel %vm357_vm4, %v820_v37, %v828_v16  ;;  %v1187_v16 = vrot.slane %v1185_v8, 4  ;;  %v848_v48 = vshrl.u32 %v565_v50, 16  ;;  %v851_v27 = vshll.u32 %v565_v50, 16 }
 0x14f   : > { %v1352_v5 = vpop.permute.xlu1 %1351  ;;  %v856_v56 = vshrl.u32 %v566_v52, 16  ;;  %v859_v55 = vshll.u32 %v566_v52, 16 }
 0x150   : > { %v6661_v53 = vpop.permute.xlu0 %1349  ;;  %v1625_v36 = vsel %vm1617_vm12, %v1580_v59, %v1352_v5  ;;  %v1188_v5 = vshll.u32 %v586_v14, 16  ;;  %v605_v59 = vld [vmem:[#allocation2 + $0xe8] sm:$0x1f] }
 0x151   : > { %1523 = vrot.lane.b32.xlu1 %v6654_v61, %s5832_s13  ;;  %v1623_v34 = vsel %vm1617_vm12, %v1577_v40, %v6661_v53  ;;  %v861_v40 = vrot.slane %v859_v55, 4 }
 0x152   : > { %1521 = vrot.lane.b32.xlu0 %v6611_v11, %s5832_s13 }
 0x153   : > { %v1384_v23 = vpop.permute.xlu1 %1383 }
 0x154   : > { %v1382_v13 = vpop.permute.xlu0 %1381  ;;  %v1658_v57 = vsel %vm1650_vm13, %v1625_v36, %v1384_v23 }
 0x155   : > { %1555 = vrot.lane.b32.xlu1 %v6666_v46, %s5836_s9  ;;  %v1656_v15 = vsel %vm1650_vm13, %v1623_v34, %v1382_v13  ;;  %v1210_v34 = vshrl.u32 %v605_v59, 16 }
 0x156   : > { %1553 = vrot.lane.b32.xlu0 %v6625_v19, %s5836_s9 }
 0x157   : > { %v1416_v58 = vpop.permute.xlu1 %1415 }
 0x158   : > { %v1414_v24 = vpop.permute.xlu0 %1413  ;;  %v1691_v63 = vsel %vm1683_vm14, %v1658_v57, %v1416_v58  ;;  %v1213_v57 = vshll.u32 %v605_v59, 16 }
 0x159   : > { %1335 = vrot.lane.b32.xlu1 %v6654_v61, %s5829_s24  ;;  %v1689_v17 = vsel %vm1683_vm14, %v1656_v15, %v1414_v24 }
 0x15a   : > { %1333 = vrot.lane.b32.xlu0 %v6611_v11, %s5829_s24  ;;  %v839_v11 = vshrl.u32 %v6678_v32, 16 }
 0x15b   : > { %v1448_v35 = vpop.permute.xlu1 %1447 }
 0x15c   : > { %v1446_v6 = vpop.permute.xlu0 %1445  ;;  %v841_v0 = vrot.slane %v839_v11, 3  ;;  %v1724_v53 = vsel %vm1716_vm15, %v1691_v63, %v1448_v35  ;;  %v1190_v35 = vrot.slane %v1188_v5, 5 }
 0x15d   : > { %1367 = vrot.lane.b32.xlu1 %v6666_v46, %s5830_s26  ;;  %v1722_v21 = vsel %vm1716_vm15, %v1689_v17, %v1446_v6 }
 0x15e   : > { %1365 = vrot.lane.b32.xlu0 %v6625_v19, %s5830_s26  ;;  %v604_v19 = vld [vmem:[#allocation2 + $0xd8] sm:$0x1f]  ;;  %v845_v18 = vor.u32 %v844_v1, %v841_v0  ;;  %v1191_v3 = vor.u32 %v1190_v35, %v1187_v16  ;;  %v850_v0 = vrot.slane %v848_v48, 3  ;;  %v853_v1 = vrot.slane %v851_v27, 4  ;;  %v588_v16 = vld [vmem:[#allocation2 + $0xf0] sm:$0xf0] }
 0x15f   : > { %v1480_v51 = vpop.permute.xlu1 %1479  ;;  %v1193_v12 = vshrl.u32 %v604_v19, 16  ;;  %v1196_v23 = vshll.u32 %v604_v19, 16  ;;  %v858_v19 = vrot.slane %v856_v56, 3  ;;  %v1219_v56 = vshrl.u32 %v588_v16, 16 }
 0x160   : > { %v1478_v28 = vpop.permute.xlu0 %1477  ;;  %v1757_v22 = vsel %vm1749_vm3, %v1724_v53, %v1480_v51  ;;  %v6728_v39 = vsel %vm357_vm4, %v837_v44, %v845_v18  ;;  %v854_v15 = vor.u32 %v853_v1, %v850_v0  ;;  %v1212_v18 = vrot.slane %v1210_v34, 4 }
 0x161   : > { %1399 = vrot.lane.b32.xlu1 %v6683_v33, %s5833_s8  ;;  %v1755_v58 = vsel %vm1749_vm3, %v1722_v21, %v1478_v28  ;;  %v1195_v42 = vrot.slane %v1193_v12, 4  ;;  %v1198_v47 = vrot.slane %v1196_v23, 5  ;;  %v587_v28 = vld [vmem:[#allocation2 + $0xe0] sm:$0xf0]  ;;  %v862_v63 = vor.u32 %v861_v40, %v858_v19  ;;  %v6762_v12 = vld [vmem:[#allocation2 + $0xf8] sm:$0xf] }
 0x162   : > { %1397 = vrot.lane.b32.xlu0 %v6637_v60, %s5833_s8  ;;  %v1205_v8 = vshll.u32 %v587_v28, 16  ;;  %v1215_v23 = vrot.slane %v1213_v57, 5  ;;  %v876_v9 = vshll.u32 %v6762_v12, 16  ;;  %v1221_v34 = vrot.slane %v1219_v56, 4 }
 0x163   : > { %v1512_v7 = vpop.permute.xlu1 %1511  ;;  %v1199_v6 = vor.u32 %v1198_v47, %v1195_v42 }
 0x164   : > { %v1510_v43 = vpop.permute.xlu0 %1509  ;;  %v1790_v25 = vsel %vm1782_vm5, %v1757_v22, %v1512_v7  ;;  %v1202_v7 = vshrl.u32 %v587_v28, 16  ;;  %v1207_v53 = vrot.slane %v1205_v8, 5  ;;  %v956_v22 = vrot.slane %v587_v28, 4 }
 0x165   : > { %1431 = vrot.lane.b32.xlu1 %v6695_v45, %s5831_s11  ;;  %v1788_v24 = vsel %vm1782_vm5, %v1755_v58, %v1510_v43  ;;  %v6750_v51 = vsel %vm962_vm1, %v1191_v3, %v1199_v6  ;;  %v567_v43 = vld [vmem:[#allocation2 + $0xf0] sm:$0xf8]  ;;  %v878_v50 = vrot.slane %v876_v9, 4  ;;  %v1222_v28 = vshll.u32 %v588_v16, 16 }
 0x166   : > { %1429 = vrot.lane.b32.xlu0 %v6654_v61, %s5831_s11  ;;  %v1204_v17 = vrot.slane %v1202_v7, 4  ;;  %v865_v58 = vshrl.u32 %v567_v43, 16  ;;  %v868_v26 = vshll.u32 %v567_v43, 16 }
 0x167   : > { %v1544_v13 = vpop.permute.xlu1 %1543  ;;  %v1224_v57 = vrot.slane %v1222_v28, 5  ;;  %v607_v28 = vld [vmem:[#allocation2 + $0x108] sm:$0x1f] }
 0x168   : > { %v1823_v31 = vsel %vm1815_vm6, %v1790_v25, %v1544_v13  ;;  %v1542_v37 = vpop.permute.xlu0 %1541  ;;  %v957_v13 = vrot.slane %v566_v52, 4  ;;  %v6767_v25 = vsel %vm357_vm4, %v854_v15, %v862_v63  ;;  %v867_v42 = vrot.slane %v865_v58, 3 }
 0x169   : > { %1463 = vrot.lane.b32.xlu1 %v6707_v62, %s5834_s15  ;;  %v1821_v61 = vsel %vm1815_vm6, %v1788_v24, %v1542_v37  ;;  %v1216_v37 = vor.u32 %v1215_v23, %v1212_v18  ;;  %v870_v3 = vrot.slane %v868_v26, 4  ;;  %v960_v18 = vrot.slane %v6762_v12, 4  ;;  %v6831_v26 = vld [vmem:[#allocation2 + $0x108] sm:$0xf] }
 0x16a   : > { %1461 = vrot.lane.b32.xlu0 %v6666_v46, %s5834_s15  ;;  %5330 = vmatprep.mubr.msk.bf16.mxu0 %vm1875_vm8, %v1821_v61  ;;  %v6776_v61 = vsel %vm913_vm2, %v956_v22, %v957_v13  ;;  %v1225_v22 = vor.u32 %v1224_v57, %v1221_v34 }
 0x16b   : > { %v6733_v32 = vpop.permute.xlu1 %1323  ;;  %5331 = vmatmul.mubr.msk.bf16.gmra.mrb[4].mxu0 %vm1875_vm8, %v1823_v31  ;;  %v1208_v31 = vor.u32 %v1207_v53, %v1204_v17  ;;  %v871_v19 = vor.u32 %v870_v3, %v867_v42  ;;  %v959_v53 = vrot.slane %v588_v16, 4  ;;  %v1247_v42 = vshll.u32 %v6831_v26, 16  ;;  %v5529_v3 = vld [vmem:[#allocation10 + $0x48] sm:$0xff]  }
 0x16c   : > { %v6736_v54 = vpop.permute.xlu0 %1321  ;;  %v1586_v47 = vsel %vm298_vm0, %v6318_v2, %v6733_v32 }
 0x16d   : > { %1495 = vrot.lane.b32.xlu1 %v6728_v39, %s5835_s30  ;;  %v1583_v52 = vsel %vm298_vm0, %v6262_v20, %v6736_v54  ;;  %v6791_v32 = vsel %vm962_vm1, %v1208_v31, %v1216_v37  ;;  %v6825_v58 = vsel %vm913_vm2, %v959_v53, %v960_v18  ;;  %v5528_v31 = vld [vmem:[#allocation10] sm:$0xff]   ;;  %v1249_v56 = vrot.slane %v1247_v42, 4  ;;  %v5536_v18 = vld [vmem:[#allocation10 + $0x18] sm:$0xff]  }
 0x16e   : > { %1493 = vrot.lane.b32.xlu0 %v6683_v33, %s5835_s30  ;;  %v5539_v42 = vld [vmem:[#allocation10 + $0x60] sm:$0xff]  }
 0x16f   : > { %v1356_v46 = vpop.permute.xlu1 %1355 }
 0x170   : > { %v6745_v11 = vpop.permute.xlu0 %1353  ;;  %v1629_v48 = vsel %vm1617_vm12, %v1586_v47, %v1356_v46 }
 0x171   : > { %1527 = vrot.lane.b32.xlu1 %v6741_v41, %s5832_s13  ;;  %v1627_v55 = vsel %vm1617_vm12, %v1583_v52, %v6745_v11 }
 0x172   : > { %1525 = vrot.lane.b32.xlu0 %v6695_v45, %s5832_s13 }
 0x173   : > { %v1388_v38 = vpop.permute.xlu1 %1387 }
 0x174   : > { %v1386_v14 = vpop.permute.xlu0 %1385  ;;  %v1662_v2 = vsel %vm1650_vm13, %v1629_v48, %v1388_v38 }
 0x175   : > { %1559 = vrot.lane.b32.xlu1 %v6750_v51, %s5836_s9  ;;  %v1660_v59 = vsel %vm1650_vm13, %v1627_v55, %v1386_v14  ;;  %v589_v55 = vld [vmem:[#allocation2 + $0x100] sm:$0xf0] }
 0x176   : > { %1557 = vrot.lane.b32.xlu0 %v6707_v62, %s5836_s9 }
 0x177   : > { %v1420_v36 = vpop.permute.xlu1 %1419 }
 0x178   : > { %v1418_v44 = vpop.permute.xlu0 %1417  ;;  %v1695_v20 = vsel %vm1683_vm14, %v1662_v2, %v1420_v36 }
 0x179   : > { %1339 = vrot.lane.b32.xlu1 %v6741_v41, %s5829_s24  ;;  %v1693_v1 = vsel %vm1683_vm14, %v1660_v59, %v1418_v44  ;;  %v6854_v59 = vld [vmem:[#allocation2 + $0x118] sm:$0xf] }
 0x17a   : > { %1337 = vrot.lane.b32.xlu0 %v6695_v45, %s5829_s24  ;;  %v873_v45 = vshrl.u32 %v6762_v12, 16  ;;  %v569_v12 = vld [vmem:[#allocation2 + $0x100] sm:$0xf8]  ;;  %v1283_v57 = vshrl.u32 %v6854_v59, 16 }
 0x17b   : > { %v1452_v5 = vpop.permute.xlu1 %1451  ;;  %v1236_v37 = vshrl.u32 %v569_v12, 16  ;;  %v1239_v16 = vshll.u32 %v569_v12, 16 }
 0x17c   : > { %v1450_v21 = vpop.permute.xlu0 %1449  ;;  %v875_v6 = vrot.slane %v873_v45, 3  ;;  %v1728_v11 = vsel %vm1716_vm15, %v1695_v20, %v1452_v5  ;;  %v5527_v45 = vld [vmem:[#allocation10 + $0x40] sm:$0xff]  }
 0x17d   : > { %1371 = vrot.lane.b32.xlu1 %v6750_v51, %s5830_s26  ;;  %v1726_v40 = vsel %vm1716_vm15, %v1693_v1, %v1450_v21  ;;  %4848 = vmatprep.subr.bf16.mxu1 %v5527_v45  ;;  %v1238_v52 = vrot.slane %v1236_v37, 3  ;;  %v1241_v48 = vrot.slane %v1239_v16, 4  ;;  %v1261_v1 = vshll.u32 %v589_v55, 16  ;;  %v5538_v37 = vld [vmem:[#allocation10 + $0x88] sm:$0xff]  }
 0x17e   : > { %1369 = vrot.lane.b32.xlu0 %v6707_v62, %s5830_s26  ;;  %v606_v62 = vld [vmem:[#allocation2 + $0xf8] sm:$0x1f]  ;;  %v879_v38 = vor.u32 %v878_v50, %v875_v6  ;;  %4849 = vmatpush3.bf16.msra.mxu1 %v5528_v31  ;;  %v571_v50 = vld [vmem:[#allocation2 + $0x110] sm:$0xf8] }
 0x17f   : > { %v1484_v24 = vpop.permute.xlu1 %1483  ;;  %v1227_v46 = vshrl.u32 %v606_v62, 16  ;;  %v1230_v0 = vshll.u32 %v606_v62, 16  ;;  %v5530_v62 = vld [vmem:[#allocation10 + $0x8] sm:$0xff]   ;;  %4850 = vmatprep.subr.bf16.mxu1 %v5529_v3  ;;  %v1275_v20 = vshrl.u32 %v571_v50, 16  ;;  %v1263_v12 = vrot.slane %v1261_v1, 5 }
 0x180   : > { %v1482_v35 = vpop.permute.xlu0 %1481  ;;  %v1761_v7 = vsel %vm1749_vm3, %v1728_v11, %v1484_v24  ;;  %v1278_v11 = vshll.u32 %v571_v50, 16 }
 0x181   : > { %1403 = vrot.lane.b32.xlu1 %v6767_v25, %s5833_s8  ;;  %v1759_v36 = vsel %vm1749_vm3, %v1726_v40, %v1482_v35  ;;  %v1229_v43 = vrot.slane %v1227_v46, 4  ;;  %v1232_v5 = vrot.slane %v1230_v0, 5  ;;  %v1244_v35 = vshrl.u32 %v6831_v26, 16 }
 0x182   : > { %1401 = vrot.lane.b32.xlu0 %v6728_v39, %s5833_s8  ;;  %4851 = vmatpush3.bf16.msra.mxu1 %v5530_v62  ;;  %v1258_v0 = vshrl.u32 %v589_v55, 16  ;;  %v1242_v40 = vor.u32 %v1241_v48, %v1238_v52  ;;  %v6873_v53 = vrot.slane %v1278_v11, 4  ;;  %v6888_v62 = vld [vmem:[#allocation2 + $0x110] sm:$0xf0] }
 0x183   : > { %v1516_v27 = vpop.permute.xlu1 %1515  ;;  %v1233_v13 = vor.u32 %v1232_v5, %v1229_v43  ;;  %v1254_v5 = vrot.slane %v589_v55, 4  ;;  %v5540_v52 = vld [vmem:[#allocation10 + $0x20] sm:$0xff]  }
 0x184   : > { %v1514_v54 = vpop.permute.xlu0 %1513  ;;  %v1794_v8 = vsel %vm1782_vm5, %v1761_v7, %v1516_v27  ;;  %v1246_v27 = vrot.slane %v1244_v35, 3  ;;  %v6880_v35 = vrot.slane %v1283_v57, 3  ;;  %v5546_v57 = vld [vmem:[#allocation10 + $0x98] sm:$0xff]  }
 0x185   : > { %1435 = vrot.lane.b32.xlu1 %v6776_v61, %s5831_s11  ;;  %v1792_v44 = vsel %vm1782_vm5, %v1759_v36, %v1514_v54  ;;  %v6838_v24 = vsel %vm962_vm1, %v1225_v22, %v1233_v13  ;;  %v5531_v54 = vld [vmem:[#allocation10 + $0x50] sm:$0xff]   ;;  %v1269_v36 = vshll.u32 %v607_v28, 16  ;;  %v5537_v22 = vld [vmem:[#allocation10 + $0xc8] sm:$0xff]  }
 0x186   : > { %1433 = vrot.lane.b32.xlu0 %v6741_v41, %s5831_s11  ;;  %v6811_v41 = vsel %vm357_vm4, %v871_v19, %v879_v38  ;;  %v5532_v19 = vld [vmem:[#allocation10 + $0x10] sm:$0xff]   ;;  %v5533_v38 = vld [vmem:[#allocation10 + $0xc0] sm:$0xff]   ;;  %v1250_v7 = vor.u32 %v1249_v56, %v1246_v27  ;;  %4852 = vmatprep.subr.bf16.mxu1 %v5531_v54 }
 0x187   : > { %v1548_v14 = vpop.permute.xlu1 %1547  ;;  %4853 = vmatpush3.bf16.msra.mxu1 %v5532_v19  ;;  %4960 = vmatprep.subr.bf16.mxu0 %v5533_v38  ;;  %v1271_v31 = vrot.slane %v1269_v36, 5  ;;  %v1297_v19 = vshrl.u32 %v6888_v62, 16 }
 0x188   : > { %v1827_v15 = vsel %vm1815_vm6, %v1794_v8, %v1548_v14  ;;  %v1546_v63 = vpop.permute.xlu0 %1545  ;;  %v1266_v14 = vshrl.u32 %v607_v28, 16  ;;  %v5534_v8 = vld [vmem:[#allocation10 + $0x80] sm:$0xff]   ;;  %v6876_v13 = vsel %vm357_vm4, %v1242_v40, %v1250_v7 }
 0x189   : > { %1467 = vrot.lane.b32.xlu1 %v6791_v32, %s5834_s15  ;;  %v1825_v17 = vsel %vm1815_vm6, %v1792_v44, %v1546_v63  ;;  %v1286_v44 = vshll.u32 %v6854_v59, 16  ;;  %v5535_v63 = vld [vmem:[#allocation10 + $0x58] sm:$0xff]   ;;  %4961 = vmatpush3.bf16.msra.mxu0 %v5534_v8  ;;  %v608_v28 = vld [vmem:[#allocation2 + $0x118] sm:$0x1f] }
 0x18a   : > { %1465 = vrot.lane.b32.xlu0 %v6750_v51, %s5834_s15  ;;  %5334 = vmatprep.mubr.msk.bf16.mxu0 %vm1875_vm8, %v1825_v17  ;;  %v1255_v17 = vrot.slane %v6831_v26, 4  ;;  %v1268_v45 = vrot.slane %v1266_v14, 4  ;;  %v1308_v7 = vshll.u32 %v608_v28, 16  ;;  %v5545_v14 = vld [vmem:[#allocation10 + $0xd8] sm:$0xff]  }
 0x18b   : > { %v6817_v23 = vpop.permute.xlu1 %1327  ;;  %5335 = vmatmul.mubr.msk.bf16.gmra.mrb[8].mxu0 %vm1875_vm8, %v1827_v15  ;;  %v6866_v15 = vrot.slane %v1275_v20, 3  ;;  %4854 = vmatprep.subr.bf16.mxu1 %v5535_v63  ;;  %v6882_v26 = vrot.slane %v1286_v44, 4  ;;  %v5542_v20 = vld [vmem:[#allocation10 + $0x90] sm:$0xff]  }
 0x18c   : > { %v6820_v21 = vpop.permute.xlu0 %1325  ;;  %4855 = vmatpush3.bf16.msra.mxu1 %v5536_v18  ;;  %4962 = vmatprep.subr.bf16.mxu0 %v5537_v22  ;;  %v1592_v48 = vsel %vm298_vm0, %v6448_v49, %v6817_v23  ;;  %v6894_v27 = vsel %vm913_vm2, %v1254_v5, %v1255_v17  ;;  %v1272_v55 = vor.u32 %v1271_v31, %v1268_v45  ;;  %v6948_v31 = vrot.slane %v1308_v7, 5 }
 0x18d   : > { %1499 = vrot.lane.b32.xlu1 %v6811_v41, %s5835_s30  ;;  %v1281_v50 = vor.u32 %v6873_v53, %v6866_v15  ;;  %4963 = vmatpush3.bf16.msra.mxu0 %v5538_v37  ;;  %v1589_v54 = vsel %vm298_vm0, %v6380_v4, %v6820_v21  ;;  %v1289_v49 = vor.u32 %v6882_v26, %v6880_v35  ;;  %v1300_v4 = vshll.u32 %v6888_v62, 16  ;;  %v5543_v21 = vld [vmem:[#allocation10 + $0x68] sm:$0xff]   ;;  %v5548_v37 = vld [vmem:[#allocation10 + $0x30] sm:$0xff]   ;;  %v2113_v35 = vld [vmem:[#allocation3 + $0x10] sm:$0x8] }
 0x18e   : > { %1497 = vrot.lane.b32.xlu0 %v6767_v25, %s5835_s30  ;;  %4856 = vmatprep.subr.bf16.mxu1 %v5539_v42  ;;  %v2116_v53 = vld [vmem:[#allocation3 + $0x20] sm:$0x8] }
 0x18f   : > { %v6829_v51 = vpop.permute.xlu1 %1359  ;;  %v6935_v18 = vrot.slane %v1300_v4, 5  ;;  %v1290_v42 = vsel %vm357_vm4, %v1281_v50, %v1289_v49  ;;  %v5551_v50 = vld [vmem:[#allocation10 + $0x78] sm:$0xff]   ;;  %v6966_v49 = vld [vmem:[#allocation3] sm:$0xf0] }
 0x190   : > { %v6833_v9 = vpop.permute.xlu0 %1357  ;;  %4857 = vmatpush3.bf16.msra.mxu1 %v5540_v52  ;;  %v2307_v52 = vld [vmem:[#allocation3] sm:$0xf8] }
 0x191   : > { %1531 = vrot.lane.b32.xlu1 %v6825_v58, %s5832_s13  ;;  %v1631_v23 = vsel %vm1617_vm12, %v1589_v54, %v6833_v9  ;;  %v1305_v9 = vshrl.u32 %v608_v28, 16  ;;  %4858 = vmatprep.subr.bf16.mxu1 %v5543_v21  ;;  %v5553_v54 = vld [vmem:[#allocation10 + $0xe8] sm:$0xff]  }
 0x192   : > { %1529 = vrot.lane.b32.xlu0 %v6776_v61, %s5832_s13 }
 0x193   : > { %v6844_v47 = vpop.permute.xlu1 %1391  ;;  %v6946_v45 = vrot.slane %v1305_v9, 4 }
 0x194   : > { %v6846_v6 = vpop.permute.xlu0 %1389 }
 0x195   : > { %1563 = vrot.lane.b32.xlu1 %v6838_v24, %s5836_s9 }
 0x196   : > { %1561 = vrot.lane.b32.xlu0 %v6791_v32, %s5836_s9 }
 0x197   : > { %v6852_v2 = vpop.permute.xlu1 %1423 }
 0x198   : > { %v6856_v46 = vpop.permute.xlu0 %1421 }
 0x199   : > { %1343 = vrot.lane.b32.xlu1 %v6825_v58, %s5829_s24 }
 0x19a   : > { %1341 = vrot.lane.b32.xlu0 %v6776_v61, %s5829_s24  ;;  %v1260_v61 = vrot.slane %v1258_v0, 4  ;;  %v1633_v0 = vsel %vm1617_vm12, %v1592_v48, %v6829_v51  ;;  %v1664_v51 = vsel %vm1650_vm13, %v1631_v23, %v6846_v6  ;;  %s5837_s24 = smov [#allocation13]  }
 0x19b   : > { %v6862_v34 = vpop.permute.xlu1 %1455  ;;  %v1666_v11 = vsel %vm1650_vm13, %v1633_v0, %v6844_v47  ;;  %v5544_v47 = vld [vmem:[#allocation10 + $0x28] sm:$0xff]   ;;  %v1697_v36 = vsel %vm1683_vm14, %v1664_v51, %v6856_v46  ;;  %v1294_v46 = vrot.slane %v6854_v59, 4  ;;  %v1311_v51 = vor.u32 %v6948_v31, %v6946_v45 }
 0x19c   : > { %v6868_v43 = vpop.permute.xlu0 %1453  ;;  %v1264_v56 = vor.u32 %v1263_v12, %v1260_v61  ;;  %v1699_v38 = vsel %vm1683_vm14, %v1666_v11, %v6852_v2  ;;  %v1293_v2 = vrot.slane %v6888_v62, 4  ;;  %4859 = vmatpush3.bf16.msra.mxu1 %v5544_v47  ;;  %v6933_v61 = vrot.slane %v1297_v19, 4  ;;  %v2308_v62 = vld [vmem:[#allocation3 + $0x8] sm:$0xf] }
 0x19d   : > { %1375 = vrot.lane.b32.xlu1 %v6838_v24, %s5830_s26  ;;  %v1732_v8 = vsel %vm1716_vm15, %v1699_v38, %v6862_v34  ;;  %v1730_v44 = vsel %vm1716_vm15, %v1697_v36, %v6868_v43  ;;  %v5547_v43 = vld [vmem:[#allocation10 + $0x70] sm:$0xff]   ;;  %v2388_v28 = vshrl.u32 %v2308_v62, 16  ;;  %v2391_v15 = vshll.u32 %v2308_v62, 16  ;;  %v5554_v38 = vld [vmem:[#allocation10 + $0xa8] sm:$0xff]  }
 0x19e   : > { %1373 = vrot.lane.b32.xlu0 %v6791_v32, %s5830_s26  ;;  %v5541_v32 = vld [vmem:[#allocation10 + $0xd0] sm:$0xff]   ;;  %v6922_v6 = vsel %vm962_vm1, %v1264_v56, %v1272_v55  ;;  %4860 = vmatprep.subr.bf16.mxu1 %v5547_v43  ;;  %v2380_v56 = vshrl.u32 %v2307_v52, 16  ;;  %v2383_v55 = vshll.u32 %v2307_v52, 16  ;;  %v2700_v0 = vrot.slane %v2308_v62, 4  ;;  %v5557_v43 = vld [vmem:[#allocation10 + $0xf8] sm:$0xff]  }
 0x19f   : > { %v1488_v16 = vpop.permute.xlu1 %1487  ;;  %4964 = vmatprep.subr.bf16.mxu0 %v5541_v32  ;;  %v2114_v32 = vsel %vm6938_vm10, 0, %v2113_v35  ;;  %v2390_v19 = vrot.slane %v2388_v28, 3  ;;  %v1295_v4 = vsel %vm913_vm2, %v1293_v2, %v1294_v46  ;;  %v1303_v21 = vor.u32 %v6935_v18, %v6933_v61  ;;  %v5555_v36 = vld [vmem:[#allocation10 + $0xf0] sm:$0xff]  }
 0x1a0   : > { %v1486_v3 = vpop.permute.xlu0 %1485  ;;  %4965 = vmatpush3.bf16.msra.mxu0 %v5542_v20  ;;  %v1765_v63 = vsel %vm1749_vm3, %v1732_v8, %v1488_v16  ;;  %v5549_v16 = vld [vmem:[#allocation10 + $0xe0] sm:$0xff]   ;;  %2115 = vst [vmem:[#allocation3 + $0x10] sm:$0x8] %v2114_v32  ;;  %4861 = vmatpush3.bf16.msra.mxu1 %v5548_v37  ;;  %v5552_v20 = vld [vmem:[#allocation10 + $0x38] sm:$0xff]   ;;  %v2382_v23 = vrot.slane %v2380_v56, 3  ;;  %v2385_v11 = vrot.slane %v2383_v55, 4 }
 0x1a1   : > { %1407 = vrot.lane.b32.xlu1 %v6876_v13, %s5833_s8  ;;  %v1763_v34 = vsel %vm1749_vm3, %v1730_v44, %v1486_v3  ;;  %4966 = vmatprep.subr.bf16.mxu0 %v5545_v14  ;;  %v5550_v3 = vld [vmem:[#allocation10 + $0xa0] sm:$0xff]   ;;  %v2393_v14 = vrot.slane %v2391_v15, 4  ;;  %v2166_v2 = vld [vmem:[#allocation3 + $0x28] sm:$0x10]  ;;  %v1312_v46 = vsel %vm962_vm1, %v1303_v21, %v1311_v51 }
 0x1a2   : > { %1405 = vrot.lane.b32.xlu0 %v6811_v41, %s5833_s8  ;;  %4862 = vmatprep.subr.bf16.mxu1 %v5551_v50  ;;  %v2386_v47 = vor.u32 %v2385_v11, %v2382_v23  ;;  %v2163_v8 = vld [vmem:[#allocation3 + $0x18] sm:$0x10]  ;;  %v2119_v23 = vld [vmem:[#allocation3 + $0x30] sm:$0x8]  ;;  %v2172_v21 = vld [vmem:[#allocation3 + $0x48] sm:$0x10] }
 0x1a3   : > { %v1520_v1 = vpop.permute.xlu1 %1519  ;;  %v2120_v11 = vsel %vm6938_vm10, 0, %v2119_v23 }
 0x1a4   : > { %v1518_v40 = vpop.permute.xlu0 %1517  ;;  %v1798_v17 = vsel %vm1782_vm5, %v1765_v63, %v1520_v1  ;;  %4967 = vmatpush3.bf16.msra.mxu0 %v5546_v57  ;;  %4863 = vmatpush3.bf16.msra.mxu1 %v5552_v20  ;;  %v2394_v63 = vor.u32 %v2393_v14, %v2390_v19  ;;  %2121 = vst [vmem:[#allocation3 + $0x30] sm:$0x8] %v2120_v11 }
 0x1a5   : > { %1439 = vrot.lane.b32.xlu1 %v6894_v27, %s5831_s11  ;;  %4968 = vmatprep.subr.bf16.mxu0 %v5549_v16 }
 0x1a6   : > { %1437 = vrot.lane.b32.xlu0 %v6825_v58, %s5831_s11  ;;  %v1796_v58 = vsel %vm1782_vm5, %v1763_v34, %v1518_v40  ;;  %v2699_v40 = vrot.slane %v6966_v49, 4  ;;  %v5556_v34 = vld [vmem:[#allocation10 + $0xb0] sm:$0xff]   ;;  %v2395_v61 = vsel %vm357_vm4, %v2386_v47, %v2394_v63  ;;  %s5747_s11 = sshll.u32 %s5837_s24, 4  ;;  %s5748_s11 = int_to_ptr.vmem [resolvable:$false] %s5747_s11 }
 0x1a7   : > { %v1552_v5 = vpop.permute.xlu1 %1551  ;;  %p5750_p12 = scmp.lt.s32.totalorder %s7787_s16, %s5748_s11 }
 0x1a8   : > { %v1831_v59 = vsel %vm1815_vm6, %v1798_v17, %v1552_v5  ;;  %v1550_v12 = vpop.permute.xlu0 %1549  ;;  %4969 = vmatpush3.bf16.msra.mxu0 %v5550_v3  ;;  %v2701_v57 = vsel %vm913_vm2, %v2699_v40, %v2700_v0  ;;  %v2164_v5 = vsel %vm6976_vm11, 0, %v2163_v8  ;;  %v2169_v40 = vld [vmem:[#allocation3 + $0x38] sm:$0x10] }
 0x1a9   : > { %1471 = vrot.lane.b32.xlu1 %v6922_v6, %s5834_s15  ;;  %v1829_v26 = vsel %vm1815_vm6, %v1796_v58, %v1550_v12  ;;  %4970 = vmatprep.subr.bf16.mxu0 %v5553_v54  ;;  %2165 = vst [vmem:[#allocation3 + $0x18] sm:$0x10] %v2164_v5  ;;  %v5558_v58 = vld [vmem:[#allocation10 + $0xb8] sm:$0xff]   ;;  %v2170_v47 = vsel %vm6976_vm11, 0, %v2169_v40 }
 0x1aa   : > { %1469 = vrot.lane.b32.xlu0 %v6838_v24, %s5834_s15  ;;  %5338 = vmatprep.mubr.msk.bf16.mxu0 %vm1875_vm8, %v1829_v26  ;;  %v2117_v24 = vsel %vm6938_vm10, 0, %v2116_v53  ;;  %2171 = vst [vmem:[#allocation3 + $0x38] sm:$0x10] %v2170_v47 }
 0x1ab   : > { %v6960_v48 = vpop.permute.xlu1 %1331  ;;  %5339 = vmatmul.mubr.msk.bf16.gmra.mrb[12].mxu0 %vm1875_vm8, %v1831_v59  ;;  %2118 = vst [vmem:[#allocation3 + $0x20] sm:$0x8] %v2117_v24  ;;  %3750 = vmatprep.mubr.bf16.mxu1 %v2701_v57 }
 0x1ac   : > { %v1330_v1 = vpop.permute.xlu0 %1329  ;;  %4971 = vmatpush3.bf16.msra.mxu0 %v5554_v38  ;;  %3751 = vmatmul.mubr.bf16.vlgmr.msra.gmra.mrb[0].mxu1 %v2395_v61  ;;  %v1598_v16 = vsel %vm298_vm0, %v6521_v10, %v6960_v48 }
 0x1ad   : > { %1503 = vrot.lane.b32.xlu1 %v1290_v42, %s5835_s30  ;;  %4972 = vmatprep.subr.bf16.mxu0 %v5555_v36  ;;  %v1595_v35 = vsel %vm298_vm0, %v6481_v29, %v1330_v1 }
 0x1ae   : > { %1501 = vrot.lane.b32.xlu0 %v6876_v13, %s5835_s30  ;;  %v2167_v13 = vsel %vm6976_vm11, 0, %v2166_v2 }
 0x1af   : > { %v1364_v7 = vpop.permute.xlu1 %1363  ;;  %2168 = vst [vmem:[#allocation3 + $0x28] sm:$0x10] %v2167_v13 }
 0x1b0   : > { %v1362_v44 = vpop.permute.xlu0 %1361  ;;  %4973 = vmatpush3.bf16.msra.mxu0 %v5556_v34  ;;  %v1637_v26 = vsel %vm1617_vm12, %v1598_v16, %v1364_v7  ;;  %v2173_v7 = vsel %vm6976_vm11, 0, %v2172_v21 }
 0x1b1   : > { %1535 = vrot.lane.b32.xlu1 %v1295_v4, %s5832_s13  ;;  %4974 = vmatprep.subr.bf16.mxu0 %v5557_v43  ;;  %v2122_v4 = vld [vmem:[#allocation3 + $0x40] sm:$0x8]  ;;  %2174 = vst [vmem:[#allocation3 + $0x48] sm:$0x10] %v2173_v7 }
 0x1b2   : > { %1533 = vrot.lane.b32.xlu0 %v6894_v27, %s5832_s13  ;;  %v2123_v38 = vsel %vm6938_vm10, 0, %v2122_v4  ;;  %s5749_s13 = scalar_lea.vmem %s5748_s11, 8192 }
 0x1b3   : > { %v1396_v17 = vpop.permute.xlu1 %1395  ;;  %2124 = vst [vmem:[#allocation3 + $0x40] sm:$0x8] %v2123_v38  ;;  %p5751_p2 = scmp.lt.s32.totalorder %s5749_s13, %s5743_s17 }
 0x1b4   : > { %v1394_v18 = vpop.permute.xlu0 %1393  ;;  %4975 = vmatpush3.bf16.msra.mxu0 %v5558_v58  ;;  %v1670_v3 = vsel %vm1650_vm13, %v1637_v26, %v1396_v17 }
 0x1b5   : > { %1567 = vrot.lane.b32.xlu1 %v1312_v46, %s5836_s9  ;;  %p5752_p1 = por %p5751_p2, %p5750_p12 }
 0x1b6   : > { %1565 = vrot.lane.b32.xlu0 %v6922_v6, %s5836_s9  ;;  %v1635_v6 = vsel %vm1617_vm12, %v1595_v35, %v1362_v44 }
 0x1b7   : > { %v1428_v59 = vpop.permute.xlu1 %1427  ;;  %v1668_v62 = vsel %vm1650_vm13, %v1635_v6, %v1394_v18  ;;  %p5753_p13 = pnand %p5752_p1, %p5746_p7 }
 0x1b8   : > { %v1426_v12 = vpop.permute.xlu0 %1425  ;;  %v1703_v52 = vsel %vm1683_vm14, %v1670_v3, %v1428_v59 }
 0x1b9   : > { %v1701_v56 = vsel %vm1683_vm14, %v1668_v62, %v1426_v12 }
 0x1bb   : > { %v1460_v45 = vpop.permute.xlu1 %1459 }
 0x1bc   : > { %v1458_v27 = vpop.permute.xlu0 %1457  ;;  %v1736_v55 = vsel %vm1716_vm15, %v1703_v52, %v1460_v45  ;;  %v2128_v52 = vld [vmem:[#allocation3 + $0x60] sm:$0x8] }
 0x1bd   : > { %v1734_v10 = vsel %vm1716_vm15, %v1701_v56, %v1458_v27 }
 0x1bf   : > { %v1492_v31 = vpop.permute.xlu1 %1491 }
 0x1c0   : > { %v1490_v37 = vpop.permute.xlu0 %1489  ;;  %v1769_v29 = vsel %vm1749_vm3, %v1736_v55, %v1492_v31  ;;  %v2125_v55 = vld [vmem:[#allocation3 + $0x50] sm:$0x8] }
 0x1c1   : > { %v1767_v28 = vsel %vm1749_vm3, %v1734_v10, %v1490_v37  ;;  %v2129_v10 = vsel %vm6938_vm10, 0, %v2128_v52 }
 0x1c2   : > { %2130 = vst [vmem:[#allocation3 + $0x60] sm:$0x8] %v2129_v10 }
 0x1c3   : > { %v1524_v42 = vpop.permute.xlu1 %1523 }
 0x1c4   : > { %v1522_v32 = vpop.permute.xlu0 %1521  ;;  %v1802_v15 = vsel %vm1782_vm5, %v1769_v29, %v1524_v42  ;;  %v2175_v29 = vld [vmem:[#allocation3 + $0x58] sm:$0x10] }
 0x1c5   : > { %v1800_v53 = vsel %vm1782_vm5, %v1767_v28, %v1522_v32  ;;  %v2178_v32 = vld [vmem:[#allocation3 + $0x68] sm:$0x10]  ;;  %v2126_v28 = vsel %vm6938_vm10, 0, %v2125_v55 }
 0x1c6   : > { %2127 = vst [vmem:[#allocation3 + $0x50] sm:$0x8] %v2126_v28 }
 0x1c7   : > { %v1556_v48 = vpop.permute.xlu1 %1555 }
 0x1c8   : > { %v1835_v50 = vsel %vm1815_vm6, %v1802_v15, %v1556_v48  ;;  %v1554_v20 = vpop.permute.xlu0 %1553  ;;  %v2179_v48 = vsel %vm6976_vm11, 0, %v2178_v32  ;;  %v2176_v15 = vsel %vm6976_vm11, 0, %v2175_v29 }
 0x1c9   : > { %v1833_v54 = vsel %vm1815_vm6, %v1800_v53, %v1554_v20  ;;  %2180 = vst [vmem:[#allocation3 + $0x68] sm:$0x10] %v2179_v48  ;;  %2177 = vst [vmem:[#allocation3 + $0x58] sm:$0x10] %v2176_v15 }
 0x1ca   : > { %5342 = vmatprep.mubr.msk.bf16.mxu0 %vm1875_vm8, %v1833_v54 }
 0x1cb   : > { %v1336_v0 = vpop.permute.xlu1 %1335  ;;  %5343 = vmatmul.mubr.msk.bf16.gmra.mrb[16].mxu0 %vm1875_vm8, %v1835_v50 }
 0x1cc   : > { %v1334_v24 = vpop.permute.xlu0 %1333  ;;  %v1604_v5 = vsel %vm298_vm0, %v6637_v60, %v1336_v0 }
 0x1cd   : > { %v1601_v13 = vsel %vm298_vm0, %v6599_v30, %v1334_v24 }
 0x1cf   : > { %v1368_v1 = vpop.permute.xlu1 %1367 }
 0x1d0   : > { %v1366_v19 = vpop.permute.xlu0 %1365  ;;  %v1641_v46 = vsel %vm1617_vm12, %v1604_v5, %v1368_v1 }
 0x1d1   : > { %v1639_v17 = vsel %vm1617_vm12, %v1601_v13, %v1366_v19 }
 0x1d3   : > { %v1400_v51 = vpop.permute.xlu1 %1399 }
 0x1d4   : > { %v1398_v14 = vpop.permute.xlu0 %1397  ;;  %v1674_v61 = vsel %vm1650_vm13, %v1641_v46, %v1400_v51 }
 0x1d5   : > { %v1672_v18 = vsel %vm1650_vm13, %v1639_v17, %v1398_v14 }
 0x1d7   : > { %v1432_v36 = vpop.permute.xlu1 %1431 }
 0x1d8   : > { %v1430_v8 = vpop.permute.xlu0 %1429  ;;  %v1707_v43 = vsel %vm1683_vm14, %v1674_v61, %v1432_v36  ;;  %v2134_v61 = vld [vmem:[#allocation3 + $0x80] sm:$0x8] }
 0x1d9   : > { %v1705_v59 = vsel %vm1683_vm14, %v1672_v18, %v1430_v8  ;;  %v2184_v18 = vld [vmem:[#allocation3 + $0x88] sm:$0x10] }
 0x1db   : > { %v1464_v2 = vpop.permute.xlu1 %1463 }
 0x1dc   : > { %v1462_v57 = vpop.permute.xlu0 %1461  ;;  %v1740_v12 = vsel %vm1716_vm15, %v1707_v43, %v1464_v2 }
 0x1dd   : > { %v1738_v60 = vsel %vm1716_vm15, %v1705_v59, %v1462_v57  ;;  %v2135_v59 = vsel %vm6938_vm10, 0, %v2134_v61 }
 0x1de   : > { %2136 = vst [vmem:[#allocation3 + $0x80] sm:$0x8] %v2135_v59 }
 0x1df   : > { %v1496_v44 = vpop.permute.xlu1 %1495 }
 0x1e0   : > { %v1494_v63 = vpop.permute.xlu0 %1493  ;;  %v1773_v30 = vsel %vm1749_vm3, %v1740_v12, %v1496_v44  ;;  %v2181_v12 = vld [vmem:[#allocation3 + $0x78] sm:$0x10] }
 0x1e1   : > { %v1771_v27 = vsel %vm1749_vm3, %v1738_v60, %v1494_v63  ;;  %v2185_v60 = vsel %vm6976_vm11, 0, %v2184_v18 }
 0x1e2   : > { %2186 = vst [vmem:[#allocation3 + $0x88] sm:$0x10] %v2185_v60 }
 0x1e3   : > { %v1528_v34 = vpop.permute.xlu1 %1527 }
 0x1e4   : > { %v1526_v58 = vpop.permute.xlu0 %1525  ;;  %v1806_v31 = vsel %vm1782_vm5, %v1773_v30, %v1528_v34 }
 0x1e5   : > { %v1804_v37 = vsel %vm1782_vm5, %v1771_v27, %v1526_v58  ;;  %v2131_v58 = vld [vmem:[#allocation3 + $0x70] sm:$0x8] }
 0x1e6   : > { %v2132_v30 = vsel %vm6938_vm10, 0, %v2131_v58  ;;  %v5562_v58 = vld [vmem:[#allocation10 + $0x108] sm:$0xff]  }
 0x1e7   : > { %v1560_v45 = vpop.permute.xlu1 %1559  ;;  %2133 = vst [vmem:[#allocation3 + $0x70] sm:$0x8] %v2132_v30 }
 0x1e8   : > { %v1839_v16 = vsel %vm1815_vm6, %v1806_v31, %v1560_v45  ;;  %v1558_v35 = vpop.permute.xlu0 %1557  ;;  %v2182_v45 = vsel %vm6976_vm11, 0, %v2181_v12 }
 0x1e9   : > { %v1837_v26 = vsel %vm1815_vm6, %v1804_v37, %v1558_v35  ;;  %2183 = vst [vmem:[#allocation3 + $0x78] sm:$0x10] %v2182_v45 }
 0x1ea   : > { %5346 = vmatprep.mubr.msk.bf16.mxu0 %vm1875_vm8, %v1837_v26  ;;  %v7080_v26 = vld [vmem:[#allocation9] ss:$0 sm:$0xff] }
 0x1eb   : > { %v1340_v42 = vpop.permute.xlu1 %1339  ;;  %5347 = vmatmul.mubr.msk.bf16.gmra.mrb[20].mxu0 %vm1875_vm8, %v1839_v16 }
 0x1ec   : > { %v1338_v6 = vpop.permute.xlu0 %1337  ;;  %v1610_v23 = vsel %vm298_vm0, %v6728_v39, %v1340_v42 }
 0x1ed   : > { %v1607_v11 = vsel %vm298_vm0, %v6683_v33, %v1338_v6 }
 0x1ef   : > { %v1372_v3 = vpop.permute.xlu1 %1371 }
 0x1f0   : > { %v1370_v62 = vpop.permute.xlu0 %1369  ;;  %v1645_v19 = vsel %vm1617_vm12, %v1610_v23, %v1372_v3 }
 0x1f1   : > { %v1643_v21 = vsel %vm1617_vm12, %v1607_v11, %v1370_v62 }
 0x1f3   : > { %v1404_v56 = vpop.permute.xlu1 %1403 }
 0x1f4   : > { %v1402_v53 = vpop.permute.xlu0 %1401  ;;  %v1678_v51 = vsel %vm1650_vm13, %v1645_v19, %v1404_v56 }
 0x1f5   : > { %v1676_v38 = vsel %vm1650_vm13, %v1643_v21, %v1402_v53 }
 0x1f7   : > { %v1436_v50 = vpop.permute.xlu1 %1435 }
 0x1f8   : > { %v1434_v20 = vpop.permute.xlu0 %1433  ;;  %v1711_v40 = vsel %vm1683_vm14, %v1678_v51, %v1436_v50  ;;  %v2764_v50 = vshrl.u32 %v6966_v49, 16 }
 0x1f9   : > { %v1709_v47 = vsel %vm1683_vm14, %v1676_v38, %v1434_v20  ;;  %v2767_v38 = vshll.u32 %v6966_v49, 16 }
 0x1fb   : > { %v1468_v54 = vpop.permute.xlu1 %1467  ;;  %v2769_v61 = vrot.slane %v2767_v38, 5 }
 0x1fc   : > { %v1466_v0 = vpop.permute.xlu0 %1465  ;;  %v1744_v14 = vsel %vm1716_vm15, %v1711_v40, %v1468_v54 }
 0x1fd   : > { %v1742_v39 = vsel %vm1716_vm15, %v1709_v47, %v1466_v0 }
 0x1ff   : > { %v1500_v24 = vpop.permute.xlu1 %1499 }
 0x200   : > { %v1498_v1 = vpop.permute.xlu0 %1497  ;;  %v1777_v33 = vsel %vm1749_vm3, %v1744_v14, %v1500_v24 }
 0x201   : > { %v1775_v8 = vsel %vm1749_vm3, %v1742_v39, %v1498_v1 }
 0x203   : > { %v1532_v4 = vpop.permute.xlu1 %1531 }
 0x204   : > { %v1530_v7 = vpop.permute.xlu0 %1529  ;;  %v1810_v2 = vsel %vm1782_vm5, %v1777_v33, %v1532_v4 }
 0x205   : > { %v1808_v57 = vsel %vm1782_vm5, %v1775_v8, %v1530_v7 }
 0x207   : > { %v1564_v36 = vpop.permute.xlu1 %1563 }
 0x208   : > { %v1843_v44 = vsel %vm1815_vm6, %v1810_v2, %v1564_v36  ;;  %v1562_v63 = vpop.permute.xlu0 %1561 }
 0x209   : > { %v1841_v5 = vsel %vm1815_vm6, %v1808_v57, %v1562_v63 }
 0x20a   : > { %5350 = vmatprep.mubr.msk.bf16.mxu0 %vm1875_vm8, %v1841_v5 }
 0x20b   : > { %v1344_v13 = vpop.permute.xlu1 %1343  ;;  %5351 = vmatmul.mubr.msk.bf16.gmra.mrb[24].mxu0 %vm1875_vm8, %v1843_v44 }
 0x20c   : > { %v1342_v46 = vpop.permute.xlu0 %1341  ;;  %v1616_v55 = vsel %vm298_vm0, %v6811_v41, %v1344_v13  ;;  %v2361_v41 = vld [vmem:[#allocation3 + $0x8] sm:$0x1f]  ;;  %v5559_v13 = vld [vmem:[#allocation10 + $0x140] sm:$0xff]  }
 0x20d   : > { %v1613_v48 = vsel %vm298_vm0, %v6767_v25, %v1342_v46  ;;  %v2772_v39 = vshrl.u32 %v2361_v41, 16  ;;  %v2775_v2 = vshll.u32 %v2361_v41, 16  ;;  %v5560_v46 = vld [vmem:[#allocation10 + $0x100] sm:$0xff]   ;;  %5072 = vmatprep.subr.bf16.mxu1 %v5559_v13 }
 0x20e   : > { %5073 = vmatpush3.bf16.msra.mxu1 %v5560_v46 }
 0x20f   : > { %v1376_v34 = vpop.permute.xlu1 %1375  ;;  %v2774_v18 = vrot.slane %v2772_v39, 4 }
 0x210   : > { %v1374_v17 = vpop.permute.xlu0 %1373  ;;  %v1649_v28 = vsel %vm1617_vm12, %v1616_v55, %v1376_v34  ;;  %v5561_v34 = vld [vmem:[#allocation10 + $0x148] sm:$0xff]  }
 0x211   : > { %v1647_v20 = vsel %vm1617_vm12, %v1613_v48, %v1374_v17  ;;  %v2766_v17 = vrot.slane %v2764_v50, 4  ;;  %5074 = vmatprep.subr.bf16.mxu1 %v5561_v34 }
 0x212   : > { %5075 = vmatpush3.bf16.msra.mxu1 %v5562_v58 }
 0x213   : > { %v1408_v43 = vpop.permute.xlu1 %1407  ;;  %v2770_v59 = vor.u32 %v2769_v61, %v2766_v17 }
 0x214   : > { %v1406_v27 = vpop.permute.xlu0 %1405  ;;  %v1682_v54 = vsel %vm1650_vm13, %v1649_v28, %v1408_v43  ;;  %v2777_v43 = vrot.slane %v2775_v2, 5  ;;  %v2187_v2 = vld [vmem:[#allocation3 + $0x98] sm:$0x10] }
 0x215   : > { %v1680_v1 = vsel %vm1650_vm13, %v1647_v20, %v1406_v27  ;;  %v2188_v34 = vsel %vm6976_vm11, 0, %v2187_v2 }
 0x216   : > { %v2778_v12 = vor.u32 %v2777_v43, %v2774_v18  ;;  %2189 = vst [vmem:[#allocation3 + $0x98] sm:$0x10] %v2188_v34 }
 0x217   : > { %v1440_v31 = vpop.permute.xlu1 %1439 }
 0x218   : > { %v1438_v37 = vpop.permute.xlu0 %1437  ;;  %v1715_v23 = vsel %vm1683_vm14, %v1682_v54, %v1440_v31 }
 0x219   : > { %v1713_v4 = vsel %vm1683_vm14, %v1680_v1, %v1438_v37 }
 0x21b   : > { %v1472_v16 = vpop.permute.xlu1 %1471 }
 0x21c   : > { %v1470_v35 = vpop.permute.xlu0 %1469  ;;  %v1748_v21 = vsel %vm1716_vm15, %v1715_v23, %v1472_v16 }
 0x21d   : > { %v1746_v40 = vsel %vm1716_vm15, %v1713_v4, %v1470_v35 }
 0x21e   : > { %v5328_v42 = vpop.f32.mrb[0].mxu0 }
 0x21f   : > { %v1504_v6 = vpop.permute.xlu1 %1503  ;;  %v1955_v3 = vadd.f32 %v5328_v42, %v7080_v26  ;;  %v1946_v62 = vpop.f32.mrb[1].mxu0 }
 0x220   : > { %v1947_v52 = vadd.f32 %v7080_v26, %v1946_v62  ;;  %v1502_v32 = vpop.permute.xlu0 %1501  ;;  %v5329_v56 = vpop.f32.mrb[2].mxu0  ;;  %v1781_v7 = vsel %vm1749_vm3, %v1748_v21, %v1504_v6 }
 0x221   : > { %v1958_v10 = vadd.f32 %v5329_v56, %v7080_v26  ;;  %v1949_v29 = vpop.f32.mrb[3].mxu0  ;;  %v2075_v0 = vmax.f32 %v1955_v3, 0.0  ;;  %v1779_v33 = vsel %vm1749_vm3, %v1746_v40, %v1502_v32  ;;  %v2779_v32 = vsel %vm962_vm1, %v2770_v59, %v2778_v12 }
 0x222   : > { %v1950_v15 = vadd.f32 %v7080_v26, %v1949_v29  ;;  %v2073_v11 = vmax.f32 %v1947_v52, 0.0 }
 0x223   : > { %v1536_v53 = vpop.permute.xlu1 %1535  ;;  %v2076_v24 = vmax.f32 %v1958_v10, 0.0 }
 0x224   : > { %v2074_v25 = vmax.f32 %v1950_v15, 0.0  ;;  %v1534_v19 = vpop.permute.xlu0 %1533  ;;  %v1814_v8 = vsel %vm1782_vm5, %v1781_v7, %v1536_v53 }
 0x225   : > { %v2212_v51 = vpack.c.bf16 %v2076_v24, %v2075_v0  ;;  %v1812_v44 = vsel %vm1782_vm5, %v1779_v33, %v1534_v19 }
 0x226   : > { %v2211_v47 = vpack.c.bf16 %v2074_v25, %v2073_v11 }
 0x227   : > { %v1568_v14 = vpop.permute.xlu1 %1567  ;;  %v2244_v36 = vrot.slane %v2212_v51, 4 }
 0x228   : > { %v2243_v57 = vrot.slane %v2211_v47, 4  ;;  %v1847_v63 = vsel %vm1815_vm6, %v1814_v8, %v1568_v14  ;;  %v1566_v5 = vpop.permute.xlu0 %1565  ;;  %v2137_v47 = vld [vmem:[#allocation3 + $0x90] sm:$0x8]  ;;  %v2140_v8 = vld [vmem:[#allocation3 + $0xa0] sm:$0x8] }
 0x229   : > { %2277 = vst [vmem:[#allocation3 + $0x28] ss:$-4 sps:$4 sm:$0xff] %v2244_v36   ;;  %v1845_v49 = vsel %vm1815_vm6, %v1812_v44, %v1566_v5  ;;  %v2141_v5 = vsel %vm6938_vm10, 0, %v2140_v8 }
 0x22a   : > { %2275 = vst [vmem:[#allocation3 + $0x18] ss:$-4 sps:$4 sm:$0xff] %v2243_v57   ;;  %5354 = vmatprep.mubr.msk.bf16.mxu0 %vm1875_vm8, %v1845_v49  ;;  %v2190_v57 = vld [vmem:[#allocation3 + $0xa8] sm:$0x10]  ;;  %2142 = vst [vmem:[#allocation3 + $0xa0] sm:$0x8] %v2141_v5 }
 0x22b   : > { %5355 = vmatmul.mubr.msk.bf16.gmra.mrb[28].mxu0 %vm1875_vm8, %v1847_v63  ;;  %v2138_v63 = vsel %vm6938_vm10, 0, %v2137_v47  ;;  %v2191_v17 = vsel %vm6976_vm11, 0, %v2190_v57 }
 0x22c   : > { %2139 = vst [vmem:[#allocation3 + $0x90] sm:$0x8] %v2138_v63  ;;  %2192 = vst [vmem:[#allocation3 + $0xa8] sm:$0x10] %v2191_v17 }
 0x230   : > { %v7108_v60 = vld [vmem:[#allocation3 + $0x20] sm:$0xf0]  ;;  %v2312_v6 = vld [vmem:[#allocation3 + $0x28] sm:$0xf] }
 0x231   : > { %v2311_v30 = vld [vmem:[#allocation3 + $0x20] sm:$0xf8]  ;;  %v2310_v45 = vld [vmem:[#allocation3 + $0x18] sm:$0xf]  ;;  %v2344_v27 = vld [vmem:[#allocation3 + $0x10] sm:$0xf0] }
 0x232   : > { %v2309_v31 = vld [vmem:[#allocation3 + $0x10] sm:$0xf8]  ;;  %v2702_v37 = vrot.slane %v2344_v27, 4  ;;  %v2703_v16 = vrot.slane %v2310_v45, 4  ;;  %v2405_v3 = vshrl.u32 %v2310_v45, 16  ;;  %v2408_v62 = vshll.u32 %v2310_v45, 16 }
 0x233   : > { %v2397_v35 = vshrl.u32 %v2309_v31, 16  ;;  %v2400_v42 = vshll.u32 %v2309_v31, 16  ;;  %v2705_v52 = vrot.slane %v7108_v60, 4  ;;  %v2414_v29 = vshrl.u32 %v2311_v30, 16  ;;  %v2362_v50 = vld [vmem:[#allocation3 + $0x18] sm:$0x1f] }
 0x234   : > { %v7113_v56 = vsel %vm913_vm2, %v2702_v37, %v2703_v16  ;;  %v2407_v48 = vrot.slane %v2405_v3, 3  ;;  %v2410_v28 = vrot.slane %v2408_v62, 4  ;;  %v2706_v15 = vrot.slane %v2312_v6, 4 }
 0x235   : > { %v2399_v55 = vrot.slane %v2397_v35, 3  ;;  %v2402_v10 = vrot.slane %v2400_v42, 4  ;;  %3758 = vmatprep.mubr.bf16.mxu1 %v7113_v56  ;;  %v2417_v53 = vshll.u32 %v2311_v30, 16  ;;  %v2416_v54 = vrot.slane %v2414_v29, 3  ;;  %v2363_v35 = vld [vmem:[#allocation3 + $0x28] sm:$0x1f] }
 0x236   : > { %v2422_v0 = vshrl.u32 %v2312_v6, 16  ;;  %v2425_v24 = vshll.u32 %v2312_v6, 16  ;;  %v2411_v41 = vor.u32 %v2410_v28, %v2407_v48  ;;  %v2781_v23 = vshrl.u32 %v2344_v27, 16  ;;  %v5563_v29 = vld [vmem:[#allocation10 + $0x150] sm:$0xff]   ;;  %v5565_v28 = vld [vmem:[#allocation10 + $0x158] sm:$0xff]  }
 0x237   : > { %v2403_v20 = vor.u32 %v2402_v10, %v2399_v55  ;;  %v2419_v1 = vrot.slane %v2417_v53, 4  ;;  %v2784_v11 = vshll.u32 %v2344_v27, 16  ;;  %v2789_v4 = vshrl.u32 %v2362_v50, 16  ;;  %v5564_v48 = vld [vmem:[#allocation10 + $0x110] sm:$0xff]   ;;  %5076 = vmatprep.subr.bf16.mxu1 %v5563_v29  ;;  %v2193_v29 = vld [vmem:[#allocation3 + $0xb8] sm:$0x10] }
 0x238   : > { %v2424_v25 = vrot.slane %v2422_v0, 3  ;;  %v2427_v19 = vrot.slane %v2425_v24, 4  ;;  %v2792_v21 = vshll.u32 %v2362_v50, 16  ;;  %v7118_v38 = vsel %vm913_vm2, %v2705_v52, %v2706_v15  ;;  %v5566_v15 = vld [vmem:[#allocation10 + $0x1c0] sm:$0xff]   ;;  %5077 = vmatpush3.bf16.msra.mxu1 %v5564_v48  ;;  %v5567_v24 = vld [vmem:[#allocation10 + $0x118] sm:$0xff]  }
 0x239   : > { %v2412_v51 = vsel %vm357_vm4, %v2403_v20, %v2411_v41  ;;  %v2420_v40 = vor.u32 %v2419_v1, %v2416_v54  ;;  %v2783_v7 = vrot.slane %v2781_v23, 4  ;;  %v2786_v39 = vrot.slane %v2784_v11, 5  ;;  %v5568_v0 = vld [vmem:[#allocation10 + $0x180] sm:$0xff]   ;;  %5184 = vmatprep.subr.bf16.mxu0 %v5566_v15  ;;  %5078 = vmatprep.subr.bf16.mxu1 %v5565_v28  ;;  %v2196_v48 = vld [vmem:[#allocation3 + $0xc8] sm:$0x10] }
 0x23a   : > { %3759 = vmatmul.mubr.bf16.gmra.mrb[4].mxu1 %v2412_v51  ;;  %3911 = vmatprep.mubr.bf16.mxu0 %v2412_v51  ;;  %v2428_v14 = vor.u32 %v2427_v19, %v2424_v25  ;;  %v2791_v33 = vrot.slane %v2789_v4, 4  ;;  %v2794_v36 = vrot.slane %v2792_v21, 5  ;;  %v2798_v3 = vshrl.u32 %v7108_v60, 16 }
 0x23b   : > { %3766 = vmatprep.mubr.bf16.mxu1 %v7118_v38  ;;  %3912 = vmatmul.mubr.bf16.vlgmr.msra.gmra.mrb[32].mxu0 %v2779_v32  ;;  %v2787_v13 = vor.u32 %v2786_v39, %v2783_v7  ;;  %v2801_v52 = vshll.u32 %v7108_v60, 16  ;;  %v2806_v32 = vshrl.u32 %v2363_v35, 16  ;;  %v2809_v55 = vshll.u32 %v2363_v35, 16 }
 0x23c   : > { %v7122_v44 = vsel %vm357_vm4, %v2420_v40, %v2428_v14  ;;  %v2795_v46 = vor.u32 %v2794_v36, %v2791_v33  ;;  %v2800_v53 = vrot.slane %v2798_v3, 4  ;;  %5185 = vmatpush3.bf16.msra.mxu0 %v5568_v0  ;;  %5079 = vmatpush3.bf16.msra.mxu1 %v5567_v24  ;;  %v2143_v3 = vld [vmem:[#allocation3 + $0xb0] sm:$0x8]  ;;  %v2194_v0 = vsel %vm6976_vm11, 0, %v2193_v29 }
 0x23d   : > { %3919 = vmatprep.mubr.bf16.mxu0 %v7122_v44  ;;  %v2803_v50 = vrot.slane %v2801_v52, 5  ;;  %v2808_v20 = vrot.slane %v2806_v32, 4  ;;  %v2811_v54 = vrot.slane %v2809_v55, 5  ;;  %v2144_v15 = vsel %vm6938_vm10, 0, %v2143_v3  ;;  %2195 = vst [vmem:[#allocation3 + $0xb8] sm:$0x10] %v2194_v0 }
 0x23e   : > { %v5332_v49 = vpop.f32.mrb[4].mxu0  ;;  %v7139_v45 = vsel %vm962_vm1, %v2787_v13, %v2795_v46  ;;  %2145 = vst [vmem:[#allocation3 + $0xb0] sm:$0x8] %v2144_v15  ;;  %v2197_v24 = vsel %vm6976_vm11, 0, %v2196_v48 }
 0x23f   : > { %v1971_v61 = vadd.f32 %v5332_v49, %v7080_v26  ;;  %v1962_v18 = vpop.f32.mrb[5].mxu0  ;;  %v2804_v60 = vor.u32 %v2803_v50, %v2800_v53  ;;  %v2812_v41 = vor.u32 %v2811_v54, %v2808_v20  ;;  %2198 = vst [vmem:[#allocation3 + $0xc8] sm:$0x10] %v2197_v24 }
 0x240   : > { %v1963_v43 = vadd.f32 %v7080_v26, %v1962_v18  ;;  %v5333_v58 = vpop.f32.mrb[6].mxu0 }
 0x241   : > { %v1974_v59 = vadd.f32 %v5333_v58, %v7080_v26  ;;  %v1965_v12 = vpop.f32.mrb[7].mxu0  ;;  %v2079_v27 = vmax.f32 %v1971_v61, 0.0  ;;  %v7148_v33 = vsel %vm962_vm1, %v2804_v60, %v2812_v41 }
 0x242   : > { %v1966_v30 = vadd.f32 %v7080_v26, %v1965_v12  ;;  %3767 = vmatmul.mubr.bf16.gmra.mrb[8].mxu1 %v7122_v44  ;;  %v2077_v37 = vmax.f32 %v1963_v43, 0.0 }
 0x243   : > { %v2080_v31 = vmax.f32 %v1974_v59, 0.0  ;;  %3920 = vmatmul.mubr.bf16.gmra.mrb[36].mxu0 %v7139_v45 }
 0x244   : > { %v2078_v16 = vmax.f32 %v1966_v30, 0.0 }
 0x245   : > { %v2214_v42 = vpack.c.bf16 %v2080_v31, %v2079_v27 }
 0x246   : > { %v2213_v6 = vpack.c.bf16 %v2078_v16, %v2077_v37 }
 0x247   : > { %v2246_v62 = vrot.slane %v2214_v42, 4 }
 0x248   : > { %v2245_v10 = vrot.slane %v2213_v6, 4 }
 0x249   : > { %2281 = vst [vmem:[#allocation3 + $0x48] ss:$-4 sps:$4 sm:$0xff] %v2246_v62  }
 0x24a   : > { %2279 = vst [vmem:[#allocation3 + $0x38] ss:$-4 sps:$4 sm:$0xff] %v2245_v10   ;;  %v2146_v10 = vld [vmem:[#allocation3 + $0xc0] sm:$0x8] }
 0x24b   : > { %v2147_v53 = vsel %vm6938_vm10, 0, %v2146_v10 }
 0x24c   : > { %2148 = vst [vmem:[#allocation3 + $0xc0] sm:$0x8] %v2147_v53 }
 0x250   : > { %v7144_v1 = vld [vmem:[#allocation3 + $0x40] sm:$0xf0]  ;;  %v2316_v7 = vld [vmem:[#allocation3 + $0x48] sm:$0xf] }
 0x251   : > { %v2315_v23 = vld [vmem:[#allocation3 + $0x40] sm:$0xf8]  ;;  %v2314_v11 = vld [vmem:[#allocation3 + $0x38] sm:$0xf]  ;;  %v2346_v25 = vld [vmem:[#allocation3 + $0x30] sm:$0xf0] }
 0x252   : > { %v2313_v19 = vld [vmem:[#allocation3 + $0x30] sm:$0xf8]  ;;  %v2708_v4 = vrot.slane %v2346_v25, 4  ;;  %v2709_v21 = vrot.slane %v2314_v11, 4  ;;  %v2439_v47 = vshrl.u32 %v2314_v11, 16  ;;  %v2442_v14 = vshll.u32 %v2314_v11, 16 }
 0x253   : > { %v2431_v51 = vshrl.u32 %v2313_v19, 16  ;;  %v2434_v40 = vshll.u32 %v2313_v19, 16  ;;  %v2711_v39 = vrot.slane %v7144_v1, 4  ;;  %v2448_v57 = vshrl.u32 %v2315_v23, 16  ;;  %v2364_v46 = vld [vmem:[#allocation3 + $0x38] sm:$0x1f] }
 0x254   : > { %v7151_v36 = vsel %vm913_vm2, %v2708_v4, %v2709_v21  ;;  %v2441_v63 = vrot.slane %v2439_v47, 3  ;;  %v2444_v5 = vrot.slane %v2442_v14, 4  ;;  %v2712_v49 = vrot.slane %v2316_v7, 4  ;;  %v2365_v14 = vld [vmem:[#allocation3 + $0x48] sm:$0x1f] }
 0x255   : > { %v2433_v8 = vrot.slane %v2431_v51, 3  ;;  %v2436_v2 = vrot.slane %v2434_v40, 4  ;;  %3774 = vmatprep.mubr.bf16.mxu1 %v7151_v36  ;;  %v2451_v13 = vshll.u32 %v2315_v23, 16  ;;  %v2450_v17 = vrot.slane %v2448_v57, 3 }
 0x256   : > { %v2456_v61 = vshrl.u32 %v2316_v7, 16  ;;  %v2459_v18 = vshll.u32 %v2316_v7, 16  ;;  %v2445_v43 = vor.u32 %v2444_v5, %v2441_v63  ;;  %v2815_v59 = vshrl.u32 %v2346_v25, 16 }
 0x257   : > { %v2437_v34 = vor.u32 %v2436_v2, %v2433_v8  ;;  %v2453_v58 = vrot.slane %v2451_v13, 4  ;;  %v2818_v12 = vshll.u32 %v2346_v25, 16  ;;  %v2823_v31 = vshrl.u32 %v2364_v46, 16 }
 0x258   : > { %v2458_v30 = vrot.slane %v2456_v61, 3  ;;  %v2461_v27 = vrot.slane %v2459_v18, 4  ;;  %v2826_v37 = vshll.u32 %v2364_v46, 16  ;;  %v7158_v35 = vsel %vm913_vm2, %v2711_v39, %v2712_v49  ;;  %v5569_v46 = vld [vmem:[#allocation10 + $0x160] sm:$0xff]   ;;  %v5572_v61 = vld [vmem:[#allocation10 + $0x188] sm:$0xff]  }
 0x259   : > { %v7155_v16 = vsel %vm357_vm4, %v2437_v34, %v2445_v43  ;;  %v2454_v42 = vor.u32 %v2453_v58, %v2450_v17  ;;  %v2817_v6 = vrot.slane %v2815_v59, 4  ;;  %v2820_v52 = vrot.slane %v2818_v12, 5  ;;  %v5570_v34 = vld [vmem:[#allocation10 + $0x1c8] sm:$0xff]   ;;  %v5571_v17 = vld [vmem:[#allocation10 + $0x120] sm:$0xff]   ;;  %5080 = vmatprep.subr.bf16.mxu1 %v5569_v46 }
 0x25a   : > { %3775 = vmatmul.mubr.bf16.gmra.mrb[12].mxu1 %v7155_v16  ;;  %3927 = vmatprep.mubr.bf16.mxu0 %v7155_v16  ;;  %v2462_v62 = vor.u32 %v2461_v27, %v2458_v30  ;;  %v2825_v32 = vrot.slane %v2823_v31, 4  ;;  %v2828_v55 = vrot.slane %v2826_v37, 5  ;;  %v2832_v2 = vshrl.u32 %v7144_v1, 16  ;;  %v5573_v18 = vld [vmem:[#allocation10 + $0x168] sm:$0xff]   ;;  %v5574_v30 = vld [vmem:[#allocation10 + $0x1d0] sm:$0xff]  }
 0x25b   : > { %3782 = vmatprep.mubr.bf16.mxu1 %v7158_v35  ;;  %3928 = vmatmul.mubr.bf16.gmra.mrb[40].mxu0 %v7148_v33  ;;  %v2821_v20 = vor.u32 %v2820_v52, %v2817_v6  ;;  %v2835_v63 = vshll.u32 %v7144_v1, 16  ;;  %v2840_v5 = vshrl.u32 %v2365_v14, 16  ;;  %v2843_v49 = vshll.u32 %v2365_v14, 16  ;;  %v5575_v1 = vld [vmem:[#allocation10 + $0x128] sm:$0xff]   ;;  %v5576_v27 = vld [vmem:[#allocation10 + $0x190] sm:$0xff]  }
 0x25c   : > { %v7165_v28 = vsel %vm357_vm4, %v2454_v42, %v2462_v62  ;;  %v2829_v54 = vor.u32 %v2828_v55, %v2825_v32  ;;  %v2834_v43 = vrot.slane %v2832_v2, 4  ;;  %5186 = vmatprep.subr.bf16.mxu0 %v5570_v34  ;;  %5081 = vmatpush3.bf16.msra.mxu1 %v5571_v17  ;;  %v2149_v17 = vld [vmem:[#allocation3 + $0xd0] sm:$0x8] }
 0x25d   : > { %3935 = vmatprep.mubr.bf16.mxu0 %v7165_v28  ;;  %v2837_v58 = vrot.slane %v2835_v63, 5  ;;  %v2842_v59 = vrot.slane %v2840_v5, 4  ;;  %v2845_v12 = vrot.slane %v2843_v49, 5  ;;  %5187 = vmatpush3.bf16.msra.mxu0 %v5572_v61 }
 0x25e   : > { %v5336_v50 = vpop.f32.mrb[8].mxu0  ;;  %v7182_v21 = vsel %vm962_vm1, %v2821_v20, %v2829_v54  ;;  %5082 = vmatprep.subr.bf16.mxu1 %v5573_v18  ;;  %5188 = vmatprep.subr.bf16.mxu0 %v5574_v30  ;;  %v2202_v30 = vld [vmem:[#allocation3 + $0xe8] sm:$0x10] }
 0x25f   : > { %v1987_v60 = vadd.f32 %v5336_v50, %v7080_v26  ;;  %v1978_v41 = vpop.f32.mrb[9].mxu0  ;;  %v2838_v31 = vor.u32 %v2837_v58, %v2834_v43  ;;  %v2846_v37 = vor.u32 %v2845_v12, %v2842_v59  ;;  %v2152_v59 = vld [vmem:[#allocation3 + $0xe0] sm:$0x8]  ;;  %v2199_v12 = vld [vmem:[#allocation3 + $0xd8] sm:$0x10] }
 0x260   : > { %v1979_v23 = vadd.f32 %v7080_v26, %v1978_v41  ;;  %v5337_v11 = vpop.f32.mrb[10].mxu0  ;;  %5083 = vmatpush3.bf16.msra.mxu1 %v5575_v1 }
 0x261   : > { %v1990_v25 = vadd.f32 %v5337_v11, %v7080_v26  ;;  %v1981_v19 = vpop.f32.mrb[11].mxu0  ;;  %v2083_v51 = vmax.f32 %v1987_v60, 0.0  ;;  %5189 = vmatpush3.bf16.msra.mxu0 %v5576_v27  ;;  %v7191_v20 = vsel %vm962_vm1, %v2838_v31, %v2846_v37  ;;  %v2150_v27 = vsel %vm6938_vm10, 0, %v2149_v17 }
 0x262   : > { %v1982_v4 = vadd.f32 %v7080_v26, %v1981_v19  ;;  %3783 = vmatmul.mubr.bf16.gmra.mrb[16].mxu1 %v7165_v28  ;;  %v2081_v7 = vmax.f32 %v1979_v23, 0.0  ;;  %2151 = vst [vmem:[#allocation3 + $0xd0] sm:$0x8] %v2150_v27  ;;  %v2153_v31 = vsel %vm6938_vm10, 0, %v2152_v59 }
 0x263   : > { %v2084_v40 = vmax.f32 %v1990_v25, 0.0  ;;  %3936 = vmatmul.mubr.bf16.gmra.mrb[44].mxu0 %v7182_v21  ;;  %2154 = vst [vmem:[#allocation3 + $0xe0] sm:$0x8] %v2153_v31 }
 0x264   : > { %v2082_v47 = vmax.f32 %v1982_v4, 0.0 }
 0x265   : > { %v2216_v39 = vpack.c.bf16 %v2084_v40, %v2083_v51 }
 0x266   : > { %v2215_v8 = vpack.c.bf16 %v2082_v47, %v2081_v7 }
 0x267   : > { %v2248_v57 = vrot.slane %v2216_v39, 4 }
 0x268   : > { %v2247_v13 = vrot.slane %v2215_v8, 4 }
 0x269   : > { %2285 = vst [vmem:[#allocation3 + $0x68] ss:$-4 sps:$4 sm:$0xff] %v2248_v57  }
 0x26a   : > { %2283 = vst [vmem:[#allocation3 + $0x58] ss:$-4 sps:$4 sm:$0xff] %v2247_v13  }
 0x270   : > { %v7187_v42 = vld [vmem:[#allocation3 + $0x60] sm:$0xf0]  ;;  %v2320_v48 = vld [vmem:[#allocation3 + $0x68] sm:$0xf] }
 0x271   : > { %v2319_v6 = vld [vmem:[#allocation3 + $0x60] sm:$0xf8]  ;;  %v2318_v3 = vld [vmem:[#allocation3 + $0x58] sm:$0xf]  ;;  %v2348_v62 = vld [vmem:[#allocation3 + $0x50] sm:$0xf0] }
 0x272   : > { %v2317_v52 = vld [vmem:[#allocation3 + $0x50] sm:$0xf8]  ;;  %v2714_v32 = vrot.slane %v2348_v62, 4  ;;  %v2715_v55 = vrot.slane %v2318_v3, 4  ;;  %v2473_v15 = vshrl.u32 %v2318_v3, 16  ;;  %v2476_v53 = vshll.u32 %v2318_v3, 16 }
 0x273   : > { %v2465_v10 = vshrl.u32 %v2317_v52, 16  ;;  %v2468_v29 = vshll.u32 %v2317_v52, 16  ;;  %v2717_v50 = vrot.slane %v7187_v42, 4  ;;  %v2482_v60 = vshrl.u32 %v2319_v6, 16  ;;  %v2366_v19 = vld [vmem:[#allocation3 + $0x58] sm:$0x1f] }
 0x274   : > { %v7194_v54 = vsel %vm913_vm2, %v2714_v32, %v2715_v55  ;;  %v2475_v41 = vrot.slane %v2473_v15, 3  ;;  %v2478_v23 = vrot.slane %v2476_v53, 4  ;;  %v2718_v11 = vrot.slane %v2320_v48, 4 }
 0x275   : > { %v2467_v0 = vrot.slane %v2465_v10, 3  ;;  %v2470_v24 = vrot.slane %v2468_v29, 4  ;;  %3790 = vmatprep.mubr.bf16.mxu1 %v7194_v54  ;;  %v2485_v25 = vshll.u32 %v2319_v6, 16  ;;  %v2484_v51 = vrot.slane %v2482_v60, 3 }
 0x276   : > { %v2490_v40 = vshrl.u32 %v2320_v48, 16  ;;  %v2493_v7 = vshll.u32 %v2320_v48, 16  ;;  %v2479_v47 = vor.u32 %v2478_v23, %v2475_v41  ;;  %v2849_v39 = vshrl.u32 %v2348_v62, 16  ;;  %v2367_v23 = vld [vmem:[#allocation3 + $0x68] sm:$0x1f] }
 0x277   : > { %v2471_v4 = vor.u32 %v2470_v24, %v2467_v0  ;;  %v2487_v14 = vrot.slane %v2485_v25, 4  ;;  %v2852_v8 = vshll.u32 %v2348_v62, 16  ;;  %v2857_v63 = vshrl.u32 %v2366_v19, 16 }
 0x278   : > { %v2492_v2 = vrot.slane %v2490_v40, 3  ;;  %v2495_v57 = vrot.slane %v2493_v7, 4  ;;  %v2860_v5 = vshll.u32 %v2366_v19, 16  ;;  %v7201_v13 = vsel %vm913_vm2, %v2717_v50, %v2718_v11 }
 0x279   : > { %v7198_v49 = vsel %vm357_vm4, %v2471_v4, %v2479_v47  ;;  %v2488_v46 = vor.u32 %v2487_v14, %v2484_v51  ;;  %v2851_v34 = vrot.slane %v2849_v39, 4  ;;  %v2854_v18 = vrot.slane %v2852_v8, 5  ;;  %v5577_v14 = vld [vmem:[#allocation10 + $0x170] sm:$0xff]   ;;  %v5578_v39 = vld [vmem:[#allocation10 + $0x1d8] sm:$0xff]  }
 0x27a   : > { %3791 = vmatmul.mubr.bf16.gmra.mrb[20].mxu1 %v7198_v49  ;;  %3943 = vmatprep.mubr.bf16.mxu0 %v7198_v49  ;;  %v2496_v61 = vor.u32 %v2495_v57, %v2492_v2  ;;  %v2859_v43 = vrot.slane %v2857_v63, 4  ;;  %v2862_v58 = vrot.slane %v2860_v5, 5  ;;  %v2200_v62 = vsel %vm6976_vm11, 0, %v2199_v12  ;;  %v5579_v8 = vld [vmem:[#allocation10 + $0x130] sm:$0xff]   ;;  %v5580_v2 = vld [vmem:[#allocation10 + $0x198] sm:$0xff]  }
 0x27b   : > { %3798 = vmatprep.mubr.bf16.mxu1 %v7201_v13  ;;  %3944 = vmatmul.mubr.bf16.gmra.mrb[48].mxu0 %v7191_v20  ;;  %v2855_v6 = vor.u32 %v2854_v18, %v2851_v34  ;;  %v2203_v52 = vsel %vm6976_vm11, 0, %v2202_v30  ;;  %2201 = vst [vmem:[#allocation3 + $0xd8] sm:$0x10] %v2200_v62  ;;  %v2866_v19 = vshrl.u32 %v7187_v42, 16  ;;  %v2869_v51 = vshll.u32 %v7187_v42, 16 }
 0x27c   : > { %v7208_v1 = vsel %vm357_vm4, %v2488_v46, %v2496_v61  ;;  %v2863_v3 = vor.u32 %v2862_v58, %v2859_v43  ;;  %2204 = vst [vmem:[#allocation3 + $0xe8] sm:$0x10] %v2203_v52  ;;  %v2874_v40 = vshrl.u32 %v2367_v23, 16  ;;  %v2877_v7 = vshll.u32 %v2367_v23, 16  ;;  %5084 = vmatprep.subr.bf16.mxu1 %v5577_v14  ;;  %5190 = vmatprep.subr.bf16.mxu0 %v5578_v39  ;;  %v5582_v23 = vld [vmem:[#allocation10 + $0x1e0] sm:$0xff]  }
 0x27d   : > { %3951 = vmatprep.mubr.bf16.mxu0 %v7208_v1  ;;  %v2868_v63 = vrot.slane %v2866_v19, 4  ;;  %v2871_v5 = vrot.slane %v2869_v51, 5  ;;  %5085 = vmatpush3.bf16.msra.mxu1 %v5579_v8 }
 0x27e   : > { %v5340_v37 = vpop.f32.mrb[12].mxu0  ;;  %v7225_v50 = vsel %vm962_vm1, %v2855_v6, %v2863_v3  ;;  %v2876_v46 = vrot.slane %v2874_v40, 4  ;;  %v2879_v34 = vrot.slane %v2877_v7, 5  ;;  %5191 = vmatpush3.bf16.msra.mxu0 %v5580_v2  ;;  %v5584_v40 = vld [vmem:[#allocation10 + $0x1a0] sm:$0xff]  }
 0x27f   : > { %v2003_v32 = vadd.f32 %v5340_v37, %v7080_v26  ;;  %v1994_v55 = vpop.f32.mrb[13].mxu0  ;;  %v4864_v57 = vpop.f32.mrb[0].mxu1  ;;  %v2872_v58 = vor.u32 %v2871_v5, %v2868_v63  ;;  %5192 = vmatprep.subr.bf16.mxu0 %v5582_v23 }
 0x280   : > { %v1995_v10 = vadd.f32 %v7080_v26, %v1994_v55  ;;  %v5341_v29 = vpop.f32.mrb[14].mxu0  ;;  %v4865_v17 = vpop.f32.mrb[1].mxu1  ;;  %v2880_v59 = vor.u32 %v2879_v34, %v2876_v46 }
 0x281   : > { %v2006_v48 = vadd.f32 %v5341_v29, %v7080_v26  ;;  %v1997_v15 = vpop.f32.mrb[15].mxu0  ;;  %v2087_v0 = vmax.f32 %v2003_v32, 0.0  ;;  %v7230_v42 = vadd.f32 %v4865_v17, %v4864_v57  ;;  %v4867_v61 = vpop.f32.mrb[2].mxu1 }
 0x282   : > { %v1998_v53 = vadd.f32 %v7080_v26, %v1997_v15  ;;  %3799 = vmatmul.mubr.bf16.gmra.mrb[24].mxu1 %v7208_v1  ;;  %v2085_v60 = vmax.f32 %v1995_v10, 0.0  ;;  %v4868_v18 = vpop.f32.mrb[3].mxu1  ;;  %5193 = vmatpush3.bf16.msra.mxu0 %v5584_v40 }
 0x283   : > { %v2088_v24 = vmax.f32 %v2006_v48, 0.0  ;;  %3952 = vmatmul.mubr.bf16.gmra.mrb[52].mxu0 %v7225_v50  ;;  %v7232_v43 = vadd.f32 %v4868_v18, %v4867_v61  ;;  %v7238_v48 = vsel %vm962_vm1, %v2872_v58, %v2880_v59 }
 0x284   : > { %v2086_v41 = vmax.f32 %v1998_v53, 0.0 }
 0x285   : > { %v2218_v11 = vpack.c.bf16 %v2088_v24, %v2087_v0 }
 0x286   : > { %v2217_v25 = vpack.c.bf16 %v2086_v41, %v2085_v60  ;;  %v5581_v41 = vld [vmem:[#allocation10 + $0x178] sm:$0xff]  }
 0x287   : > { %v2250_v4 = vrot.slane %v2218_v11, 4  ;;  %v5583_v11 = vld [vmem:[#allocation10 + $0x138] sm:$0xff]   ;;  %5086 = vmatprep.subr.bf16.mxu1 %v5581_v41  ;;  %v7262_v41 = vld [vmem:[#allocation10 + $0x200] sm:$0xff]  }
 0x288   : > { %v2249_v47 = vrot.slane %v2217_v25, 4  ;;  %5087 = vmatpush3.bf16.msra.mxu1 %v5583_v11 }
 0x289   : > { %2289 = vst [vmem:[#allocation3 + $0x88] ss:$-4 sps:$4 sm:$0xff] %v2250_v4   ;;  %5406 = vmatprep.subr.bf16.mxu1 %v7262_v41 }
 0x28a   : > { %2287 = vst [vmem:[#allocation3 + $0x78] ss:$-4 sps:$4 sm:$0xff] %v2249_v47  }
 0x290   : > { %v7234_v12 = vld [vmem:[#allocation3 + $0x80] sm:$0xf0]  ;;  %v2324_v32 = vld [vmem:[#allocation3 + $0x88] sm:$0xf] }
 0x291   : > { %v2323_v30 = vld [vmem:[#allocation3 + $0x80] sm:$0xf8]  ;;  %v2322_v27 = vld [vmem:[#allocation3 + $0x78] sm:$0xf]  ;;  %v2350_v31 = vld [vmem:[#allocation3 + $0x70] sm:$0xf0] }
 0x292   : > { %v2321_v37 = vld [vmem:[#allocation3 + $0x70] sm:$0xf8]  ;;  %v2720_v6 = vrot.slane %v2350_v31, 4  ;;  %v2721_v3 = vrot.slane %v2322_v27, 4  ;;  %v2507_v55 = vshrl.u32 %v2322_v27, 16  ;;  %v2510_v10 = vshll.u32 %v2322_v27, 16 }
 0x293   : > { %v2499_v62 = vshrl.u32 %v2321_v37, 16  ;;  %v2502_v52 = vshll.u32 %v2321_v37, 16  ;;  %v2723_v29 = vrot.slane %v7234_v12, 4  ;;  %v2368_v15 = vld [vmem:[#allocation3 + $0x78] sm:$0x1f]  ;;  %v2516_v60 = vshrl.u32 %v2323_v30, 16 }
 0x294   : > { %v7241_v53 = vsel %vm913_vm2, %v2720_v6, %v2721_v3  ;;  %v2509_v25 = vrot.slane %v2507_v55, 3  ;;  %v2512_v19 = vrot.slane %v2510_v10, 4  ;;  %v2724_v4 = vrot.slane %v2324_v32, 4  ;;  %v2158_v3 = vld [vmem:[#allocation3 + $0x100] sm:$0x8] }
 0x295   : > { %v2501_v0 = vrot.slane %v2499_v62, 3  ;;  %v2504_v24 = vrot.slane %v2502_v52, 4  ;;  %3806 = vmatprep.mubr.bf16.mxu1 %v7241_v53  ;;  %v2519_v51 = vshll.u32 %v2323_v30, 16  ;;  %v2518_v47 = vrot.slane %v2516_v60, 3  ;;  %v2155_v30 = vld [vmem:[#allocation3 + $0xf0] sm:$0x8] }
 0x296   : > { %v2524_v14 = vshrl.u32 %v2324_v32, 16  ;;  %v2527_v39 = vshll.u32 %v2324_v32, 16  ;;  %v2513_v8 = vor.u32 %v2512_v19, %v2509_v25  ;;  %v2883_v57 = vshrl.u32 %v2350_v31, 16  ;;  %v2205_v62 = vld [vmem:[#allocation3 + $0xf8] sm:$0x10] }
 0x297   : > { %v2505_v7 = vor.u32 %v2504_v24, %v2501_v0  ;;  %v2521_v2 = vrot.slane %v2519_v51, 4  ;;  %v2886_v63 = vshll.u32 %v2350_v31, 16  ;;  %v2891_v34 = vshrl.u32 %v2368_v15, 16  ;;  %v2208_v52 = vld [vmem:[#allocation3 + $0x108] sm:$0x10] }
 0x298   : > { %v2526_v5 = vrot.slane %v2524_v14, 3  ;;  %v2529_v46 = vrot.slane %v2527_v39, 4  ;;  %v2894_v17 = vshll.u32 %v2368_v15, 16  ;;  %v7248_v18 = vsel %vm913_vm2, %v2723_v29, %v2724_v4  ;;  %v5585_v29 = vld [vmem:[#allocation10 + $0x1e8] sm:$0xff]  }
 0x299   : > { %v7245_v61 = vsel %vm357_vm4, %v2505_v7, %v2513_v8  ;;  %v2522_v58 = vor.u32 %v2521_v2, %v2518_v47  ;;  %v2885_v59 = vrot.slane %v2883_v57, 4  ;;  %v2888_v31 = vrot.slane %v2886_v63, 5  ;;  %v5586_v15 = vld [vmem:[#allocation10 + $0x1a8] sm:$0xff]   ;;  %5194 = vmatprep.subr.bf16.mxu0 %v5585_v29  ;;  %v2369_v2 = vld [vmem:[#allocation3 + $0x88] sm:$0x1f] }
 0x29a   : > { %3807 = vmatmul.mubr.bf16.gmra.mrb[28].mxu1 %v7245_v61  ;;  %3959 = vmatprep.mubr.bf16.mxu0 %v7245_v61  ;;  %v2530_v27 = vor.u32 %v2529_v46, %v2526_v5  ;;  %v2893_v37 = vrot.slane %v2891_v34, 4  ;;  %v2896_v6 = vrot.slane %v2894_v17, 5  ;;  %v2156_v55 = vsel %vm6938_vm10, 0, %v2155_v30  ;;  %v5588_v63 = vld [vmem:[#allocation10 + $0x1f0] sm:$0xff]   ;;  %v5590_v46 = vld [vmem:[#allocation10 + $0x1f8] sm:$0xff]  }
 0x29b   : > { %3814 = vmatprep.mubr.bf16.mxu1 %v7248_v18  ;;  %3960 = vmatmul.mubr.bf16.gmra.mrb[56].mxu0 %v7238_v48  ;;  %2157 = vst [vmem:[#allocation3 + $0xf0] sm:$0x8] %v2156_v55  ;;  %v2159_v10 = vsel %vm6938_vm10, 0, %v2158_v3  ;;  %v2889_v24 = vor.u32 %v2888_v31, %v2885_v59  ;;  %v2206_v23 = vsel %vm6976_vm11, 0, %v2205_v62  ;;  %v2209_v11 = vsel %vm6976_vm11, 0, %v2208_v52  ;;  %v5589_v5 = vld [vmem:[#allocation10 + $0x1b0] sm:$0xff]  }
 0x29c   : > { %v7255_v32 = vsel %vm357_vm4, %v2522_v58, %v2530_v27  ;;  %v2897_v60 = vor.u32 %v2896_v6, %v2893_v37  ;;  %2160 = vst [vmem:[#allocation3 + $0x100] sm:$0x8] %v2159_v10  ;;  %2207 = vst [vmem:[#allocation3 + $0xf8] sm:$0x10] %v2206_v23  ;;  %5195 = vmatpush3.bf16.msra.mxu0 %v5586_v15  ;;  %v2900_v17 = vshrl.u32 %v7234_v12, 16  ;;  %v2903_v58 = vshll.u32 %v7234_v12, 16 }
 0x29d   : > { %3967 = vmatprep.mubr.bf16.mxu0 %v7255_v32  ;;  %2210 = vst [vmem:[#allocation3 + $0x108] sm:$0x10] %v2209_v11  ;;  %v2908_v59 = vshrl.u32 %v2369_v2, 16  ;;  %v2911_v30 = vshll.u32 %v2369_v2, 16  ;;  %5196 = vmatprep.subr.bf16.mxu0 %v5588_v63  ;;  %v5591_v31 = vld [vmem:[#allocation10 + $0x1b8] sm:$0xff]  }
 0x29e   : > { %v5344_v0 = vpop.f32.mrb[16].mxu0  ;;  %v7275_v9 = vsel %vm962_vm1, %v2889_v24, %v2897_v60  ;;  %v2902_v37 = vrot.slane %v2900_v17, 4  ;;  %v2905_v6 = vrot.slane %v2903_v58, 5 }
 0x29f   : > { %v2019_v25 = vadd.f32 %v5344_v0, %v7080_v26  ;;  %v2010_v19 = vpop.f32.mrb[17].mxu0  ;;  %v2910_v3 = vrot.slane %v2908_v59, 4  ;;  %v2913_v62 = vrot.slane %v2911_v30, 5 }
 0x2a0   : > { %v2011_v22 = vadd.f32 %v7080_v26, %v2010_v19  ;;  %v5345_v4 = vpop.f32.mrb[18].mxu0  ;;  %5197 = vmatpush3.bf16.msra.mxu0 %v5589_v5  ;;  %v2906_v52 = vor.u32 %v2905_v6, %v2902_v37 }
 0x2a1   : > { %v2022_v51 = vadd.f32 %v5345_v4, %v7080_v26  ;;  %v2013_v40 = vpop.f32.mrb[19].mxu0  ;;  %v2091_v47 = vmax.f32 %v2019_v25, 0.0  ;;  %5198 = vmatprep.subr.bf16.mxu0 %v5590_v46  ;;  %v2914_v55 = vor.u32 %v2913_v62, %v2910_v3 }
 0x2a2   : > { %v2014_v7 = vadd.f32 %v7080_v26, %v2013_v40  ;;  %3815 = vmatmul.mubr.bf16.gmra.mrb[32].mxu1 %v7255_v32  ;;  %v2089_v39 = vmax.f32 %v2011_v22, 0.0 }
 0x2a3   : > { %v2092_v14 = vmax.f32 %v2022_v51, 0.0  ;;  %3968 = vmatmul.mubr.bf16.gmra.mrb[60].mxu0 %v7275_v9  ;;  %v7285_v51 = vsel %vm962_vm1, %v2906_v52, %v2914_v55 }
 0x2a4   : > { %v2090_v8 = vmax.f32 %v2014_v7, 0.0  ;;  %5199 = vmatpush3.bf16.msra.mxu0 %v5591_v31 }
 0x2a5   : > { %v2220_v57 = vpack.c.bf16 %v2092_v14, %v2091_v47  ;;  %5358 = vmatprep.subr.bf16.mxu0 %v7262_v41 }
 0x2a6   : > { %v2219_v34 = vpack.c.bf16 %v2090_v8, %v2089_v39 }
 0x2a7   : > { %v2252_v26 = vrot.slane %v2220_v57, 4 }
 0x2a8   : > { %v2251_v27 = vrot.slane %v2219_v34, 4 }
 0x2a9   : > { %2293 = vst [vmem:[#allocation3 + $0xa8] ss:$-4 sps:$4 sm:$0xff] %v2252_v26  }
 0x2aa   : > { %2291 = vst [vmem:[#allocation3 + $0x98] ss:$-4 sps:$4 sm:$0xff] %v2251_v27  }
 0x2b0   : > { %v7281_v10 = vld [vmem:[#allocation3 + $0xa0] sm:$0xf0]  ;;  %v2328_v25 = vld [vmem:[#allocation3 + $0xa8] sm:$0xf] }
 0x2b1   : > { %v2327_v12 = vld [vmem:[#allocation3 + $0xa0] sm:$0xf8]  ;;  %v2326_v29 = vld [vmem:[#allocation3 + $0x98] sm:$0xf]  ;;  %v2352_v15 = vld [vmem:[#allocation3 + $0x90] sm:$0xf0] }
 0x2b2   : > { %v2325_v0 = vld [vmem:[#allocation3 + $0x90] sm:$0xf8]  ;;  %v2726_v24 = vrot.slane %v2352_v15, 4  ;;  %v2727_v60 = vrot.slane %v2326_v29, 4  ;;  %v2541_v19 = vshrl.u32 %v2326_v29, 16  ;;  %v2544_v22 = vshll.u32 %v2326_v29, 16 }
 0x2b3   : > { %v2533_v23 = vshrl.u32 %v2325_v0, 16  ;;  %v2536_v11 = vshll.u32 %v2325_v0, 16  ;;  %v2729_v4 = vrot.slane %v7281_v10, 4  ;;  %v2550_v14 = vshrl.u32 %v2327_v12, 16  ;;  %v2370_v63 = vld [vmem:[#allocation3 + $0x98] sm:$0x1f] }
 0x2b4   : > { %v7288_v40 = vsel %vm913_vm2, %v2726_v24, %v2727_v60  ;;  %v2543_v39 = vrot.slane %v2541_v19, 3  ;;  %v2546_v8 = vrot.slane %v2544_v22, 4  ;;  %v2730_v2 = vrot.slane %v2328_v25, 4 }
 0x2b5   : > { %v2535_v7 = vrot.slane %v2533_v23, 3  ;;  %v2538_v47 = vrot.slane %v2536_v11, 4  ;;  %3822 = vmatprep.mubr.bf16.mxu1 %v7288_v40  ;;  %v2553_v57 = vshll.u32 %v2327_v12, 16  ;;  %v2552_v46 = vrot.slane %v2550_v14, 3 }
 0x2b6   : > { %v2558_v34 = vshrl.u32 %v2328_v25, 16  ;;  %v2561_v17 = vshll.u32 %v2328_v25, 16  ;;  %v2547_v26 = vor.u32 %v2546_v8, %v2543_v39  ;;  %v2917_v59 = vshrl.u32 %v2352_v15, 16  ;;  %v7305_v25 = vld [vmem:[#allocation9] ss:$0 sm:$0xff] }
 0x2b7   : > { %v2539_v5 = vor.u32 %v2538_v47, %v2535_v7  ;;  %v2555_v58 = vrot.slane %v2553_v57, 4  ;;  %v2920_v30 = vshll.u32 %v2352_v15, 16  ;;  %v2925_v37 = vshrl.u32 %v2370_v63, 16 }
 0x2b8   : > { %v2560_v27 = vrot.slane %v2558_v34, 3  ;;  %v2563_v31 = vrot.slane %v2561_v17, 4  ;;  %v2928_v6 = vshll.u32 %v2370_v63, 16  ;;  %v7295_v62 = vsel %vm913_vm2, %v2729_v4, %v2730_v2 }
 0x2b9   : > { %v7292_v3 = vsel %vm357_vm4, %v2539_v5, %v2547_v26  ;;  %v2556_v52 = vor.u32 %v2555_v58, %v2552_v46  ;;  %v2919_v55 = vrot.slane %v2917_v59, 4  ;;  %v2922_v29 = vrot.slane %v2920_v30, 5  ;;  %v2371_v46 = vld [vmem:[#allocation3 + $0xa8] sm:$0x1f] }
 0x2ba   : > { %3823 = vmatmul.mubr.bf16.gmra.mrb[36].mxu1 %v7292_v3  ;;  %3975 = vmatprep.mubr.bf16.mxu0 %v7292_v3  ;;  %v2564_v12 = vor.u32 %v2563_v31, %v2560_v27  ;;  %v2927_v0 = vrot.slane %v2925_v37, 4  ;;  %v2930_v15 = vrot.slane %v2928_v6, 5  ;;  %v2934_v26 = vshrl.u32 %v7281_v10, 16 }
 0x2bb   : > { %3830 = vmatprep.mubr.bf16.mxu1 %v7295_v62  ;;  %3976 = vmatmul.mubr.bf16.gmra.mrb[64].mxu0 %v7285_v51  ;;  %v2923_v23 = vor.u32 %v2922_v29, %v2919_v55  ;;  %v2937_v59 = vshll.u32 %v7281_v10, 16  ;;  %v2942_v30 = vshrl.u32 %v2371_v46, 16  ;;  %v2945_v27 = vshll.u32 %v2371_v46, 16 }
 0x2bc   : > { %v7302_v24 = vsel %vm357_vm4, %v2556_v52, %v2564_v12  ;;  %v2931_v11 = vor.u32 %v2930_v15, %v2927_v0  ;;  %v2936_v37 = vrot.slane %v2934_v26, 4 }
 0x2bd   : > { %7887 = vst [vmem:[#allocation18_spill] sm:$0xff] %v7302_v24  ;;  %3983 = vmatprep.mubr.bf16.mxu0 %v7302_v24  ;;  %v2939_v6 = vrot.slane %v2937_v59, 5  ;;  %v2944_v52 = vrot.slane %v2942_v30, 4  ;;  %v2947_v55 = vrot.slane %v2945_v27, 5 }
 0x2be   : > { %v5348_v60 = vpop.f32.mrb[20].mxu0  ;;  %v7313_v8 = vsel %vm962_vm1, %v2923_v23, %v2931_v11 }
 0x2bf   : > { %v2035_v19 = vadd.f32 %v7305_v25, %v5348_v60  ;;  %v2026_v22 = vpop.f32.mrb[21].mxu0  ;;  %v2940_v12 = vor.u32 %v2939_v6, %v2936_v37  ;;  %v2948_v29 = vor.u32 %v2947_v55, %v2944_v52 }
 0x2c0   : > { %v2027_v4 = vadd.f32 %v7305_v25, %v2026_v22  ;;  %v5349_v7 = vpop.f32.mrb[22].mxu0 }
 0x2c1   : > { %v2038_v47 = vadd.f32 %v7305_v25, %v5349_v7  ;;  %v2029_v14 = vpop.f32.mrb[23].mxu0  ;;  %v2095_v2 = vmax.f32 %v2035_v19, 0.0 }
 0x2c2   : > { %v2030_v39 = vadd.f32 %v7305_v25, %v2029_v14  ;;  %3831 = vmatmul.mubr.bf16.gmra.mrb[40].mxu1 %v7302_v24  ;;  %v2093_v63 = vmax.f32 %v2027_v4, 0.0 }
 0x2c3   : > { %v2096_v57 = vmax.f32 %v2038_v47, 0.0  ;;  %3984 = vmatmul.mubr.bf16.gmra.mrb[68].mxu0 %v7313_v8 }
 0x2c4   : > { %v2094_v5 = vmax.f32 %v2030_v39, 0.0 }
 0x2c5   : > { %v2222_v34 = vpack.c.bf16 %v2096_v57, %v2095_v2  ;;  %v7322_v2 = vsel %vm962_vm1, %v2940_v12, %v2948_v29 }
 0x2c6   : > { %v2221_v17 = vpack.c.bf16 %v2094_v5, %v2093_v63 }
 0x2c7   : > { %v2254_v58 = vrot.slane %v2222_v34, 4 }
 0x2c8   : > { %v2253_v31 = vrot.slane %v2221_v17, 4 }
 0x2c9   : > { %2297 = vst [vmem:[#allocation3 + $0xc8] ss:$-4 sps:$4 sm:$0xff] %v2254_v58  }
 0x2ca   : > { %2295 = vst [vmem:[#allocation3 + $0xb8] ss:$-4 sps:$4 sm:$0xff] %v2253_v31  }
 0x2d0   : > { %v7318_v0 = vld [vmem:[#allocation3 + $0xc0] sm:$0xf0]  ;;  %v2332_v7 = vld [vmem:[#allocation3 + $0xc8] sm:$0xf] }
 0x2d1   : > { %v2331_v15 = vld [vmem:[#allocation3 + $0xc0] sm:$0xf8]  ;;  %v2330_v60 = vld [vmem:[#allocation3 + $0xb8] sm:$0xf]  ;;  %v2354_v23 = vld [vmem:[#allocation3 + $0xb0] sm:$0xf0] }
 0x2d2   : > { %v2329_v11 = vld [vmem:[#allocation3 + $0xb0] sm:$0xf8]  ;;  %v2732_v19 = vrot.slane %v2354_v23, 4  ;;  %v2733_v22 = vrot.slane %v2330_v60, 4  ;;  %v2575_v47 = vshrl.u32 %v2330_v60, 16  ;;  %v2578_v14 = vshll.u32 %v2330_v60, 16 }
 0x2d3   : > { %v2567_v10 = vshrl.u32 %v2329_v11, 16  ;;  %v2570_v4 = vshll.u32 %v2329_v11, 16  ;;  %v2735_v39 = vrot.slane %v7318_v0, 4  ;;  %v2584_v46 = vshrl.u32 %v2331_v15, 16  ;;  %v2372_v59 = vld [vmem:[#allocation3 + $0xb8] sm:$0x1f] }
 0x2d4   : > { %v7325_v57 = vsel %vm913_vm2, %v2732_v19, %v2733_v22  ;;  %v2577_v34 = vrot.slane %v2575_v47, 3  ;;  %v2580_v17 = vrot.slane %v2578_v14, 4  ;;  %v2736_v26 = vrot.slane %v2332_v7, 4 }
 0x2d5   : > { %7888 = vst [vmem:[#allocation19_spill] sm:$0xff] %v7325_v57  ;;  %v2569_v63 = vrot.slane %v2567_v10, 3  ;;  %v2572_v5 = vrot.slane %v2570_v4, 4  ;;  %3838 = vmatprep.mubr.bf16.mxu1 %v7325_v57  ;;  %v2587_v58 = vshll.u32 %v2331_v15, 16  ;;  %v2586_v27 = vrot.slane %v2584_v46, 3 }
 0x2d6   : > { %v2592_v31 = vshrl.u32 %v2332_v7, 16  ;;  %v2595_v37 = vshll.u32 %v2332_v7, 16  ;;  %v2581_v6 = vor.u32 %v2580_v17, %v2577_v34  ;;  %v2951_v55 = vshrl.u32 %v2354_v23, 16 }
 0x2d7   : > { %v2573_v30 = vor.u32 %v2572_v5, %v2569_v63  ;;  %v2589_v52 = vrot.slane %v2587_v58, 4  ;;  %v2954_v12 = vshll.u32 %v2354_v23, 16  ;;  %v2959_v11 = vshrl.u32 %v2372_v59, 16 }
 0x2d8   : > { %v2594_v29 = vrot.slane %v2592_v31, 3  ;;  %v2597_v60 = vrot.slane %v2595_v37, 4  ;;  %v2962_v19 = vshll.u32 %v2372_v59, 16  ;;  %v7332_v10 = vsel %vm913_vm2, %v2735_v39, %v2736_v26 }
 0x2d9   : > { %v7329_v22 = vsel %vm357_vm4, %v2573_v30, %v2581_v6  ;;  %7890 = vst [vmem:[#allocation21_spill] sm:$0xff] %v7332_v10  ;;  %v2590_v15 = vor.u32 %v2589_v52, %v2586_v27  ;;  %v2953_v4 = vrot.slane %v2951_v55, 4  ;;  %v2956_v47 = vrot.slane %v2954_v12, 5  ;;  %v2373_v12 = vld [vmem:[#allocation3 + $0xc8] sm:$0x1f] }
 0x2da   : > { %7889 = vst [vmem:[#allocation20_spill] sm:$0xff] %v7329_v22  ;;  %3839 = vmatmul.mubr.bf16.gmra.mrb[44].mxu1 %v7329_v22  ;;  %3991 = vmatprep.mubr.bf16.mxu0 %v7329_v22  ;;  %v2598_v7 = vor.u32 %v2597_v60, %v2594_v29  ;;  %v2961_v14 = vrot.slane %v2959_v11, 4  ;;  %v2964_v23 = vrot.slane %v2962_v19, 5  ;;  %v2968_v11 = vshrl.u32 %v7318_v0, 16 }
 0x2db   : > { %3846 = vmatprep.mubr.bf16.mxu1 %v7332_v10  ;;  %3992 = vmatmul.mubr.bf16.gmra.mrb[72].mxu0 %v7322_v2  ;;  %v2957_v5 = vor.u32 %v2956_v47, %v2953_v4  ;;  %v2976_v4 = vshrl.u32 %v2373_v12, 16 }
 0x2dc   : > { %v7339_v63 = vsel %vm357_vm4, %v2590_v15, %v2598_v7  ;;  %v2965_v46 = vor.u32 %v2964_v23, %v2961_v14  ;;  %v2971_v15 = vshll.u32 %v7318_v0, 16  ;;  %v2979_v7 = vshll.u32 %v2373_v12, 16 }
 0x2dd   : > { %7891 = vst [vmem:[#allocation22_spill] sm:$0xff] %v7339_v63  ;;  %3999 = vmatprep.mubr.bf16.mxu0 %v7339_v63  ;;  %v2970_v14 = vrot.slane %v2968_v11, 4 }
 0x2de   : > { %v5352_v39 = vpop.f32.mrb[24].mxu0  ;;  %v7348_v31 = vsel %vm962_vm1, %v2957_v5, %v2965_v46  ;;  %v2973_v23 = vrot.slane %v2971_v15, 5  ;;  %v2981_v5 = vrot.slane %v2979_v7, 5 }
 0x2df   : > { %v2051_v34 = vadd.f32 %v7305_v25, %v5352_v39  ;;  %v2042_v17 = vpop.f32.mrb[25].mxu0  ;;  %7892 = vst [vmem:[#allocation23_spill] sm:$0xff] %v7348_v31  ;;  %v2978_v39 = vrot.slane %v2976_v4, 4 }
 0x2e0   : > { %v2043_v26 = vadd.f32 %v7305_v25, %v2042_v17  ;;  %v5353_v58 = vpop.f32.mrb[26].mxu0  ;;  %v2974_v46 = vor.u32 %v2973_v23, %v2970_v14 }
 0x2e1   : > { %v2054_v59 = vadd.f32 %v7305_v25, %v5353_v58  ;;  %v2045_v30 = vpop.f32.mrb[27].mxu0  ;;  %v2099_v37 = vmax.f32 %v2051_v34, 0.0  ;;  %v2982_v34 = vor.u32 %v2981_v5, %v2978_v39 }
 0x2e2   : > { %v2046_v27 = vadd.f32 %v7305_v25, %v2045_v30  ;;  %3847 = vmatmul.mubr.bf16.gmra.mrb[48].mxu1 %v7339_v63  ;;  %v2097_v52 = vmax.f32 %v2043_v26, 0.0 }
 0x2e3   : > { %v2100_v6 = vmax.f32 %v2054_v59, 0.0  ;;  %4000 = vmatmul.mubr.bf16.gmra.mrb[76].mxu0 %v7348_v31 }
 0x2e4   : > { %v2098_v55 = vmax.f32 %v2046_v27, 0.0 }
 0x2e5   : > { %v2224_v29 = vpack.c.bf16 %v2100_v6, %v2099_v37 }
 0x2e6   : > { %v2223_v60 = vpack.c.bf16 %v2098_v55, %v2097_v52 }
 0x2e7   : > { %v2256_v19 = vrot.slane %v2224_v29, 4 }
 0x2e8   : > { %v2255_v47 = vrot.slane %v2223_v60, 4  ;;  %v7357_v60 = vsel %vm962_vm1, %v2974_v46, %v2982_v34 }
 0x2e9   : > { %2301 = vst [vmem:[#allocation3 + $0xe8] ss:$-4 sps:$4 sm:$0xff] %v2256_v19   ;;  %7893 = vst [vmem:[#allocation24_spill] sm:$0xff] %v7357_v60 }
 0x2ea   : > { %2299 = vst [vmem:[#allocation3 + $0xd8] ss:$-4 sps:$4 sm:$0xff] %v2255_v47  }
 0x2f0   : > { %v7353_v17 = vld [vmem:[#allocation3 + $0xe0] sm:$0xf0]  ;;  %v2336_v52 = vld [vmem:[#allocation3 + $0xe8] sm:$0xf] }
 0x2f1   : > { %v2335_v26 = vld [vmem:[#allocation3 + $0xe0] sm:$0xf8]  ;;  %v2334_v58 = vld [vmem:[#allocation3 + $0xd8] sm:$0xf]  ;;  %v2356_v59 = vld [vmem:[#allocation3 + $0xd0] sm:$0xf0] }
 0x2f2   : > { %v2333_v30 = vld [vmem:[#allocation3 + $0xd0] sm:$0xf8]  ;;  %v2738_v27 = vrot.slane %v2356_v59, 4  ;;  %v2739_v37 = vrot.slane %v2334_v58, 4  ;;  %v2609_v55 = vshrl.u32 %v2334_v58, 16  ;;  %v2612_v12 = vshll.u32 %v2334_v58, 16 }
 0x2f3   : > { %v2601_v0 = vshrl.u32 %v2333_v30, 16  ;;  %v2604_v6 = vshll.u32 %v2333_v30, 16  ;;  %v2741_v29 = vrot.slane %v7353_v17, 4  ;;  %v2618_v4 = vshrl.u32 %v2335_v26, 16  ;;  %v2374_v39 = vld [vmem:[#allocation3 + $0xd8] sm:$0x1f] }
 0x2f4   : > { %v7360_v11 = vsel %vm913_vm2, %v2738_v27, %v2739_v37  ;;  %v2611_v7 = vrot.slane %v2609_v55, 3  ;;  %v2614_v47 = vrot.slane %v2612_v12, 4  ;;  %v2742_v14 = vrot.slane %v2336_v52, 4 }
 0x2f5   : > { %7894 = vst [vmem:[#allocation25_spill] sm:$0xff] %v7360_v11  ;;  %v2603_v19 = vrot.slane %v2601_v0, 3  ;;  %v2606_v15 = vrot.slane %v2604_v6, 4  ;;  %3854 = vmatprep.mubr.bf16.mxu1 %v7360_v11  ;;  %v2621_v23 = vshll.u32 %v2335_v26, 16  ;;  %v2620_v58 = vrot.slane %v2618_v4, 3 }
 0x2f6   : > { %v2626_v30 = vshrl.u32 %v2336_v52, 16  ;;  %v2629_v63 = vshll.u32 %v2336_v52, 16  ;;  %v2615_v10 = vor.u32 %v2614_v47, %v2611_v7  ;;  %v2985_v34 = vshrl.u32 %v2356_v59, 16 }
 0x2f7   : > { %v2607_v5 = vor.u32 %v2606_v15, %v2603_v19  ;;  %v2623_v46 = vrot.slane %v2621_v23, 4  ;;  %v2988_v22 = vshll.u32 %v2356_v59, 16  ;;  %v2993_v0 = vshrl.u32 %v2374_v39, 16 }
 0x2f8   : > { %v2628_v27 = vrot.slane %v2626_v30, 3  ;;  %v2631_v37 = vrot.slane %v2629_v63, 4  ;;  %v2996_v6 = vshll.u32 %v2374_v39, 16  ;;  %v7367_v55 = vsel %vm913_vm2, %v2741_v29, %v2742_v14 }
 0x2f9   : > { %v7364_v57 = vsel %vm357_vm4, %v2607_v5, %v2615_v10  ;;  %7896 = vst [vmem:[#allocation27_spill] sm:$0xff] %v7367_v55  ;;  %v2624_v26 = vor.u32 %v2623_v46, %v2620_v58  ;;  %v2987_v12 = vrot.slane %v2985_v34, 4  ;;  %v2990_v19 = vrot.slane %v2988_v22, 5 }
 0x2fa   : > { %7895 = vst [vmem:[#allocation26_spill] sm:$0xff] %v7364_v57  ;;  %3855 = vmatmul.mubr.bf16.gmra.mrb[52].mxu1 %v7364_v57  ;;  %4007 = vmatprep.mubr.bf16.mxu0 %v7364_v57  ;;  %v2632_v52 = vor.u32 %v2631_v37, %v2628_v27  ;;  %v2995_v15 = vrot.slane %v2993_v0, 4  ;;  %v2998_v59 = vrot.slane %v2996_v6, 5  ;;  %v2375_v6 = vld [vmem:[#allocation3 + $0xe8] sm:$0x1f] }
 0x2fb   : > { %3862 = vmatprep.mubr.bf16.mxu1 %v7367_v55  ;;  %4008 = vmatmul.mubr.bf16.gmra.mrb[80].mxu0 %v7357_v60  ;;  %v2991_v29 = vor.u32 %v2990_v19, %v2987_v12  ;;  %v3010_v19 = vshrl.u32 %v2375_v6, 16 }
 0x2fc   : > { %v7374_v10 = vsel %vm357_vm4, %v2624_v26, %v2632_v52  ;;  %v2999_v4 = vor.u32 %v2998_v59, %v2995_v15  ;;  %v3002_v52 = vshrl.u32 %v7353_v17, 16  ;;  %v3013_v15 = vshll.u32 %v2375_v6, 16  ;;  %v7388_v59 = vld [vmem:[#allocation12] ss:$0 sm:$0xff] }
 0x2fd   : > { %7897 = vst [vmem:[#allocation28_spill] sm:$0xff] %v7374_v10  ;;  %4015 = vmatprep.mubr.bf16.mxu0 %v7374_v10 }
 0x2fe   : > { %v5356_v63 = vpop.f32.mrb[28].mxu0  ;;  %v7383_v58 = vsel %vm962_vm1, %v2991_v29, %v2999_v4  ;;  %v7390_v29 = vrot.slane %v3002_v52, 4 }
 0x2ff   : > { %v2067_v7 = vadd.f32 %v7305_v25, %v5356_v63  ;;  %v2058_v47 = vpop.f32.mrb[29].mxu0  ;;  %7898 = vst [vmem:[#allocation29_spill] sm:$0xff] %v7383_v58 }
 0x300   : > { %v2059_v14 = vadd.f32 %v7305_v25, %v2058_v47  ;;  %v5357_v22 = vpop.f32.mrb[30].mxu0  ;;  %v7396_v47 = vrot.slane %v3013_v15, 5 }
 0x301   : > { %v2070_v23 = vadd.f32 %v7305_v25, %v5357_v22  ;;  %v2061_v39 = vpop.f32.mrb[31].mxu0  ;;  %v2103_v30 = vmax.f32 %v2067_v7, 0.0  ;;  %v7394_v7 = vrot.slane %v3010_v19, 4 }
 0x302   : > { %v2062_v5 = vadd.f32 %v7305_v25, %v2061_v39  ;;  %3863 = vmatmul.mubr.bf16.gmra.mrb[56].mxu1 %v7374_v10  ;;  %v2101_v34 = vmax.f32 %v2059_v14, 0.0  ;;  %v3005_v25 = vshll.u32 %v7353_v17, 16  ;;  %v3753_v14 = vadd.f32 %v7230_v42, %v7388_v59 }
 0x303   : > { %v2104_v46 = vmax.f32 %v2070_v23, 0.0  ;;  %4016 = vmatmul.mubr.bf16.gmra.mrb[84].mxu0 %v7383_v58  ;;  %v3016_v42 = vor.u32 %v7396_v47, %v7394_v7 }
 0x304   : > { %v2102_v27 = vmax.f32 %v2062_v5, 0.0  ;;  %v7392_v4 = vrot.slane %v3005_v25, 5 }
 0x305   : > { %v2226_v37 = vpack.c.bf16 %v2104_v46, %v2103_v30  ;;  %v3756_v30 = vadd.f32 %v7232_v43, %v7388_v59 }
 0x306   : > { %v2225_v0 = vpack.c.bf16 %v2102_v27, %v2101_v34  ;;  %v3008_v52 = vor.u32 %v7392_v4, %v7390_v29 }
 0x307   : > { %v2258_v26 = vrot.slane %v2226_v37, 4 }
 0x308   : > { %v2257_v12 = vrot.slane %v2225_v0, 4 }
 0x309   : > { %2305 = vst [vmem:[#allocation3 + $0x108] ss:$-4 sps:$4 sm:$0xff] %v2258_v26  }
 0x30a   : > { %2303 = vst [vmem:[#allocation3 + $0xf8] ss:$-4 sps:$4 sm:$0xff] %v2257_v12  }
 0x30d   : > { %v4870_v63 = vpop.f32.mrb[4].mxu1 }
 0x30e   : > { %v4871_v22 = vpop.f32.mrb[5].mxu1  ;;  %v4976_v23 = vpop.f32.mrb[32].mxu0 }
 0x30f   : > { %v4872_v17 = vadd.f32 %v4871_v22, %v4870_v63  ;;  %v4873_v39 = vpop.f32.mrb[6].mxu1  ;;  %v4977_v5 = vpop.f32.mrb[33].mxu0 }
 0x310   : > { %v4874_v46 = vpop.f32.mrb[7].mxu1  ;;  %v4978_v34 = vadd.f32 %v4977_v5, %v4976_v23  ;;  %v4979_v27 = vpop.f32.mrb[34].mxu0  ;;  %v2339_v37 = vld [vmem:[#allocation3 + $0x100] sm:$0xf8]  ;;  %v7409_v10 = vld [vmem:[#allocation3 + $0x108] sm:$0xf] }
 0x311   : > { %v4875_v0 = vadd.f32 %v4874_v46, %v4873_v39  ;;  %v4980_v6 = vpop.f32.mrb[35].mxu0  ;;  %v2338_v26 = vld [vmem:[#allocation3 + $0xf8] sm:$0xf]  ;;  %v2358_v12 = vld [vmem:[#allocation3 + $0xf0] sm:$0xf0]  ;;  %v3052_v25 = vshrl.u32 %v2339_v37, 16  ;;  %v3761_v23 = vadd.f32 %v4872_v17, %v7388_v59 }
 0x312   : > { %v7406_v19 = vadd.f32 %v4978_v34, %v3753_v14  ;;  %v4981_v15 = vadd.f32 %v4980_v6, %v4979_v27  ;;  %v2744_v63 = vrot.slane %v2358_v12, 4  ;;  %v2745_v43 = vrot.slane %v2338_v26, 4  ;;  %v2337_v22 = vld [vmem:[#allocation3 + $0xf0] sm:$0xf8]  ;;  %7900 = vst [vmem:[#allocation31_spill] sm:$0xff] %v7409_v10 }
 0x313   : > { %v2635_v5 = vshrl.u32 %v2337_v22, 16  ;;  %v2638_v39 = vshll.u32 %v2337_v22, 16  ;;  %v2643_v46 = vshrl.u32 %v2338_v26, 16  ;;  %v2646_v4 = vshll.u32 %v2338_v26, 16  ;;  %v2376_v60 = vld [vmem:[#allocation3 + $0xf8] sm:$0x1f] }
 0x314   : > { %7899 = vst [vmem:[#allocation30_spill] sm:$0xff] %v7406_v19  ;;  %v7411_v55 = vadd.f32 %v4981_v15, %v3756_v30  ;;  %v7414_v29 = vsel %vm913_vm2, %v2744_v63, %v2745_v43  ;;  %v3054_v7 = vrot.slane %v3052_v25, 3  ;;  %v3055_v6 = vshll.u32 %v2339_v37, 16 }
 0x315   : > { %7902 = vst [vmem:[#allocation33_spill] sm:$0xff] %v7414_v29  ;;  %v4876_v47 = vpop.f32.mrb[8].mxu1  ;;  %3870 = vmatprep.mubr.bf16.mxu1 %v7414_v29  ;;  %v2637_v14 = vrot.slane %v2635_v5, 3  ;;  %v2640_v34 = vrot.slane %v2638_v39, 4  ;;  %v2645_v27 = vrot.slane %v2643_v46, 3  ;;  %v2648_v22 = vrot.slane %v2646_v4, 4 }
 0x316   : > { %7901 = vst [vmem:[#allocation32_spill] sm:$0xff] %v7411_v55  ;;  %v4877_v17 = vpop.f32.mrb[9].mxu1  ;;  %v4982_v19 = vpop.f32.mrb[36].mxu0  ;;  %v3060_v57 = vshrl.u32 %v7409_v10, 16  ;;  %v3063_v30 = vshll.u32 %v7409_v10, 16  ;;  %v3019_v15 = vshrl.u32 %v2358_v12, 16  ;;  %v3764_v4 = vadd.f32 %v4875_v0, %v7388_v59 }
 0x317   : > { %v7419_v55 = vadd.f32 %v4877_v17, %v4876_v47  ;;  %v4879_v63 = vpop.f32.mrb[10].mxu1  ;;  %v4983_v26 = vpop.f32.mrb[37].mxu0  ;;  %v2641_v25 = vor.u32 %v2640_v34, %v2637_v14  ;;  %v3057_v43 = vrot.slane %v3055_v6, 4  ;;  %v3022_v11 = vshll.u32 %v2358_v12, 16 }
 0x318   : > { %v4984_v29 = vadd.f32 %v4983_v26, %v4982_v19  ;;  %v4880_v5 = vpop.f32.mrb[11].mxu1  ;;  %v4985_v39 = vpop.f32.mrb[38].mxu0  ;;  %v2649_v46 = vor.u32 %v2648_v22, %v2645_v27  ;;  %v3062_v37 = vrot.slane %v3060_v57, 3  ;;  %v3065_v58 = vrot.slane %v3063_v30, 4  ;;  %v5595_v30 = vld [vmem:[#allocation10 + $0x220] sm:$0xff]  }
 0x319   : > { %v4881_v24 = vadd.f32 %v4880_v5, %v4879_v63  ;;  %v4986_v31 = vpop.f32.mrb[39].mxu0  ;;  %v7423_v10 = vsel %vm962_vm1, %v3008_v52, %v3016_v42  ;;  %v3058_v47 = vor.u32 %v3057_v43, %v3054_v7  ;;  %v3021_v57 = vrot.slane %v3019_v15, 4 }
 0x31a   : > { %v7425_v17 = vadd.f32 %v4984_v29, %v3761_v23  ;;  %v4987_v14 = vadd.f32 %v4986_v31, %v4985_v39  ;;  %v7428_v12 = vsel %vm357_vm4, %v2641_v25, %v2649_v46  ;;  %v3066_v19 = vor.u32 %v3065_v58, %v3062_v37  ;;  %v5592_v29 = vld [vmem:[#allocation10 + $0x208] sm:$0xff]  }
 0x31b   : > { %3871 = vmatmul.mubr.bf16.gmra.mrb[60].mxu1 %v7428_v12  ;;  %4023 = vmatprep.mubr.bf16.mxu0 %v7428_v12  ;;  %v3024_v34 = vrot.slane %v3022_v11, 5  ;;  %v3027_v0 = vshrl.u32 %v2376_v60, 16  ;;  %v3030_v27 = vshll.u32 %v2376_v60, 16  ;;  %v5594_v11 = vld [vmem:[#allocation10 + $0x218] sm:$0xff]   ;;  %v3772_v46 = vadd.f32 %v4881_v24, %v7388_v59 }
 0x31c   : > { %v7432_v6 = vadd.f32 %v4987_v14, %v3764_v4  ;;  %4024 = vmatmul.mubr.bf16.gmra.mrb[88].mxu0 %v7423_v10  ;;  %4072 = vmatprep.mubr.bf16.mxu1 %v7139_v45  ;;  %v7437_v31 = vsel %vm357_vm4, %v3058_v47, %v3066_v19  ;;  %v5593_v45 = vld [vmem:[#allocation10 + $0x210] sm:$0xff]  }
 0x31d   : > { %4031 = vmatprep.mubr.bf16.mxu0 %v7437_v31  ;;  %v3029_v58 = vrot.slane %v3027_v0, 4  ;;  %v3032_v52 = vrot.slane %v3030_v27, 5  ;;  %v3025_v42 = vor.u32 %v3024_v34, %v3021_v57  ;;  %v5597_v19 = vld [vmem:[#allocation10 + $0x230] sm:$0xff]  }
 0x31f   : > { %v3033_v23 = vor.u32 %v3032_v52, %v3029_v58 }
 0x321   : > { %v7442_v60 = vsel %vm962_vm1, %v3025_v42, %v3033_v23 }
 0x323   : > { %4073 = vmatmul.mubr.bf16.vlgmr.msra.gmra.mrb[64].mxu1 %v7113_v56 }
 0x324   : > { %5414 = vmatpush3.bf16.msra.mxu1 %v7262_v41  ;;  %4032 = vmatmul.mubr.bf16.gmra.mrb[92].mxu0 %v7442_v60 }
 0x325   : > { %4080 = vmatprep.mubr.bf16.mxu1 %v7148_v33  ;;  %4233 = vmatprep.mubr.bf16.mxu0 %v7118_v38 }
 0x326   : > { %5407 = vmatprep.subr.bf16.mxu1 %v5592_v29 }
 0x328   : > { %5415 = vmatpush3.bf16.msra.mxu1 %v5592_v29 }
 0x329   : > { %5408 = vmatprep.subr.bf16.mxu1 %v5593_v45 }
 0x32b   : > { %4081 = vmatmul.mubr.bf16.gmra.mrb[68].mxu1 %v7118_v38  ;;  %v3769_v38 = vadd.f32 %v7419_v55, %v7388_v59 }
 0x32c   : > { %4088 = vmatprep.mubr.bf16.mxu1 %v7182_v21  ;;  %4234 = vmatmul.mubr.bf16.vlgmr.msra.gmra.mrb[96].mxu0 %v7122_v44 }
 0x32d   : > { %4241 = vmatprep.mubr.bf16.mxu0 %v7151_v36  ;;  %v4882_v56 = vpop.f32.mrb[12].mxu1  ;;  %5416 = vmatpush3.bf16.msra.mxu1 %v5593_v45 }
 0x32e   : > { %v4883_v7 = vpop.f32.mrb[13].mxu1  ;;  %v4988_v22 = vpop.f32.mrb[40].mxu0  ;;  %5409 = vmatprep.subr.bf16.mxu1 %v5594_v11  ;;  %5359 = vmatpush3.bf16.msra.mxu0 %v7262_v41  ;;  %v5596_v41 = vld [vmem:[#allocation10 + $0x228] sm:$0xff]  }
 0x32f   : > { %v4884_v15 = vadd.f32 %v4883_v7, %v4882_v56  ;;  %v4885_v63 = vpop.f32.mrb[14].mxu1  ;;  %v4989_v26 = vpop.f32.mrb[41].mxu0  ;;  %5360 = vmatprep.subr.bf16.mxu0 %v5592_v29 }
 0x330   : > { %v4990_v25 = vadd.f32 %v4989_v26, %v4988_v22  ;;  %v4886_v43 = vpop.f32.mrb[15].mxu1  ;;  %v4991_v44 = vpop.f32.mrb[42].mxu0 }
 0x331   : > { %v4887_v5 = vadd.f32 %v4886_v43, %v4885_v63  ;;  %v4992_v39 = vpop.f32.mrb[43].mxu0  ;;  %5417 = vmatpush3.bf16.msra.mxu1 %v5594_v11 }
 0x332   : > { %v7456_v37 = vadd.f32 %v4990_v25, %v3769_v38  ;;  %v4993_v4 = vadd.f32 %v4992_v39, %v4991_v44  ;;  %5410 = vmatprep.subr.bf16.mxu1 %v5595_v30  ;;  %5361 = vmatpush3.bf16.msra.mxu0 %v5592_v29 }
 0x333   : > { %4089 = vmatmul.mubr.bf16.gmra.mrb[72].mxu1 %v7151_v36  ;;  %5362 = vmatprep.subr.bf16.mxu0 %v5593_v45  ;;  %v3777_v36 = vadd.f32 %v4884_v15, %v7388_v59  ;;  %v3780_v23 = vadd.f32 %v4887_v5, %v7388_v59 }
 0x334   : > { %v7459_v47 = vadd.f32 %v4993_v4, %v3772_v46  ;;  %4096 = vmatprep.mubr.bf16.mxu1 %v7191_v20  ;;  %4242 = vmatmul.mubr.bf16.gmra.mrb[100].mxu0 %v7155_v16 }
 0x335   : > { %4249 = vmatprep.mubr.bf16.mxu0 %v7158_v35  ;;  %v4888_v55 = vpop.f32.mrb[16].mxu1  ;;  %5418 = vmatpush3.bf16.msra.mxu1 %v5595_v30 }
 0x336   : > { %v4889_v24 = vpop.f32.mrb[17].mxu1  ;;  %v4994_v14 = vpop.f32.mrb[44].mxu0  ;;  %5411 = vmatprep.subr.bf16.mxu1 %v5596_v41  ;;  %5363 = vmatpush3.bf16.msra.mxu0 %v5593_v45  ;;  %v5598_v45 = vld [vmem:[#allocation10 + $0x238] sm:$0xff]  }
 0x337   : > { %v4890_v57 = vadd.f32 %v4889_v24, %v4888_v55  ;;  %v4891_v34 = vpop.f32.mrb[18].mxu1  ;;  %v4995_v0 = vpop.f32.mrb[45].mxu0  ;;  %5364 = vmatprep.subr.bf16.mxu0 %v5594_v11 }
 0x338   : > { %v4996_v27 = vadd.f32 %v4995_v0, %v4994_v14  ;;  %v4892_v58 = vpop.f32.mrb[19].mxu1  ;;  %v4997_v52 = vpop.f32.mrb[46].mxu0 }
 0x339   : > { %v4893_v42 = vadd.f32 %v4892_v58, %v4891_v34  ;;  %v4998_v16 = vpop.f32.mrb[47].mxu0  ;;  %5419 = vmatpush3.bf16.msra.mxu1 %v5596_v41  ;;  %v7903_v58 = vld [vmem:[#allocation23_spill] sm:$0xff] }
 0x33a   : > { %v7466_v29 = vadd.f32 %v4996_v27, %v3777_v36  ;;  %v4999_v56 = vadd.f32 %v4998_v16, %v4997_v52  ;;  %5412 = vmatprep.subr.bf16.mxu1 %v5597_v19  ;;  %5365 = vmatpush3.bf16.msra.mxu0 %v5594_v11  ;;  %v7905_v52 = vld [vmem:[#allocation19_spill] sm:$0xff] }
 0x33b   : > { %4097 = vmatmul.mubr.bf16.gmra.mrb[76].mxu1 %v7158_v35  ;;  %5366 = vmatprep.subr.bf16.mxu0 %v5595_v30 }
 0x33c   : > { %v7469_v7 = vadd.f32 %v4999_v56, %v3780_v23  ;;  %4104 = vmatprep.mubr.bf16.mxu1 %v7225_v50  ;;  %4250 = vmatmul.mubr.bf16.gmra.mrb[104].mxu0 %v7165_v28 }
 0x33d   : > { %4257 = vmatprep.mubr.bf16.mxu0 %v7194_v54  ;;  %5420 = vmatpush3.bf16.msra.mxu1 %v5597_v19 }
 0x33e   : > { %5413 = vmatprep.subr.bf16.mxu1 %v5598_v45  ;;  %5367 = vmatpush3.bf16.msra.mxu0 %v5595_v30 }
 0x33f   : > { %5368 = vmatprep.subr.bf16.mxu0 %v5596_v41 }
 0x341   : > { %5421 = vmatpush3.bf16.msra.mxu1 %v5598_v45 }
 0x342   : > { %5369 = vmatpush3.bf16.msra.mxu0 %v5596_v41 }
 0x343   : > { %4105 = vmatmul.mubr.bf16.gmra.mrb[80].mxu1 %v7194_v54  ;;  %5370 = vmatprep.subr.bf16.mxu0 %v5597_v19 }
 0x344   : > { %4112 = vmatprep.mubr.bf16.mxu1 %v7238_v48  ;;  %4258 = vmatmul.mubr.bf16.gmra.mrb[108].mxu0 %v7198_v49  ;;  %v3785_v49 = vadd.f32 %v4890_v57, %v7388_v59 }
 0x345   : > { %4265 = vmatprep.mubr.bf16.mxu0 %v7201_v13 }
 0x346   : > { %5371 = vmatpush3.bf16.msra.mxu0 %v5597_v19 }
 0x347   : > { %5372 = vmatprep.subr.bf16.mxu0 %v5598_v45 }
 0x34a   : > { %5373 = vmatpush3.bf16.msra.mxu0 %v5598_v45 }
 0x34b   : > { %4113 = vmatmul.mubr.bf16.gmra.mrb[84].mxu1 %v7201_v13  ;;  %v3788_v13 = vadd.f32 %v4893_v42, %v7388_v59 }
 0x34c   : > { %4120 = vmatprep.mubr.bf16.mxu1 %v7275_v9  ;;  %4266 = vmatmul.mubr.bf16.gmra.mrb[112].mxu0 %v7208_v1 }
 0x34d   : > { %4273 = vmatprep.mubr.bf16.mxu0 %v7241_v53  ;;  %v4894_v35 = vpop.f32.mrb[20].mxu1 }
 0x34e   : > { %v4895_v28 = vpop.f32.mrb[21].mxu1  ;;  %v5000_v54 = vpop.f32.mrb[48].mxu0 }
 0x34f   : > { %v4896_v11 = vadd.f32 %v4895_v28, %v4894_v35  ;;  %v4897_v22 = vpop.f32.mrb[22].mxu1  ;;  %v5001_v30 = vpop.f32.mrb[49].mxu0 }
 0x350   : > { %v5002_v15 = vadd.f32 %v5001_v30, %v5000_v54  ;;  %v4898_v63 = vpop.f32.mrb[23].mxu1  ;;  %v5003_v26 = vpop.f32.mrb[50].mxu0 }
 0x351   : > { %v4899_v38 = vadd.f32 %v4898_v63, %v4897_v22  ;;  %v5004_v25 = vpop.f32.mrb[51].mxu0  ;;  %v3793_v24 = vadd.f32 %v4896_v11, %v7388_v59  ;;  %v7907_v63 = vld [vmem:[#allocation20_spill] sm:$0xff] }
 0x352   : > { %v7484_v43 = vadd.f32 %v5002_v15, %v3785_v49  ;;  %v5005_v1 = vadd.f32 %v5004_v25, %v5003_v26  ;;  %v7906_v15 = vld [vmem:[#allocation24_spill] sm:$0xff]  ;;  %v7908_v26 = vld [vmem:[#allocation21_spill] sm:$0xff] }
 0x353   : > { %4121 = vmatmul.mubr.bf16.gmra.mrb[88].mxu1 %v7241_v53  ;;  %v3796_v0 = vadd.f32 %v4899_v38, %v7388_v59 }
 0x354   : > { %v7487_v44 = vadd.f32 %v5005_v1, %v3788_v13  ;;  %4128 = vmatprep.mubr.bf16.mxu1 %v7285_v51  ;;  %4274 = vmatmul.mubr.bf16.gmra.mrb[116].mxu0 %v7245_v61 }
 0x355   : > { %4281 = vmatprep.mubr.bf16.mxu0 %v7248_v18  ;;  %v4900_v5 = vpop.f32.mrb[24].mxu1 }
 0x356   : > { %v4901_v39 = vpop.f32.mrb[25].mxu1  ;;  %v5006_v46 = vpop.f32.mrb[52].mxu0 }
 0x357   : > { %v4902_v4 = vadd.f32 %v4901_v39, %v4900_v5  ;;  %v4903_v41 = vpop.f32.mrb[26].mxu1  ;;  %v5007_v55 = vpop.f32.mrb[53].mxu0 }
 0x358   : > { %v5008_v14 = vadd.f32 %v5007_v55, %v5006_v46  ;;  %v4904_v19 = vpop.f32.mrb[27].mxu1  ;;  %v5009_v57 = vpop.f32.mrb[54].mxu0 }
 0x359   : > { %v4905_v53 = vadd.f32 %v4904_v19, %v4903_v41  ;;  %v5010_v34 = vpop.f32.mrb[55].mxu0  ;;  %v3801_v45 = vadd.f32 %v4902_v4, %v7388_v59 }
 0x35a   : > { %v7494_v36 = vadd.f32 %v5008_v14, %v3793_v24  ;;  %v5011_v61 = vadd.f32 %v5010_v34, %v5009_v57 }
 0x35b   : > { %4129 = vmatmul.mubr.bf16.gmra.mrb[92].mxu1 %v7248_v18  ;;  %v7904_v18 = vld [vmem:[#allocation18_spill] sm:$0xff] }
 0x35c   : > { %v7497_v27 = vadd.f32 %v5011_v61, %v3796_v0  ;;  %4136 = vmatprep.mubr.bf16.mxu1 %v7313_v8  ;;  %4282 = vmatmul.mubr.bf16.gmra.mrb[120].mxu0 %v7255_v32  ;;  %v7909_v0 = vld [vmem:[#allocation29_spill] sm:$0xff]  ;;  %v7910_v61 = vld [vmem:[#allocation22_spill] sm:$0xff] }
 0x35d   : > { %4289 = vmatprep.mubr.bf16.mxu0 %v7288_v40 }
 0x363   : > { %4137 = vmatmul.mubr.bf16.gmra.mrb[96].mxu1 %v7288_v40 }
 0x364   : > { %4144 = vmatprep.mubr.bf16.mxu1 %v7322_v2  ;;  %4290 = vmatmul.mubr.bf16.gmra.mrb[124].mxu0 %v7292_v3 }
 0x365   : > { %4297 = vmatprep.mubr.bf16.mxu0 %v7295_v62 }
 0x36b   : > { %4145 = vmatmul.mubr.bf16.gmra.mrb[100].mxu1 %v7295_v62  ;;  %v3804_v62 = vadd.f32 %v4905_v53, %v7388_v59 }
 0x36c   : > { %4152 = vmatprep.mubr.bf16.mxu1 %v7903_v58  ;;  %4298 = vmatmul.mubr.bf16.gmra.mrb[128].mxu0 %v7904_v18  ;;  %v7911_v18 = vld [vmem:[#allocation25_spill] sm:$0xff] }
 0x36d   : > { %4305 = vmatprep.mubr.bf16.mxu0 %v7905_v52  ;;  %v4906_v42 = vpop.f32.mrb[28].mxu1 }
 0x36e   : > { %v4907_v32 = vpop.f32.mrb[29].mxu1  ;;  %v5012_v16 = vpop.f32.mrb[56].mxu0 }
 0x36f   : > { %v4908_v23 = vadd.f32 %v4907_v32, %v4906_v42  ;;  %v4909_v56 = vpop.f32.mrb[30].mxu1  ;;  %v5013_v40 = vpop.f32.mrb[57].mxu0  ;;  %v2359_v42 = vld [vmem:[#allocation3 + $0x100] sm:$0xf0]  ;;  %v2377_v32 = vld [vmem:[#allocation3 + $0x108] sm:$0x1f] }
 0x370   : > { %v5014_v35 = vadd.f32 %v5013_v40, %v5012_v16  ;;  %v4910_v3 = vpop.f32.mrb[31].mxu1  ;;  %v5015_v28 = vpop.f32.mrb[58].mxu0  ;;  %v7913_v16 = vld [vmem:[#allocation27_spill] sm:$0xff]  ;;  %v3084_v40 = vshrl.u32 %v2377_v32, 16 }
 0x371   : > { %v4911_v54 = vadd.f32 %v4910_v3, %v4909_v56  ;;  %v5016_v11 = vpop.f32.mrb[59].mxu0  ;;  %v3809_v46 = vadd.f32 %v4908_v23, %v7388_v59  ;;  %v3076_v23 = vshrl.u32 %v2359_v42, 16  ;;  %v3079_v56 = vshll.u32 %v2359_v42, 16 }
 0x372   : > { %v7512_v22 = vadd.f32 %v5014_v35, %v3801_v45  ;;  %v5017_v30 = vadd.f32 %v5016_v11, %v5015_v28  ;;  %v3087_v45 = vshll.u32 %v2377_v32, 16  ;;  %v3086_v28 = vrot.slane %v3084_v40, 4  ;;  %v7914_v11 = vld [vmem:[#allocation28_spill] sm:$0xff] }
 0x373   : > { %4153 = vmatmul.mubr.bf16.gmra.mrb[104].mxu1 %v7905_v52  ;;  %v3812_v19 = vadd.f32 %v4911_v54, %v7388_v59  ;;  %v7912_v52 = vld [vmem:[#allocation26_spill] sm:$0xff]  ;;  %v3078_v35 = vrot.slane %v3076_v23, 4  ;;  %v3081_v3 = vrot.slane %v3079_v56, 5  ;;  %v2341_v56 = vld [vmem:[#allocation3 + $0x110] sm:$0xf8] }
 0x374   : > { %v7515_v49 = vadd.f32 %v5017_v30, %v3804_v62  ;;  %4160 = vmatprep.mubr.bf16.mxu1 %v7906_v15  ;;  %4306 = vmatmul.mubr.bf16.gmra.mrb[132].mxu0 %v7907_v63  ;;  %v3089_v54 = vrot.slane %v3087_v45, 5  ;;  %v7915_v62 = vld [vmem:[#allocation33_spill] sm:$0xff] }
 0x375   : > { %4313 = vmatprep.mubr.bf16.mxu0 %v7908_v26  ;;  %v4912_v38 = vpop.f32.mrb[32].mxu1 }
 0x376   : > { %v4913_v25 = vpop.f32.mrb[33].mxu1  ;;  %v5018_v13 = vpop.f32.mrb[60].mxu0 }
 0x377   : > { %v4914_v1 = vadd.f32 %v4913_v25, %v4912_v38  ;;  %v4915_v5 = vpop.f32.mrb[34].mxu1  ;;  %v5019_v39 = vpop.f32.mrb[61].mxu0 }
 0x378   : > { %v5020_v4 = vadd.f32 %v5019_v39, %v5018_v13  ;;  %v4916_v41 = vpop.f32.mrb[35].mxu1  ;;  %v5021_v55 = vpop.f32.mrb[62].mxu0  ;;  %v3090_v39 = vor.u32 %v3089_v54, %v3086_v28  ;;  %v3097_v28 = vshll.u32 %v2341_v56, 16 }
 0x379   : > { %v4917_v24 = vadd.f32 %v4916_v41, %v4915_v5  ;;  %v5022_v14 = vpop.f32.mrb[63].mxu0  ;;  %v3082_v5 = vor.u32 %v3081_v3, %v3078_v35  ;;  %v3094_v3 = vshrl.u32 %v2341_v56, 16 }
 0x37a   : > { %v7522_v57 = vadd.f32 %v5020_v4, %v3809_v46  ;;  %v5023_v53 = vadd.f32 %v5022_v14, %v5021_v55  ;;  %v3817_v46 = vadd.f32 %v4914_v1, %v7388_v59  ;;  %v3071_v14 = vrot.slane %v2359_v42, 4  ;;  %v7547_v1 = vld [vmem:[#allocation3 + $0x110] sm:$0xf0] }
 0x37b   : > { %4161 = vmatmul.mubr.bf16.gmra.mrb[108].mxu1 %v7908_v26  ;;  %v3820_v32 = vadd.f32 %v4917_v24, %v7388_v59  ;;  %v7545_v40 = vsel %vm962_vm1, %v3082_v5, %v3090_v39 }
 0x37c   : > { %v7525_v34 = vadd.f32 %v5023_v53, %v3812_v19  ;;  %4168 = vmatprep.mubr.bf16.mxu1 %v7909_v0  ;;  %4314 = vmatmul.mubr.bf16.gmra.mrb[136].mxu0 %v7910_v61  ;;  %v7916_v19 = vld [vmem:[#allocation31_spill] sm:$0xff] }
 0x37d   : > { %4321 = vmatprep.mubr.bf16.mxu0 %v7911_v18  ;;  %v3072_v53 = vrot.slane %v7916_v19, 4  ;;  %v3099_v19 = vrot.slane %v3097_v28, 4 }
 0x37f   : > { %v3073_v42 = vsel %vm913_vm2, %v3071_v14, %v3072_v53  ;;  %v3096_v14 = vrot.slane %v3094_v3, 3 }
 0x383   : > { %4169 = vmatmul.mubr.bf16.gmra.mrb[112].mxu1 %v7911_v18 }
 0x384   : > { %4176 = vmatprep.mubr.bf16.mxu1 %v7423_v10  ;;  %4322 = vmatmul.mubr.bf16.gmra.mrb[140].mxu0 %v7912_v52  ;;  %v2342_v52 = vld [vmem:[#allocation3 + $0x118] sm:$0xf] }
 0x385   : > { %4329 = vmatprep.mubr.bf16.mxu0 %v7913_v16  ;;  %v3102_v24 = vshrl.u32 %v2342_v52, 16  ;;  %v3105_v54 = vshll.u32 %v2342_v52, 16 }
 0x387   : > { %v3107_v53 = vrot.slane %v3105_v54, 4 }
 0x38b   : > { %4177 = vmatmul.mubr.bf16.gmra.mrb[116].mxu1 %v7913_v16 }
 0x38c   : > { %4184 = vmatprep.mubr.bf16.mxu1 %v7442_v60  ;;  %4330 = vmatmul.mubr.bf16.gmra.mrb[144].mxu0 %v7914_v11 }
 0x38d   : > { %4337 = vmatprep.mubr.bf16.mxu0 %v7915_v62  ;;  %v4918_v30 = vpop.f32.mrb[36].mxu1 }
 0x38e   : > { %v4919_v63 = vpop.f32.mrb[37].mxu1  ;;  %v5024_v26 = vpop.f32.mrb[64].mxu0 }
 0x38f   : > { %v4920_v38 = vadd.f32 %v4919_v63, %v4918_v30  ;;  %v4921_v25 = vpop.f32.mrb[38].mxu1  ;;  %v5025_v13 = vpop.f32.mrb[65].mxu0  ;;  %v3113_v30 = vrot.slane %v7547_v1, 4  ;;  %v3114_v63 = vrot.slane %v2342_v52, 4 }
 0x390   : > { %v5026_v4 = vadd.f32 %v5025_v13, %v5024_v26  ;;  %v4922_v41 = vpop.f32.mrb[39].mxu1  ;;  %v5027_v55 = vpop.f32.mrb[66].mxu0 }
 0x391   : > { %v4923_v61 = vadd.f32 %v4922_v41, %v4921_v25  ;;  %v5028_v18 = vpop.f32.mrb[67].mxu0  ;;  %v3825_v5 = vadd.f32 %v4920_v38, %v7388_v59  ;;  %v3115_v52 = vsel %vm913_vm2, %v3113_v30, %v3114_v63  ;;  %v3100_v38 = vor.u32 %v3099_v19, %v3096_v14 }
 0x392   : > { %v7541_v16 = vadd.f32 %v5026_v4, %v3817_v46  ;;  %v5029_v23 = vadd.f32 %v5028_v18, %v5027_v55  ;;  %v3104_v4 = vrot.slane %v3102_v24, 3 }
 0x393   : > { %4185 = vmatmul.mubr.bf16.gmra.mrb[120].mxu1 %v7915_v62  ;;  %v3828_v18 = vadd.f32 %v4923_v61, %v7388_v59 }
 0x394   : > { %v7549_v45 = vadd.f32 %v5029_v23, %v3820_v32  ;;  %4192 = vmatprep.mubr.bf16.mxu1 %v7545_v40  ;;  %4338 = vmatmul.mubr.bf16.gmra.mrb[148].mxu0 %v7428_v12  ;;  %v3108_v24 = vor.u32 %v3107_v53, %v3104_v4 }
 0x395   : > { %4345 = vmatprep.mubr.bf16.mxu0 %v3073_v42  ;;  %v4924_v35 = vpop.f32.mrb[40].mxu1 }
 0x396   : > { %v4925_v11 = vpop.f32.mrb[41].mxu1  ;;  %v5030_v62 = vpop.f32.mrb[68].mxu0 }
 0x397   : > { %v4926_v26 = vadd.f32 %v4925_v11, %v4924_v35  ;;  %v4927_v25 = vpop.f32.mrb[42].mxu1  ;;  %v5031_v13 = vpop.f32.mrb[69].mxu0  ;;  %v3109_v35 = vsel %vm357_vm4, %v3100_v38, %v3108_v24 }
 0x398   : > { %v5032_v39 = vadd.f32 %v5031_v13, %v5030_v62  ;;  %v4928_v12 = vpop.f32.mrb[43].mxu1  ;;  %v5033_v46 = vpop.f32.mrb[70].mxu0 }
 0x399   : > { %v4929_v41 = vadd.f32 %v4928_v12, %v4927_v25  ;;  %v5034_v55 = vpop.f32.mrb[71].mxu0  ;;  %v3833_v54 = vadd.f32 %v4926_v26, %v7388_v59 }
 0x39a   : > { %v7557_v32 = vadd.f32 %v5032_v39, %v3825_v5  ;;  %v5035_v23 = vadd.f32 %v5034_v55, %v5033_v46 }
 0x39b   : > { %4193 = vmatmul.mubr.bf16.gmra.mrb[124].mxu1 %v3073_v42 }
 0x39c   : > { %v7560_v56 = vadd.f32 %v5035_v23, %v3828_v18  ;;  %4346 = vmatmul.mubr.bf16.gmra.mrb[152].mxu0 %v7437_v31  ;;  %5378 = vmatprep.mubr.bf16.mxu1 %v7191_v20  ;;  %v2378_v18 = vld [vmem:[#allocation3 + $0x118] sm:$0x1f]  ;;  %v3118_v23 = vshrl.u32 %v7547_v1, 16 }
 0x39d   : > { %4353 = vmatprep.mubr.bf16.mxu0 %v3115_v52  ;;  %v3121_v52 = vshll.u32 %v7547_v1, 16  ;;  %v3126_v38 = vshrl.u32 %v2378_v18, 16  ;;  %v3129_v24 = vshll.u32 %v2378_v18, 16 }
 0x3a3   : > { %5379 = vmatmul.mubr.bf16.vlgmr.msra.gmra.mrb[128].mxu1 %v7225_v50 }
 0x3a4   : > { %4354 = vmatmul.mubr.bf16.gmra.mrb[156].mxu0 %v3109_v35  ;;  %5382 = vmatprep.mubr.bf16.mxu1 %v7238_v48  ;;  %v3120_v35 = vrot.slane %v3118_v23, 4 }
 0x3a5   : > { %5374 = vmatprep.mubr.bf16.mxu0 %v7148_v33  ;;  %v3836_v33 = vadd.f32 %v4929_v41, %v7388_v59 }
 0x3ab   : > { %5383 = vmatmul.mubr.bf16.gmra.mrb[132].mxu1 %v7275_v9 }
 0x3ac   : > { %5375 = vmatmul.mubr.bf16.vlgmr.msra.gmra.mrb[160].mxu0 %v7182_v21  ;;  %5386 = vmatprep.mubr.bf16.mxu1 %v7285_v51 }
 0x3ad   : > { %v4930_v31 = vpop.f32.mrb[44].mxu1 }
 0x3ae   : > { %v4931_v20 = vpop.f32.mrb[45].mxu1  ;;  %v5036_v61 = vpop.f32.mrb[72].mxu0 }
 0x3af   : > { %v4932_v42 = vadd.f32 %v4931_v20, %v4930_v31  ;;  %v4933_v3 = vpop.f32.mrb[46].mxu1  ;;  %v5037_v28 = vpop.f32.mrb[73].mxu0  ;;  %v3123_v31 = vrot.slane %v3121_v52, 5  ;;  %v3128_v20 = vrot.slane %v3126_v38, 4 }
 0x3b0   : > { %v5038_v50 = vadd.f32 %v5037_v28, %v5036_v61  ;;  %v4934_v11 = vpop.f32.mrb[47].mxu1  ;;  %v5039_v62 = vpop.f32.mrb[74].mxu0  ;;  %v3131_v61 = vrot.slane %v3129_v24, 5 }
 0x3b1   : > { %v4935_v48 = vadd.f32 %v4934_v11, %v4933_v3  ;;  %v5040_v30 = vpop.f32.mrb[75].mxu0  ;;  %v3841_v12 = vadd.f32 %v4932_v42, %v7388_v59 }
 0x3b2   : > { %v7573_v9 = vadd.f32 %v5038_v50, %v3833_v54  ;;  %v5041_v21 = vadd.f32 %v5040_v30, %v5039_v62 }
 0x3b3   : > { %5387 = vmatmul.mubr.bf16.gmra.mrb[136].mxu1 %v7313_v8  ;;  %v3844_v19 = vadd.f32 %v4935_v48, %v7388_v59 }
 0x3b4   : > { %v7576_v51 = vadd.f32 %v5041_v21, %v3836_v33  ;;  %5390 = vmatprep.mubr.bf16.mxu1 %v7322_v2 }
 0x3b5   : > { %v4936_v63 = vpop.f32.mrb[48].mxu1 }
 0x3b6   : > { %v4937_v25 = vpop.f32.mrb[49].mxu1  ;;  %v5042_v13 = vpop.f32.mrb[76].mxu0 }
 0x3b7   : > { %v4938_v26 = vadd.f32 %v4937_v25, %v4936_v63  ;;  %v4939_v5 = vpop.f32.mrb[50].mxu1  ;;  %v5043_v39 = vpop.f32.mrb[77].mxu0 }
 0x3b8   : > { %v5044_v46 = vadd.f32 %v5043_v39, %v5042_v13  ;;  %v4940_v4 = vpop.f32.mrb[51].mxu1  ;;  %v5045_v41 = vpop.f32.mrb[78].mxu0 }
 0x3b9   : > { %v4941_v55 = vadd.f32 %v4940_v4, %v4939_v5  ;;  %v5046_v14 = vpop.f32.mrb[79].mxu0  ;;  %v3849_v1 = vadd.f32 %v4938_v26, %v7388_v59 }
 0x3ba   : > { %v7581_v8 = vadd.f32 %v5044_v46, %v3841_v12  ;;  %v5047_v53 = vadd.f32 %v5046_v14, %v5045_v41 }
 0x3bb   : > { %5391 = vmatmul.mubr.bf16.gmra.mrb[140].mxu1 %v7903_v58  ;;  %v3124_v58 = vor.u32 %v3123_v31, %v3120_v35 }
 0x3bc   : > { %v7584_v2 = vadd.f32 %v5047_v53, %v3844_v19  ;;  %5394 = vmatprep.mubr.bf16.mxu1 %v7906_v15  ;;  %v3132_v15 = vor.u32 %v3131_v61, %v3128_v20 }
 0x3be   : > { %v3133_v48 = vsel %vm962_vm1, %v3124_v58, %v3132_v15 }
 0x3c3   : > { %5395 = vmatmul.mubr.bf16.gmra.mrb[144].mxu1 %v7909_v0 }
 0x3c4   : > { %5398 = vmatprep.mubr.bf16.mxu1 %v7423_v10 }
 0x3cb   : > { %5399 = vmatmul.mubr.bf16.gmra.mrb[148].mxu1 %v7442_v60  ;;  %v3852_v60 = vadd.f32 %v4941_v55, %v7388_v59 }
 0x3cc   : > { %5402 = vmatprep.mubr.bf16.mxu1 %v7545_v40 }
 0x3cd   : > { %v4942_v42 = vpop.f32.mrb[52].mxu1 }
 0x3ce   : > { %v4943_v0 = vpop.f32.mrb[53].mxu1  ;;  %v5048_v3 = vpop.f32.mrb[80].mxu0 }
 0x3cf   : > { %v4944_v10 = vadd.f32 %v4943_v0, %v4942_v42  ;;  %v4945_v28 = vpop.f32.mrb[54].mxu1  ;;  %v5049_v54 = vpop.f32.mrb[81].mxu0 }
 0x3d0   : > { %v5050_v50 = vadd.f32 %v5049_v54, %v5048_v3  ;;  %v4946_v11 = vpop.f32.mrb[55].mxu1  ;;  %v5051_v62 = vpop.f32.mrb[82].mxu0 }
 0x3d1   : > { %v4947_v30 = vadd.f32 %v4946_v11, %v4945_v28  ;;  %v5052_v33 = vpop.f32.mrb[83].mxu0  ;;  %v3857_v46 = vadd.f32 %v4944_v10, %v7388_v59 }
 0x3d2   : > { %v7596_v40 = vadd.f32 %v5050_v50, %v3849_v1  ;;  %v5053_v21 = vadd.f32 %v5052_v33, %v5051_v62 }
 0x3d3   : > { %5403 = vmatmul.mubr.bf16.gmra.mrb[152].mxu1 %v3133_v48  ;;  %v3860_v55 = vadd.f32 %v4947_v30, %v7388_v59 }
 0x3d4   : > { %v7598_v63 = vadd.f32 %v5053_v21, %v3852_v60 }
 0x3d5   : > { %v4948_v25 = vpop.f32.mrb[56].mxu1 }
 0x3d6   : > { %v4949_v13 = vpop.f32.mrb[57].mxu1  ;;  %v5054_v5 = vpop.f32.mrb[84].mxu0 }
 0x3d7   : > { %v4950_v39 = vadd.f32 %v4949_v13, %v4948_v25  ;;  %v4951_v26 = vpop.f32.mrb[58].mxu1  ;;  %v5055_v12 = vpop.f32.mrb[85].mxu0 }
 0x3d8   : > { %v5056_v4 = vadd.f32 %v5055_v12, %v5054_v5  ;;  %v4952_v41 = vpop.f32.mrb[59].mxu1  ;;  %v5057_v14 = vpop.f32.mrb[86].mxu0 }
 0x3d9   : > { %v4953_v19 = vadd.f32 %v4952_v41, %v4951_v26  ;;  %v5058_v53 = vpop.f32.mrb[87].mxu0  ;;  %v3865_v58 = vadd.f32 %v4950_v39, %v7388_v59  ;;  %v7917_v39 = vld [vmem:[#allocation30_spill] sm:$0xff] }
 0x3da   : > { %v7602_v18 = vadd.f32 %v5056_v4, %v3857_v46  ;;  %v5059_v23 = vadd.f32 %v5058_v53, %v5057_v14 }
 0x3db   : > { %v3868_v28 = vadd.f32 %v4953_v19, %v7388_v59  ;;  %v7918_v19 = vld [vmem:[#allocation32_spill] sm:$0xff] }
 0x3dc   : > { %v7604_v52 = vadd.f32 %v5059_v23, %v3860_v55 }
 0x3ee   : > { %v4954_v38 = vpop.f32.mrb[60].mxu1 }
 0x3ef   : > { %v4955_v24 = vpop.f32.mrb[61].mxu1  ;;  %v5060_v35 = vpop.f32.mrb[88].mxu0 }
 0x3f0   : > { %v4956_v31 = vadd.f32 %v4955_v24, %v4954_v38  ;;  %v4957_v20 = vpop.f32.mrb[62].mxu1  ;;  %v5061_v61 = vpop.f32.mrb[89].mxu0 }
 0x3f1   : > { %v5062_v15 = vadd.f32 %v5061_v61, %v5060_v35  ;;  %v4958_v42 = vpop.f32.mrb[63].mxu1  ;;  %v5063_v0 = vpop.f32.mrb[90].mxu0 }
 0x3f2   : > { %v4959_v3 = vadd.f32 %v4958_v42, %v4957_v20  ;;  %v5064_v10 = vpop.f32.mrb[91].mxu0  ;;  %v3873_v21 = vadd.f32 %v4956_v31, %v7388_v59 }
 0x3f3   : > { %v7608_v54 = vadd.f32 %v5062_v15, %v3865_v58  ;;  %v5065_v1 = vadd.f32 %v5064_v10, %v5063_v0 }
 0x3f4   : > { %v3876_v4 = vadd.f32 %v4959_v3, %v7388_v59 }
 0x3f5   : > { %v7610_v50 = vadd.f32 %v5065_v1, %v3868_v28 }
 0x3f6   : > { %v5088_v11 = vpop.f32.mrb[64].mxu1 }
 0x3f7   : > { %v5066_v62 = vpop.f32.mrb[92].mxu0  ;;  %v5089_v48 = vpop.f32.mrb[65].mxu1 }
 0x3f8   : > { %v5090_v30 = vadd.f32 %v5089_v48, %v5088_v11  ;;  %v5067_v33 = vpop.f32.mrb[93].mxu0  ;;  %v5091_v60 = vpop.f32.mrb[66].mxu1 }
 0x3f9   : > { %v5068_v25 = vadd.f32 %v5067_v33, %v5066_v62  ;;  %v5069_v13 = vpop.f32.mrb[94].mxu0  ;;  %v5092_v5 = vpop.f32.mrb[67].mxu1 }
 0x3fa   : > { %v4075_v26 = vadd.f32 %v5090_v30, %v7917_v39  ;;  %v5093_v12 = vadd.f32 %v5092_v5, %v5091_v60  ;;  %v5070_v46 = vpop.f32.mrb[95].mxu0 }
 0x3fb   : > { %v7615_v41 = vadd.f32 %v5068_v25, %v3873_v21  ;;  %v5071_v14 = vadd.f32 %v5070_v46, %v5069_v13 }
 0x3fc   : > { %v4078_v53 = vadd.f32 %v5093_v12, %v7918_v19 }
 0x3fd   : > { %v7618_v55 = vadd.f32 %v5071_v14, %v3876_v4 }
 0x3fe   : > { %v5094_v23 = vpop.f32.mrb[68].mxu1 }
 0x3ff   : > { %v5095_v38 = vpop.f32.mrb[69].mxu1  ;;  %v5200_v24 = vpop.f32.mrb[96].mxu0 }
 0x400   : > { %v5096_v35 = vadd.f32 %v5095_v38, %v5094_v23  ;;  %v5097_v31 = vpop.f32.mrb[70].mxu1  ;;  %v5201_v20 = vpop.f32.mrb[97].mxu0 }
 0x401   : > { %v5202_v61 = vadd.f32 %v5201_v20, %v5200_v24  ;;  %v5098_v58 = vpop.f32.mrb[71].mxu1  ;;  %v5203_v15 = vpop.f32.mrb[98].mxu0 }
 0x402   : > { %v4083_v42 = vadd.f32 %v5096_v35, %v7425_v17  ;;  %v5099_v0 = vadd.f32 %v5098_v58, %v5097_v31  ;;  %v5204_v59 = vpop.f32.mrb[99].mxu0 }
 0x403   : > { %v5205_v3 = vadd.f32 %v5204_v59, %v5203_v15  ;;  %v7621_v10 = vadd.f32 %v5202_v61, %v4075_v26 }
 0x404   : > { %v4086_v28 = vadd.f32 %v5099_v0, %v7432_v6 }
 0x405   : > { %v7624_v1 = vadd.f32 %v5205_v3, %v4078_v53 }
 0x406   : > { %v5100_v11 = vpop.f32.mrb[72].mxu1 }
 0x407   : > { %v5101_v62 = vpop.f32.mrb[73].mxu1  ;;  %v5206_v48 = vpop.f32.mrb[100].mxu0 }
 0x408   : > { %v5102_v30 = vadd.f32 %v5101_v62, %v5100_v11  ;;  %v5103_v33 = vpop.f32.mrb[74].mxu1  ;;  %v5207_v60 = vpop.f32.mrb[101].mxu0 }
 0x409   : > { %v5208_v21 = vadd.f32 %v5207_v60, %v5206_v48  ;;  %v5104_v25 = vpop.f32.mrb[75].mxu1  ;;  %v5209_v13 = vpop.f32.mrb[102].mxu0 }
 0x40a   : > { %v4091_v17 = vadd.f32 %v5102_v30, %v7456_v37  ;;  %v5105_v5 = vadd.f32 %v5104_v25, %v5103_v33  ;;  %v5210_v39 = vpop.f32.mrb[103].mxu0 }
 0x40b   : > { %v5211_v12 = vadd.f32 %v5210_v39, %v5209_v13  ;;  %v7627_v26 = vadd.f32 %v5208_v21, %v4083_v42 }
 0x40c   : > { %v4094_v6 = vadd.f32 %v5105_v5, %v7459_v47 }
 0x40d   : > { %v7630_v46 = vadd.f32 %v5211_v12, %v4086_v28 }
 0x40e   : > { %v5106_v4 = vpop.f32.mrb[76].mxu1 }
 0x40f   : > { %v5107_v14 = vpop.f32.mrb[77].mxu1  ;;  %v5212_v19 = vpop.f32.mrb[104].mxu0 }
 0x410   : > { %v5108_v53 = vadd.f32 %v5107_v14, %v5106_v4  ;;  %v5109_v23 = vpop.f32.mrb[78].mxu1  ;;  %v5213_v38 = vpop.f32.mrb[105].mxu0 }
 0x411   : > { %v5214_v24 = vadd.f32 %v5213_v38, %v5212_v19  ;;  %v5110_v35 = vpop.f32.mrb[79].mxu1  ;;  %v5215_v31 = vpop.f32.mrb[106].mxu0 }
 0x412   : > { %v4099_v37 = vadd.f32 %v5108_v53, %v7466_v29  ;;  %v5111_v20 = vadd.f32 %v5110_v35, %v5109_v23  ;;  %v5216_v61 = vpop.f32.mrb[107].mxu0 }
 0x413   : > { %v5217_v58 = vadd.f32 %v5216_v61, %v5215_v31  ;;  %v7633_v15 = vadd.f32 %v5214_v24, %v4091_v17 }
 0x414   : > { %v4102_v47 = vadd.f32 %v5111_v20, %v7469_v7 }
 0x415   : > { %v7636_v42 = vadd.f32 %v5217_v58, %v4094_v6 }
 0x416   : > { %v5112_v0 = vpop.f32.mrb[80].mxu1 }
 0x417   : > { %v5113_v59 = vpop.f32.mrb[81].mxu1  ;;  %v5218_v3 = vpop.f32.mrb[108].mxu0 }
 0x418   : > { %v5114_v28 = vadd.f32 %v5113_v59, %v5112_v0  ;;  %v5115_v11 = vpop.f32.mrb[82].mxu1  ;;  %v5219_v62 = vpop.f32.mrb[109].mxu0 }
 0x419   : > { %v5220_v48 = vadd.f32 %v5219_v62, %v5218_v3  ;;  %v5116_v30 = vpop.f32.mrb[83].mxu1  ;;  %v5221_v33 = vpop.f32.mrb[110].mxu0 }
 0x41a   : > { %v4107_v29 = vadd.f32 %v5114_v28, %v7484_v43  ;;  %v5117_v60 = vadd.f32 %v5116_v30, %v5115_v11  ;;  %v5222_v21 = vpop.f32.mrb[111].mxu0 }
 0x41b   : > { %v5223_v25 = vadd.f32 %v5222_v21, %v5221_v33  ;;  %v7639_v13 = vadd.f32 %v5220_v48, %v4099_v37 }
 0x41c   : > { %v4110_v7 = vadd.f32 %v5117_v60, %v7487_v44 }
 0x41d   : > { %v7642_v17 = vadd.f32 %v5223_v25, %v4102_v47 }
 0x41e   : > { %v5118_v5 = vpop.f32.mrb[84].mxu1 }
 0x41f   : > { %v5119_v39 = vpop.f32.mrb[85].mxu1  ;;  %v5224_v12 = vpop.f32.mrb[112].mxu0 }
 0x420   : > { %v5120_v6 = vadd.f32 %v5119_v39, %v5118_v5  ;;  %v5121_v4 = vpop.f32.mrb[86].mxu1  ;;  %v5225_v14 = vpop.f32.mrb[113].mxu0 }
 0x421   : > { %v5226_v19 = vadd.f32 %v5225_v14, %v5224_v12  ;;  %v5122_v53 = vpop.f32.mrb[87].mxu1  ;;  %v5227_v23 = vpop.f32.mrb[114].mxu0 }
 0x422   : > { %v4115_v43 = vadd.f32 %v5120_v6, %v7494_v36  ;;  %v5123_v38 = vadd.f32 %v5122_v53, %v5121_v4  ;;  %v5228_v24 = vpop.f32.mrb[115].mxu0 }
 0x423   : > { %v5229_v35 = vadd.f32 %v5228_v24, %v5227_v23  ;;  %v7645_v31 = vadd.f32 %v5226_v19, %v4107_v29 }
 0x424   : > { %v4118_v44 = vadd.f32 %v5123_v38, %v7497_v27 }
 0x425   : > { %v7648_v37 = vadd.f32 %v5229_v35, %v4110_v7 }
 0x426   : > { %v5124_v20 = vpop.f32.mrb[88].mxu1 }
 0x427   : > { %v5125_v61 = vpop.f32.mrb[89].mxu1  ;;  %v5230_v58 = vpop.f32.mrb[116].mxu0 }
 0x428   : > { %v5126_v47 = vadd.f32 %v5125_v61, %v5124_v20  ;;  %v5127_v0 = vpop.f32.mrb[90].mxu1  ;;  %v5231_v59 = vpop.f32.mrb[117].mxu0 }
 0x429   : > { %v5232_v3 = vadd.f32 %v5231_v59, %v5230_v58  ;;  %v5128_v28 = vpop.f32.mrb[91].mxu1  ;;  %v5233_v11 = vpop.f32.mrb[118].mxu0 }
 0x42a   : > { %v4123_v36 = vadd.f32 %v5126_v47, %v7512_v22  ;;  %v5129_v62 = vadd.f32 %v5128_v28, %v5127_v0  ;;  %v5234_v48 = vpop.f32.mrb[119].mxu0 }
 0x42b   : > { %v5235_v30 = vadd.f32 %v5234_v48, %v5233_v11  ;;  %v7651_v33 = vadd.f32 %v5232_v3, %v4115_v43 }
 0x42c   : > { %v4126_v27 = vadd.f32 %v5129_v62, %v7515_v49 }
 0x42d   : > { %v7654_v29 = vadd.f32 %v5235_v30, %v4118_v44 }
 0x42e   : > { %v5130_v60 = vpop.f32.mrb[92].mxu1 }
 0x42f   : > { %v5131_v21 = vpop.f32.mrb[93].mxu1  ;;  %v5236_v25 = vpop.f32.mrb[120].mxu0 }
 0x430   : > { %v5132_v7 = vadd.f32 %v5131_v21, %v5130_v60  ;;  %v5133_v5 = vpop.f32.mrb[94].mxu1  ;;  %v5237_v39 = vpop.f32.mrb[121].mxu0 }
 0x431   : > { %v5238_v12 = vadd.f32 %v5237_v39, %v5236_v25  ;;  %v5134_v6 = vpop.f32.mrb[95].mxu1  ;;  %v5239_v4 = vpop.f32.mrb[122].mxu0 }
 0x432   : > { %v4131_v22 = vadd.f32 %v5132_v7, %v7522_v57  ;;  %v5135_v14 = vadd.f32 %v5134_v6, %v5133_v5  ;;  %v5240_v19 = vpop.f32.mrb[123].mxu0 }
 0x433   : > { %v5241_v53 = vadd.f32 %v5240_v19, %v5239_v4  ;;  %v7657_v23 = vadd.f32 %v5238_v12, %v4123_v36 }
 0x434   : > { %v4134_v49 = vadd.f32 %v5135_v14, %v7525_v34 }
 0x435   : > { %v7660_v43 = vadd.f32 %v5241_v53, %v4126_v27 }
 0x436   : > { %v5136_v38 = vpop.f32.mrb[96].mxu1 }
 0x437   : > { %v5137_v24 = vpop.f32.mrb[97].mxu1  ;;  %v5242_v35 = vpop.f32.mrb[124].mxu0 }
 0x438   : > { %v5138_v44 = vadd.f32 %v5137_v24, %v5136_v38  ;;  %v5139_v20 = vpop.f32.mrb[98].mxu1  ;;  %v5243_v61 = vpop.f32.mrb[125].mxu0 }
 0x439   : > { %v5244_v58 = vadd.f32 %v5243_v61, %v5242_v35  ;;  %v5140_v47 = vpop.f32.mrb[99].mxu1  ;;  %v5245_v0 = vpop.f32.mrb[126].mxu0 }
 0x43a   : > { %v4139_v57 = vadd.f32 %v5138_v44, %v7541_v16  ;;  %v5141_v59 = vadd.f32 %v5140_v47, %v5139_v20  ;;  %v5246_v3 = vpop.f32.mrb[127].mxu0 }
 0x43b   : > { %v5247_v28 = vadd.f32 %v5246_v3, %v5245_v0  ;;  %v7663_v11 = vadd.f32 %v5244_v58, %v4131_v22 }
 0x43c   : > { %v4142_v34 = vadd.f32 %v5141_v59, %v7549_v45 }
 0x43d   : > { %v7666_v36 = vadd.f32 %v5247_v28, %v4134_v49 }
 0x43e   : > { %v5142_v62 = vpop.f32.mrb[100].mxu1 }
 0x43f   : > { %v5143_v48 = vpop.f32.mrb[101].mxu1  ;;  %v5248_v30 = vpop.f32.mrb[128].mxu0 }
 0x440   : > { %v5144_v27 = vadd.f32 %v5143_v48, %v5142_v62  ;;  %v5145_v60 = vpop.f32.mrb[102].mxu1  ;;  %v5249_v21 = vpop.f32.mrb[129].mxu0 }
 0x441   : > { %v5250_v25 = vadd.f32 %v5249_v21, %v5248_v30  ;;  %v5146_v7 = vpop.f32.mrb[103].mxu1  ;;  %v5251_v5 = vpop.f32.mrb[130].mxu0 }
 0x442   : > { %v4147_v16 = vadd.f32 %v5144_v27, %v7557_v32  ;;  %v5147_v39 = vadd.f32 %v5146_v7, %v5145_v60  ;;  %v5252_v12 = vpop.f32.mrb[131].mxu0 }
 0x443   : > { %v5253_v6 = vadd.f32 %v5252_v12, %v5251_v5  ;;  %v7669_v4 = vadd.f32 %v5250_v25, %v4139_v57 }
 0x444   : > { %v4150_v45 = vadd.f32 %v5147_v39, %v7560_v56 }
 0x445   : > { %v7672_v22 = vadd.f32 %v5253_v6, %v4142_v34 }
 0x446   : > { %v5148_v14 = vpop.f32.mrb[104].mxu1 }
 0x447   : > { %v5149_v19 = vpop.f32.mrb[105].mxu1  ;;  %v5254_v53 = vpop.f32.mrb[132].mxu0 }
 0x448   : > { %v5150_v49 = vadd.f32 %v5149_v19, %v5148_v14  ;;  %v5151_v38 = vpop.f32.mrb[106].mxu1  ;;  %v5255_v24 = vpop.f32.mrb[133].mxu0 }
 0x449   : > { %v5256_v35 = vadd.f32 %v5255_v24, %v5254_v53  ;;  %v5152_v44 = vpop.f32.mrb[107].mxu1  ;;  %v5257_v20 = vpop.f32.mrb[134].mxu0 }
 0x44a   : > { %v4155_v32 = vadd.f32 %v5150_v49, %v7573_v9  ;;  %v5153_v61 = vadd.f32 %v5152_v44, %v5151_v38  ;;  %v5258_v58 = vpop.f32.mrb[135].mxu0 }
 0x44b   : > { %v5259_v47 = vadd.f32 %v5258_v58, %v5257_v20  ;;  %v7675_v0 = vadd.f32 %v5256_v35, %v4147_v16 }
 0x44c   : > { %v4158_v56 = vadd.f32 %v5153_v61, %v7576_v51 }
 0x44d   : > { %v7678_v57 = vadd.f32 %v5259_v47, %v4150_v45 }
 0x44e   : > { %v5154_v59 = vpop.f32.mrb[108].mxu1 }
 0x44f   : > { %v5155_v3 = vpop.f32.mrb[109].mxu1  ;;  %v5260_v28 = vpop.f32.mrb[136].mxu0 }
 0x450   : > { %v5156_v34 = vadd.f32 %v5155_v3, %v5154_v59  ;;  %v5157_v62 = vpop.f32.mrb[110].mxu1  ;;  %v5261_v48 = vpop.f32.mrb[137].mxu0 }
 0x451   : > { %v5262_v30 = vadd.f32 %v5261_v48, %v5260_v28  ;;  %v5158_v27 = vpop.f32.mrb[111].mxu1  ;;  %v5263_v60 = vpop.f32.mrb[138].mxu0 }
 0x452   : > { %v4163_v9 = vadd.f32 %v5156_v34, %v7581_v8  ;;  %v5159_v21 = vadd.f32 %v5158_v27, %v5157_v62  ;;  %v5264_v25 = vpop.f32.mrb[139].mxu0 }
 0x453   : > { %v5265_v7 = vadd.f32 %v5264_v25, %v5263_v60  ;;  %v7681_v5 = vadd.f32 %v5262_v30, %v4155_v32 }
 0x454   : > { %v4166_v51 = vadd.f32 %v5159_v21, %v7584_v2 }
 0x455   : > { %v7684_v16 = vadd.f32 %v5265_v7, %v4158_v56 }
 0x456   : > { %v5160_v39 = vpop.f32.mrb[112].mxu1 }
 0x457   : > { %v5161_v12 = vpop.f32.mrb[113].mxu1  ;;  %v5266_v6 = vpop.f32.mrb[140].mxu0 }
 0x458   : > { %v5162_v45 = vadd.f32 %v5161_v12, %v5160_v39  ;;  %v5163_v14 = vpop.f32.mrb[114].mxu1  ;;  %v5267_v19 = vpop.f32.mrb[141].mxu0 }
 0x459   : > { %v5268_v53 = vadd.f32 %v5267_v19, %v5266_v6  ;;  %v5164_v49 = vpop.f32.mrb[115].mxu1  ;;  %v5269_v38 = vpop.f32.mrb[142].mxu0 }
 0x45a   : > { %v4171_v8 = vadd.f32 %v5162_v45, %v7596_v40  ;;  %v5165_v24 = vadd.f32 %v5164_v49, %v5163_v14  ;;  %v5270_v35 = vpop.f32.mrb[143].mxu0 }
 0x45b   : > { %v5271_v44 = vadd.f32 %v5270_v35, %v5269_v38  ;;  %v7687_v20 = vadd.f32 %v5268_v53, %v4163_v9 }
 0x45c   : > { %v4174_v2 = vadd.f32 %v5165_v24, %v7598_v63 }
 0x45d   : > { %v7690_v32 = vadd.f32 %v5271_v44, %v4166_v51 }
 0x45e   : > { %v5166_v61 = vpop.f32.mrb[116].mxu1 }
 0x45f   : > { %v5167_v58 = vpop.f32.mrb[117].mxu1  ;;  %v5272_v47 = vpop.f32.mrb[144].mxu0 }
 0x460   : > { %v5168_v56 = vadd.f32 %v5167_v58, %v5166_v61  ;;  %v5169_v59 = vpop.f32.mrb[118].mxu1  ;;  %v5273_v3 = vpop.f32.mrb[145].mxu0 }
 0x461   : > { %v5274_v28 = vadd.f32 %v5273_v3, %v5272_v47  ;;  %v5170_v34 = vpop.f32.mrb[119].mxu1  ;;  %v5275_v62 = vpop.f32.mrb[146].mxu0 }
 0x462   : > { %v4179_v40 = vadd.f32 %v5168_v56, %v7602_v18  ;;  %v5171_v48 = vadd.f32 %v5170_v34, %v5169_v59  ;;  %v5276_v30 = vpop.f32.mrb[147].mxu0 }
 0x463   : > { %v5277_v27 = vadd.f32 %v5276_v30, %v5275_v62  ;;  %v7693_v60 = vadd.f32 %v5274_v28, %v4171_v8 }
 0x464   : > { %v4182_v63 = vadd.f32 %v5171_v48, %v7604_v52 }
 0x465   : > { %v7696_v9 = vadd.f32 %v5277_v27, %v4174_v2 }
 0x466   : > { %v5172_v21 = vpop.f32.mrb[120].mxu1 }
 0x467   : > { %v5173_v25 = vpop.f32.mrb[121].mxu1  ;;  %v5278_v7 = vpop.f32.mrb[148].mxu0 }
 0x468   : > { %v5174_v51 = vadd.f32 %v5173_v25, %v5172_v21  ;;  %v5175_v39 = vpop.f32.mrb[122].mxu1  ;;  %v5279_v12 = vpop.f32.mrb[149].mxu0 }
 0x469   : > { %v5280_v6 = vadd.f32 %v5279_v12, %v5278_v7  ;;  %v5176_v45 = vpop.f32.mrb[123].mxu1  ;;  %v5281_v14 = vpop.f32.mrb[150].mxu0 }
 0x46a   : > { %v4187_v18 = vadd.f32 %v5174_v51, %v7608_v54  ;;  %v5177_v19 = vadd.f32 %v5176_v45, %v5175_v39  ;;  %v5282_v53 = vpop.f32.mrb[151].mxu0 }
 0x46b   : > { %v5283_v49 = vadd.f32 %v5282_v53, %v5281_v14  ;;  %v7699_v38 = vadd.f32 %v5280_v6, %v4179_v40 }
 0x46c   : > { %v4190_v52 = vadd.f32 %v5177_v19, %v7610_v50 }
 0x46d   : > { %v7702_v8 = vadd.f32 %v5283_v49, %v4182_v63 }
 0x46e   : > { %v5178_v24 = vpop.f32.mrb[124].mxu1 }
 0x46f   : > { %v5179_v35 = vpop.f32.mrb[125].mxu1  ;;  %v5284_v44 = vpop.f32.mrb[152].mxu0 }
 0x470   : > { %v5180_v2 = vadd.f32 %v5179_v35, %v5178_v24  ;;  %v5181_v61 = vpop.f32.mrb[126].mxu1  ;;  %v5285_v58 = vpop.f32.mrb[153].mxu0 }
 0x471   : > { %v5286_v47 = vadd.f32 %v5285_v58, %v5284_v44  ;;  %v5182_v56 = vpop.f32.mrb[127].mxu1  ;;  %v5287_v59 = vpop.f32.mrb[154].mxu0 }
 0x472   : > { %v4195_v54 = vadd.f32 %v5180_v2, %v7615_v41  ;;  %v5183_v3 = vadd.f32 %v5182_v56, %v5181_v61  ;;  %v5288_v28 = vpop.f32.mrb[155].mxu0 }
 0x473   : > { %v5289_v34 = vadd.f32 %v5288_v28, %v5287_v59  ;;  %v7705_v62 = vadd.f32 %v5286_v47, %v4187_v18 }
 0x474   : > { %v4198_v50 = vadd.f32 %v5183_v3, %v7618_v55 }
 0x475   : > { %v7708_v40 = vadd.f32 %v5289_v34, %v4190_v52 }
 0x476   : > { %v5380_v48 = vpop.f32.mrb[128].mxu1 }
 0x477   : > { %v4421_v30 = vadd.f32 %v5380_v48, %v7639_v13  ;;  %v5290_v27 = vpop.f32.mrb[156].mxu0  ;;  %v4412_v63 = vpop.f32.mrb[129].mxu1 }
 0x478   : > { %v4413_v21 = vadd.f32 %v4412_v63, %v7633_v15  ;;  %v5291_v25 = vpop.f32.mrb[157].mxu0  ;;  %v5381_v7 = vpop.f32.mrb[130].mxu1 }
 0x479   : > { %v4529_v41 = vmax.f32 %v4421_v30, 0.0  ;;  %v5292_v51 = vadd.f32 %v5291_v25, %v5290_v27  ;;  %v4424_v39 = vadd.f32 %v5381_v7, %v7642_v17  ;;  %v5293_v12 = vpop.f32.mrb[158].mxu0  ;;  %v4415_v6 = vpop.f32.mrb[131].mxu1 }
 0x47a   : > { %v4527_v45 = vmax.f32 %v4413_v21, 0.0  ;;  %v4416_v55 = vadd.f32 %v4415_v6, %v7636_v42  ;;  %v5294_v14 = vpop.f32.mrb[159].mxu0 }
 0x47b   : > { %4561 = vst [vmem:[%s7716_s10 + $0x30] sm:$0xff] %v4529_v41  ;;  %v4530_v15 = vmax.f32 %v4424_v39, 0.0  ;;  %v5295_v13 = vadd.f32 %v5294_v14, %v5293_v12  ;;  %v7719_v18 = vadd.f32 %v5292_v51, %v4195_v54 }
 0x47c   : > { %4559 = vst [vmem:[%s7716_s10 + $0x20] sm:$0xff] %v4527_v45  ;;  %v4528_v17 = vmax.f32 %v4416_v55, 0.0 }
 0x47d   : > { %4562 = vst [vmem:[%s7716_s10 + $0x38] sm:$0xff] %v4530_v15  ;;  %v7723_v19 = vadd.f32 %v5295_v13, %v4198_v50 }
 0x47e   : > { %4560 = vst [vmem:[%s7716_s10 + $0x28] sm:$0xff] %v4528_v17  ;;  %v5384_v42 = vpop.f32.mrb[132].mxu1 }
 0x47f   : > { %v4437_v53 = vadd.f32 %v5384_v42, %v7651_v33  ;;  %v5376_v49 = vpop.f32.mrb[160].mxu0  ;;  %v4428_v52 = vpop.f32.mrb[133].mxu1 }
 0x480   : > { %v4405_v24 = vadd.f32 %v5376_v49, %v7627_v26  ;;  %v4429_v35 = vadd.f32 %v4428_v52, %v7645_v31  ;;  %v4396_v44 = vpop.f32.mrb[161].mxu0  ;;  %v5385_v2 = vpop.f32.mrb[134].mxu1 }
 0x481   : > { %v4533_v61 = vmax.f32 %v4437_v53, 0.0  ;;  %v4397_v58 = vadd.f32 %v4396_v44, %v7621_v10  ;;  %v4440_v47 = vadd.f32 %v5385_v2, %v7654_v29  ;;  %v5377_v56 = vpop.f32.mrb[162].mxu0  ;;  %v4431_v33 = vpop.f32.mrb[135].mxu1 }
 0x482   : > { %v4525_v59 = vmax.f32 %v4405_v24, 0.0  ;;  %v4531_v54 = vmax.f32 %v4429_v35, 0.0  ;;  %v4408_v26 = vadd.f32 %v5377_v56, %v7630_v46  ;;  %v4432_v31 = vadd.f32 %v4431_v33, %v7648_v37  ;;  %v4399_v3 = vpop.f32.mrb[163].mxu0 }
 0x483   : > { %4565 = vst [vmem:[%s7716_s10 + $0x50] sm:$0xff] %v4533_v61  ;;  %v4523_v28 = vmax.f32 %v4397_v58, 0.0  ;;  %v4534_v34 = vmax.f32 %v4440_v47, 0.0  ;;  %v4400_v10 = vadd.f32 %v4399_v3, %v7624_v1 }
 0x484   : > { %4557 = vst [vmem:[%s7716_s10 + $0x10] sm:$0xff] %v4525_v59  ;;  %4563 = vst [vmem:[%s7716_s10 + $0x40] sm:$0xff] %v4531_v54  ;;  %v4526_v29 = vmax.f32 %v4408_v26, 0.0  ;;  %v4532_v50 = vmax.f32 %v4432_v31, 0.0 }
 0x485   : > { %4555 = vst [vmem:[%s7716_s10] sm:$0xff] %v4523_v28  ;;  %4566 = vst [vmem:[%s7716_s10 + $0x58] sm:$0xff] %v4534_v34  ;;  %v4524_v48 = vmax.f32 %v4400_v10, 0.0 }
 0x486   : > { %4558 = vst [vmem:[%s7716_s10 + $0x18] sm:$0xff] %v4526_v29  ;;  %4564 = vst [vmem:[%s7716_s10 + $0x48] sm:$0xff] %v4532_v50  ;;  %v5388_v46 = vpop.f32.mrb[136].mxu1 }
 0x487   : > { %4556 = vst [vmem:[%s7716_s10 + $0x8] sm:$0xff] %v4524_v48  ;;  %v4453_v37 = vadd.f32 %v5388_v46, %v7663_v11  ;;  %v4444_v30 = vpop.f32.mrb[137].mxu1 }
 0x488   : > { %v4445_v1 = vadd.f32 %v4444_v30, %v7657_v23  ;;  %v5389_v27 = vpop.f32.mrb[138].mxu1 }
 0x489   : > { %v4537_v63 = vmax.f32 %v4453_v37, 0.0  ;;  %v4456_v21 = vadd.f32 %v5389_v27, %v7666_v36  ;;  %v4447_v25 = vpop.f32.mrb[139].mxu1 }
 0x48a   : > { %v4535_v7 = vmax.f32 %v4445_v1, 0.0  ;;  %v4448_v41 = vadd.f32 %v4447_v25, %v7660_v43 }
 0x48b   : > { %4569 = vst [vmem:[%s7716_s10 + $0x70] sm:$0xff] %v4537_v63  ;;  %v4538_v51 = vmax.f32 %v4456_v21, 0.0 }
 0x48c   : > { %4567 = vst [vmem:[%s7716_s10 + $0x60] sm:$0xff] %v4535_v7  ;;  %v4536_v39 = vmax.f32 %v4448_v41, 0.0 }
 0x48d   : > { %4570 = vst [vmem:[%s7716_s10 + $0x78] sm:$0xff] %v4538_v51 }
 0x48e   : > { %4568 = vst [vmem:[%s7716_s10 + $0x68] sm:$0xff] %v4536_v39  ;;  %v5392_v11 = vpop.f32.mrb[140].mxu1 }
 0x48f   : > { %v4469_v23 = vadd.f32 %v5392_v11, %v7675_v0  ;;  %v4460_v12 = vpop.f32.mrb[141].mxu1 }
 0x490   : > { %v4461_v36 = vadd.f32 %v4460_v12, %v7669_v4  ;;  %v5393_v6 = vpop.f32.mrb[142].mxu1 }
 0x491   : > { %v4541_v45 = vmax.f32 %v4469_v23, 0.0  ;;  %v4472_v43 = vadd.f32 %v5393_v6, %v7678_v57  ;;  %v4463_v55 = vpop.f32.mrb[143].mxu1 }
 0x492   : > { %v4539_v14 = vmax.f32 %v4461_v36, 0.0  ;;  %v4464_v15 = vadd.f32 %v4463_v55, %v7672_v22 }
 0x493   : > { %4573 = vst [vmem:[%s7716_s10 + $0x90] sm:$0xff] %v4541_v45  ;;  %v4542_v13 = vmax.f32 %v4472_v43, 0.0 }
 0x494   : > { %4571 = vst [vmem:[%s7716_s10 + $0x80] sm:$0xff] %v4539_v14  ;;  %v4540_v17 = vmax.f32 %v4464_v15, 0.0 }
 0x495   : > { %4574 = vst [vmem:[%s7716_s10 + $0x98] sm:$0xff] %v4542_v13 }
 0x496   : > { %4572 = vst [vmem:[%s7716_s10 + $0x88] sm:$0xff] %v4540_v17  ;;  %v5396_v0 = vpop.f32.mrb[144].mxu1 }
 0x497   : > { %v4485_v4 = vadd.f32 %v5396_v0, %v7687_v20  ;;  %v4476_v42 = vpop.f32.mrb[145].mxu1 }
 0x498   : > { %v4477_v57 = vadd.f32 %v4476_v42, %v7681_v5  ;;  %v5397_v53 = vpop.f32.mrb[146].mxu1 }
 0x499   : > { %v4545_v49 = vmax.f32 %v4485_v4, 0.0  ;;  %v4488_v22 = vadd.f32 %v5397_v53, %v7690_v32  ;;  %v4479_v52 = vpop.f32.mrb[147].mxu1 }
 0x49a   : > { %v4543_v24 = vmax.f32 %v4477_v57, 0.0  ;;  %v4480_v35 = vadd.f32 %v4479_v52, %v7684_v16 }
 0x49b   : > { %4577 = vst [vmem:[%s7716_s10 + $0xb0] sm:$0xff] %v4545_v49  ;;  %v4546_v44 = vmax.f32 %v4488_v22, 0.0 }
 0x49c   : > { %4575 = vst [vmem:[%s7716_s10 + $0xa0] sm:$0xff] %v4543_v24  ;;  %v4544_v2 = vmax.f32 %v4480_v35, 0.0 }
 0x49d   : > { %4578 = vst [vmem:[%s7716_s10 + $0xb8] sm:$0xff] %v4546_v44 }
 0x49e   : > { %4576 = vst [vmem:[%s7716_s10 + $0xa8] sm:$0xff] %v4544_v2  ;;  %v5400_v20 = vpop.f32.mrb[148].mxu1 }
 0x49f   : > { %v4501_v5 = vadd.f32 %v5400_v20, %v7699_v38  ;;  %v4492_v61 = vpop.f32.mrb[149].mxu1 }
 0x4a0   : > { %v4493_v32 = vadd.f32 %v4492_v61, %v7693_v60  ;;  %v5401_v58 = vpop.f32.mrb[150].mxu1 }
 0x4a1   : > { %v4549_v47 = vmax.f32 %v4501_v5, 0.0  ;;  %v4504_v16 = vadd.f32 %v5401_v58, %v7702_v8  ;;  %v4495_v56 = vpop.f32.mrb[151].mxu1 }
 0x4a2   : > { %v4547_v33 = vmax.f32 %v4493_v32, 0.0  ;;  %v4496_v59 = vadd.f32 %v4495_v56, %v7696_v9 }
 0x4a3   : > { %4581 = vst [vmem:[%s7716_s10 + $0xd0] sm:$0xff] %v4549_v47  ;;  %v4550_v54 = vmax.f32 %v4504_v16, 0.0 }
 0x4a4   : > { %4579 = vst [vmem:[%s7716_s10 + $0xc0] sm:$0xff] %v4547_v33  ;;  %v4548_v26 = vmax.f32 %v4496_v59, 0.0 }
 0x4a5   : > { %4582 = vst [vmem:[%s7716_s10 + $0xd8] sm:$0xff] %v4550_v54 }
 0x4a6   : > { %4580 = vst [vmem:[%s7716_s10 + $0xc8] sm:$0xff] %v4548_v26  ;;  %v5404_v38 = vpop.f32.mrb[152].mxu1 }
 0x4a7   : > { %v4517_v60 = vadd.f32 %v5404_v38, %v7719_v18  ;;  %v4508_v31 = vpop.f32.mrb[153].mxu1 }
 0x4a8   : > { %v4509_v8 = vadd.f32 %v4508_v31, %v7705_v62  ;;  %v5405_v3 = vpop.f32.mrb[154].mxu1 }
 0x4a9   : > { %v4553_v9 = vmax.f32 %v4517_v60, 0.0  ;;  %v4520_v28 = vadd.f32 %v5405_v3, %v7723_v19  ;;  %v4511_v34 = vpop.f32.mrb[155].mxu1 }
 0x4aa   : > { %v4551_v10 = vmax.f32 %v4509_v8, 0.0  ;;  %v4512_v29 = vadd.f32 %v4511_v34, %v7708_v40 }
 0x4ab   : > { %4585 = vst [vmem:[%s7716_s10 + $0xf0] sm:$0xff] %v4553_v9  ;;  %v4554_v50 = vmax.f32 %v4520_v28, 0.0 }
 0x4ac   : > { %4583 = vst [vmem:[%s7716_s10 + $0xe0] sm:$0xff] %v4551_v10  ;;  %v4552_v62 = vmax.f32 %v4512_v29, 0.0 }
 0x4ad   : > { %4586 = vst [vmem:[%s7716_s10 + $0xf8] sm:$0xff] %v4554_v50 }
 0x4ae   : > { %4584 = vst [vmem:[%s7716_s10 + $0xe8] sm:$0xff] %v4552_v62 }
 0x4af   : > { %5756 = shalt.err (!%p5753_p13)
}
 0x4b0   : > { %s5757_s8 = scalar_lea.hbm %s7784_s7, 4096  ;;  %s5761_s9 = scalar_lea.hbm %s7839_s5, 8192 }
 0x4b1   : > { %p5758_p9 = scmp.ne.s32.totalorder %s7784_s7, %s5757_s8  ;;  %p5762_p6 = scmp.lt.u32.totalorder %s7784_s7, %s7839_s5 }
 0x4b2   : > { %p5763_p4 = scmp.lt.u32.totalorder %s5761_s9, %s5757_s8  ;;  %p5765_p3 = scmp.lt.u32.totalorder %s5757_s8, %s7784_s7 }
 0x4b3   : > { %p5759_p0 = pnand %p5758_p9, %p6028_p10 }
 0x4b4   : > { %p5764_p8 = por %p5763_p4, %p5762_p6 }
 0x4b5   : > { %p5760_p11 = pneg %p5759_p0 }
 0x4b6   : > { %p5766_p5 = por %p5765_p3, %p5764_p8 }
 0x4b8   : > { %p5767_p7 = pnand %p5766_p5, %p5760_p11 }
 0x4ba   : > { %5770 = shalt.err (!%p5767_p7)
}
 0x4bb   : > { %s5838_s6 = smov 128  }
 0x4bc   : > { %5441 = dma.vmem_to_hbm [thread:$0]  (%p6028_p10), %s7787_s16, 4096, %s7784_s7, %s4588_s22, %s5838_s6, %s5838_s6, %s5830_s26  }
 0x4bd PF: > { %s4616_s29 = sand.u32 1, %s5805_s18   ;;  %p7919_p12 = scmp.ne.s32.totalorder %s7866_s25, 0 }
 0x4be   : > { %p7920_p2 = scmp.ge.s32.totalorder %s5817_s21, 2  ;;  %s4617_s17 = scalar_lea.sflag [#allocation6], %s4616_s29 }
 0x4c0   : > { %p5461_p1 = pnand %p7920_p2, %p7919_p12 }
 0x4c2   : > { %5800 = dma.done.wait (!%p5461_p1), %s4617_s17, 4096  }
 0x4c3   : > { %5802 = vsyncadd (!%p5461_p1), %s4617_s17, 4294963200  ;;  %p20_p13 = scmp.ge.s32.totalorder %s6018_s14, 4   ;;  %s7921_s18 = smov %s5809_s19 }
 0x4c4   : > { %s7922_s19 = smov %s5813_s20  ;;  %s7923_s20 = smov %s6034_s28 }
 0x4c5   : > { %s7924_s21 = smov %s6018_s14  ;;  %22 = sbr.rel (!%p20_p13) target bundleno = 7 (0x7), region = 105 }
 0x4cc   :  { %4622 = vsyncpa [#allocation5], 1 }
 0x4cd   :  { %4624 = vsyncpa [#allocation5 + $0x1], 1 }
 0x4ce   :  { %4625 = vsyncpa [#allocation8], 1 }
 0x4cf   :  { %4626 = vsyncpa [#allocation11], 1 }
 0x4d0   :  { %4627 = vsyncpa [#allocation6], 1 }
 0x4d1   :  { %4629 = vsyncpa [#allocation6 + $0x1], 1 }

</bundles_post_ra>
